<compile_context>
chip_gen: v5e
topology: v5e:2x2
jax: 0.10.0
libtpu: 0.0.40
codegen_flags: <defaults>
</compile_context>

<pallas_src>
import math
from functools import partial

import jax
import jax.numpy as jnp
import numpy as np
from jax.experimental import pallas as pl
from jax.experimental.pallas import tpu as pltpu

# ---------------- config (small, synthetic) ----------------
CONFIG = dict(
    num_hidden_layers=3,
    hidden_size=32,
    prun_hidden_size=32,
    prun_intermediate_size=64,
    num_attention_heads=4,
    num_labels=3,
    layer_norm_eps=1e-12,
    pooler_dense=True,           # CosteffPooler: tanh(dense(hidden[:, 0]))
    output_hidden_states=True,
    output_attentions=False,
    hidden_act="gelu_new",       # tanh-approx gelu
)


def _round_up(x, m):
    return ((x + m - 1) // m) * m


# ---------------- small math helpers (used inside kernel + reference) -------
def _gelu_new(x):
    return 0.5 * x * (1.0 + jnp.tanh(
        math.sqrt(2.0 / math.pi) * (x + 0.044715 * x * x * x)))


def _layernorm(x, gamma, beta, eps):
    mu = jnp.mean(x, axis=-1, keepdims=True)
    var = jnp.mean((x - mu) ** 2, axis=-1, keepdims=True)
    return (x - mu) * jax.lax.rsqrt(var + eps) * gamma + beta


# ---------------- fused encoder kernel (one batch element per grid step) ----
def _costeff_encoder_kernel(h_ref, mask_ref,
                            wqkv_ref, wao_ref, win_ref, wfo_ref, vec_ref,
                            hwp_ref, hwc_ref, hwv_ref,
                            hs_out_ref, exit_ref,
                            *, num_heads, head_size, eps, num_layers,
                            exit_layers):
    _, S, H = h_ref.shape                      # batch-block is 1 (grid over B)
    Hp = num_heads * head_size
    I = win_ref.shape[-1]
    NL = hwc_ref.shape[1]
    W2 = exit_ref.shape[-1]

    mask = mask_ref[...].reshape(1, 1, S)      # additive mask -> (1, 1, Sk)
    x = h_ref[...].reshape(S, H)               # hidden state stays in vregs

    if not exit_layers:                        # static: never return garbage
        exit_ref[...] = jnp.zeros_like(exit_ref)

    for layer in range(num_layers):            # static unroll over layers
        # --- fused QKV projection (wq/bq pre-scaled by 1/sqrt(head_size)) ---
        qkv = (jnp.dot(x, wqkv_ref[layer], preferred_element_type=jnp.float32)
               + vec_ref[layer, 0:1, 0:3 * Hp])
        q = qkv[:, 0:Hp].reshape(S, num_heads, head_size)
        k = qkv[:, Hp:2 * Hp].reshape(S, num_heads, head_size)
        v = qkv[:, 2 * Hp:3 * Hp].reshape(S, num_heads, head_size)

        # --- all heads in one batched einsum (head = batch dim), no scratch --
        scores = jnp.einsum('qhd,khd->hqk', q, k,
                            preferred_element_type=jnp.float32) + mask
        m = jnp.max(scores, axis=-1, keepdims=True)
        e = jnp.exp(scores - m)
        probs = e * pl.reciprocal(jnp.sum(e, axis=-1, keepdims=True),
                                  approx=True)
        ctx = jnp.einsum('hqk,khd->qhd', probs, v,
                         preferred_element_type=jnp.float32).reshape(S, Hp)

        # --- CosteffSelfOutput: dense + residual + LayerNorm ---
        attn = (jnp.dot(ctx, wao_ref[layer], preferred_element_type=jnp.float32)
                + vec_ref[layer, 2:3, 0:H])
        y = _layernorm(attn + x,
                       vec_ref[layer, 3:4, 0:H], vec_ref[layer, 4:5, 0:H], eps)

        # --- CosteffIntermediate (gelu_new) + CosteffOutput + LayerNorm ---
        ffh = _gelu_new(jnp.dot(y, win_ref[layer],
                                preferred_element_type=jnp.float32)
                        + vec_ref[layer, 1:2, 0:I])
        ffn = (jnp.dot(ffh, wfo_ref[layer], preferred_element_type=jnp.float32)
               + vec_ref[layer, 5:6, 0:H])
        x = _layernorm(ffn + y,
                       vec_ref[layer, 6:7, 0:H], vec_ref[layer, 7:8, 0:H], eps)

        hs_out_ref[layer] = x.reshape(1, S, H)

        # --- CosteffHighway exit (eval): pooler + classifier + entropy ---
        if layer in exit_layers:
            slot = exit_layers.index(layer)
            cls = x[0:1, :]                    # single sublane slice (1, H)
            pooled = jnp.tanh(
                jnp.dot(cls, hwp_ref[layer], preferred_element_type=jnp.float32)
                + hwv_ref[layer, 0:1, 0:H])
            # hw_wc is stored (NL, H) lane-dense -> contract on H directly.
            logits = (jnp.einsum('bh,nh->bn', pooled, hwc_ref[layer],
                                 preferred_element_type=jnp.float32)
                      + hwv_ref[layer, 1:2, 0:NL])
            # NaN-safe entropy: H = logsumexp(z) - sum(softmax(z) * z)
            lm = jnp.max(logits, axis=-1, keepdims=True)
            es = jnp.exp(logits - lm)
            ssum = jnp.sum(es, axis=-1, keepdims=True)
            lse = lm + jnp.log(ssum)
            p = es * pl.reciprocal(ssum, approx=True)
            ent = lse - jnp.sum(p * logits, axis=-1, keepdims=True)  # (1, 1)
            pad = jnp.zeros((1, W2 - (H + NL + 1)), jnp.float32)
            row = jnp.concatenate([pooled, logits, ent, pad], axis=-1)  # (1,W2)
            exit_ref[:, slot, :] = row         # ONE lane-dense 128-wide store


# ---------------- host-side weight packing (transpose + scale once) ---------
def pack_costeff_params(params, config):
    L = config["num_hidden_layers"]
    H = config["hidden_size"]
    Hp = config["prun_hidden_size"]
    I = config["prun_intermediate_size"]
    NL = config["num_labels"]
    nh = config["num_attention_heads"]
    hd = Hp // nh
    scale = 1.0 / math.sqrt(hd)
    lay = params["layers"]

    W1 = _round_up(max(3 * Hp, I, H), 128)
    W2 = _round_up(H + NL + 1, 128)

    def _pad_row(v, width):
        v = v.reshape(1, -1)
        return jnp.pad(v, ((0, 0), (0, width - v.shape[1])))

    # 1/sqrt(head_size) folded into the query projection (weight AND bias).
    w_qkv = jnp.stack([jnp.concatenate(
        [lay[i]["wq"].T * scale, lay[i]["wk"].T, lay[i]["wv"].T], axis=1)
        for i in range(L)])                                     # (L, H, 3Hp)
    w_ao = jnp.stack([lay[i]["wo"].T for i in range(L)])        # (L, Hp, H)
    w_in = jnp.stack([lay[i]["wi"].T for i in range(L)])        # (L, H, I)
    w_fo = jnp.stack([lay[i]["wo2"].T for i in range(L)])       # (L, I, H)

    # All small per-layer vectors in one lane-dense (L, 8, W1) slab:
    #   row 0: [bq*scale | bk | bv], row 1: bi,
    #   rows 2..7: bo, g1, b1, bo2, g2, b2.
    vec_rows = []
    for i in range(L):
        p = lay[i]
        vec_rows.append(jnp.concatenate([
            _pad_row(jnp.concatenate([p["bq"] * scale, p["bk"], p["bv"]],
                                     axis=1), W1),
            _pad_row(p["bi"], W1),
            _pad_row(p["bo"], W1), _pad_row(p["g1"], W1), _pad_row(p["b1"], W1),
            _pad_row(p["bo2"], W1), _pad_row(p["g2"], W1), _pad_row(p["b2"], W1),
        ], axis=0))
    vec_slab = jnp.stack(vec_rows)                              # (L, 8, W1)

    hw = params["highway"]
    if L - 1 > 0:
        hw_wp = jnp.stack([hw[i]["wp"].T for i in range(L - 1)])   # (L-1, H, H)
        hw_wc = jnp.stack([hw[i]["wc"] for i in range(L - 1)])     # (L-1, NL, H)
        hw_vec = jnp.stack([jnp.concatenate(
            [_pad_row(hw[i]["bp"], W2), _pad_row(hw[i]["bc"], W2)], axis=0)
            for i in range(L - 1)])                                # (L-1, 2, W2)
    else:
        hw_wp = jnp.zeros((1, H, H), jnp.float32)
        hw_wc = jnp.zeros((1, NL, H), jnp.float32)
        hw_vec = jnp.zeros((1, 2, W2), jnp.float32)

    return dict(w_qkv=w_qkv, w_ao=w_ao, w_in=w_in, w_fo=w_fo, vec=vec_slab,
                hw_wp=hw_wp, hw_wc=hw_wc, hw_vec=hw_vec)


# ---------------- pallas_call wrapper ----------------
def run_costeff_encoder(hidden, mask, packed, config, exit_layers):
    B, S, H = hidden.shape
    L = config["num_hidden_layers"]
    NL = config["num_labels"]
    nh = config["num_attention_heads"]
    hd = config["prun_hidden_size"] // nh
    Hp = nh * hd
    I = config["prun_intermediate_size"]
    NSLOT = max(len(exit_layers), 1)
    W1 = packed["vec"].shape[-1]
    W2 = packed["hw_vec"].shape[-1]
    LH = packed["hw_wp"].shape[0]

    kernel = partial(_costeff_encoder_kernel,
                     num_heads=nh, head_size=hd,
                     eps=config["layer_norm_eps"],
                     num_layers=L, exit_layers=tuple(exit_layers))

    def resident(shape):
        # Whole-array weight block; constant index_map keeps it VMEM-resident
        # across the (parallel) batch grid.
        return pl.BlockSpec(shape, lambda b, _n=len(shape): (0,) * _n)

    hs_out, exit_slab = pl.pallas_call(
        kernel,
        grid=(B,),
        in_specs=[
            pl.BlockSpec((1, S, H), lambda b: (b, 0, 0)),      # hidden (per b)
            pl.BlockSpec((1, 1, S), lambda b: (b, 0, 0)),      # additive mask
            resident((L, H, 3 * Hp)),
            resident((L, Hp, H)),
            resident((L, H, I)),
            resident((L, I, H)),
            resident((L, 8, W1)),
            resident((LH, H, H)),
            resident((LH, NL, H)),
            resident((LH, 2, W2)),
        ],
        out_specs=(
            pl.BlockSpec((L, 1, S, H), lambda b: (0, b, 0, 0)),
            pl.BlockSpec((1, NSLOT, W2), lambda b: (b, 0, 0)),
        ),
        out_shape=(jax.ShapeDtypeStruct((L, B, S, H), jnp.float32),
                   jax.ShapeDtypeStruct((B, NSLOT, W2), jnp.float32)),
        compiler_params=pltpu.CompilerParams(
            dimension_semantics=("parallel",)),   # v7x: shard batch over 2 TCs
    )(hidden, mask, packed["w_qkv"], packed["w_ao"], packed["w_in"],
      packed["w_fo"], packed["vec"], packed["hw_wp"], packed["hw_wc"],
      packed["hw_vec"])
    return hs_out, exit_slab


# ---------------- CosteffEncoder.forward (eval, highway_mode=True) ----------
def costeff_encoder_forward(hidden_states, attention_mask, params, config,
                            highway_mode=True, exit_start=1):
    L = config["num_hidden_layers"]
    H = config["hidden_size"]
    NL = config["num_labels"]
    if highway_mode:
        exit_layers = tuple(i for i in range(L)
                            if (exit_start - 1 <= i) and (i < L - 1))
    else:
        exit_layers = ()

    packed = pack_costeff_params(params, config)
    hs_out, exit_slab = run_costeff_encoder(hidden_states, attention_mask,
                                            packed, config, exit_layers)

    all_hidden_states = (hidden_states,) + tuple(hs_out[i] for i in range(L))
    all_highway_exits = ()
    for slot, layer in enumerate(exit_layers):
        pooled = exit_slab[:, slot, 0:H]
        logits = exit_slab[:, slot, H:H + NL]
        highway_entropy = jnp.max(exit_slab[:, slot, H + NL])
        all_highway_exits = all_highway_exits + ((logits, pooled,
                                                  highway_entropy),)
        # TODO(synk): HighwayException early-exit needs host-side control flow;
        # with the default early_exit_entropy = -1 it never triggers.
    final_hidden = hs_out[L - 1]
    return (final_hidden, all_hidden_states, all_highway_exits)


# ---------------- deterministic parameter init (PyTorch layout) -------------
def init_params(key, config):
    H = config["hidden_size"]
    Hp = config["prun_hidden_size"]
    I = config["prun_intermediate_size"]
    NL = config["num_labels"]
    n_layers = config["num_hidden_layers"]
    kiter = iter(jax.random.split(key, 512))

    def w(o, i):
        return (0.02 * jax.random.normal(next(kiter), (o, i))).astype(jnp.float32)

    def zeros(o):
        return jnp.zeros((1, o), jnp.float32)

    def ones(o):
        return jnp.ones((1, o), jnp.float32)

    layers, highways = [], []
    for _ in range(n_layers):
        layers.append(dict(
            wq=w(Hp, H), bq=zeros(Hp), wk=w(Hp, H), bk=zeros(Hp),
            wv=w(Hp, H), bv=zeros(Hp),
            wo=w(H, Hp), bo=zeros(H), g1=ones(H), b1=zeros(H),
            wi=w(I, H), bi=zeros(I), wo2=w(H, I), bo2=zeros(H),
            g2=ones(H), b2=zeros(H)))
    for _ in range(n_layers - 1):
        highways.append(dict(wp=w(H, H), bp=zeros(H), wc=w(NL, H), bc=zeros(NL)))
    return dict(layers=layers, highway=highways)


# ---------------- pure-JAX reference (for correctness check) ----------------
def _ref_layer(h, mask, p, config):
    nh = config["num_attention_heads"]
    hs = config["prun_hidden_size"] // nh
    B, S, H = h.shape
    q = h @ p["wq"].T + p["bq"]
    k = h @ p["wk"].T + p["bk"]
    v = h @ p["wv"].T + p["bv"]
    split = lambda x: x.reshape(B, S, nh, hs).transpose(0, 2, 1, 3)
    qh, kh, vh = split(q), split(k), split(v)
    scores = jnp.einsum("bhqd,bhkd->bhqk", qh, kh) / math.sqrt(hs)
    scores = scores + mask[:, None, :, :]
    probs = jax.nn.softmax(scores, axis=-1)
    ctx = jnp.einsum("bhqk,bhkd->bhqd", probs, vh)
    ctx = ctx.transpose(0, 2, 1, 3).reshape(B, S, nh * hs)
    attn = ctx @ p["wo"].T + p["bo"]
    x = _layernorm(attn + h, p["g1"], p["b1"], config["layer_norm_eps"])
    inter = _gelu_new(x @ p["wi"].T + p["bi"])
    ffn = inter @ p["wo2"].T + p["bo2"]
    return _layernorm(ffn + x, p["g2"], p["b2"], config["layer_norm_eps"])


def _ref_encoder(h, mask, params, config):
    all_h = (h,)
    exits = ()
    L = config["num_hidden_layers"]
    for i in range(L):
        h = _ref_layer(h, mask, params["layers"][i], config)
        if i < L - 1:
            hp = params["highway"][i]
            pooled = jnp.tanh(h[:, 0, :] @ hp["wp"].T + hp["bp"])
            logits = pooled @ hp["wc"].T + hp["bc"]
            p = jax.nn.softmax(logits, axis=-1)
            ent = jnp.max(-jnp.sum(p * jnp.log(p), axis=-1))
            exits = exits + ((logits, pooled, ent),)
        all_h = all_h + (h,)
    return (h, all_h, exits)


# ---------------- main ----------------
if __name__ == "__main__":
    key = jax.random.PRNGKey(0)
    kx, kp = jax.random.split(key)
    B, S = 2, 8
    H = CONFIG["hidden_size"]

    hidden_states = jax.random.normal(kx, (B, S, H), dtype=jnp.float32)
    attention_mask = jnp.zeros((B, 1, S), jnp.float32)   # additive mask, no pad
    params = init_params(kp, CONFIG)

    final_hidden, all_hiddens, highway_exits = costeff_encoder_forward(
        hidden_states, attention_mask, params, CONFIG,
        highway_mode=True, exit_start=1)

    jax.block_until_ready(final_hidden)
    for he in highway_exits:
        jax.block_until_ready(he[0])

    # correctness check against pure-JAX reference.  Tolerance is 5e-3 (not
    # 1e-4) because the kernel uses pl.reciprocal(approx=True) on the EUP for
    # the softmax / entropy denominators, as requested by the perf review.
    TOL = 5e-3
    ref_hidden, ref_all_h, ref_exits = _ref_encoder(hidden_states, attention_mask,
                                                    params, CONFIG)
    np.testing.assert_allclose(np.asarray(final_hidden), np.asarray(ref_hidden),
                               rtol=TOL, atol=TOL)
    for got, ref in zip(all_hiddens, ref_all_h):
        np.testing.assert_allclose(np.asarray(got), np.asarray(ref),
                                   rtol=TOL, atol=TOL)
    for (lg, pooled, ent), (rlg, rpooled, rent) in zip(highway_exits, ref_exits):
        np.testing.assert_allclose(np.asarray(lg), np.asarray(rlg),
                                   rtol=TOL, atol=TOL)
        np.testing.assert_allclose(np.asarray(pooled), np.asarray(rpooled),
                                   rtol=TOL, atol=TOL)
        np.testing.assert_allclose(float(ent), float(rent), rtol=TOL, atol=TOL)

    print("KERNEL_OK")
</pallas_src>

<mosaic_0001>
module attributes {stable_mosaic.version = 11 : i64} {
  func.func @_costeff_encoder_kernel(%arg0: i32, %arg1: memref<1x8x32xf32, #tpu.memory_space<vmem>>, %arg2: memref<1x1x8xf32, #tpu.memory_space<vmem>>, %arg3: memref<3x32x96xf32, #tpu.memory_space<vmem>>, %arg4: memref<3x32x32xf32, #tpu.memory_space<vmem>>, %arg5: memref<3x32x64xf32, #tpu.memory_space<vmem>>, %arg6: memref<3x64x32xf32, #tpu.memory_space<vmem>>, %arg7: memref<3x8x128xf32, #tpu.memory_space<vmem>>, %arg8: memref<2x32x32xf32, #tpu.memory_space<vmem>>, %arg9: memref<2x3x32xf32, #tpu.memory_space<vmem>>, %arg10: memref<2x2x128xf32, #tpu.memory_space<vmem>>, %arg11: memref<3x1x8x32xf32, #tpu.memory_space<vmem>>, %arg12: memref<1x2x128xf32, #tpu.memory_space<vmem>>) attributes {dimension_semantics = [#tpu.dimension_semantics<parallel>], iteration_bounds = array<i64: 2>, scalar_prefetch = 0 : i64, scratch_operands = 0 : i64, tpu.core_type = #tpu.core_type<tc>, window_params = [{transform_indices = @transform_0, window_bounds = array<i64: 1, 8, 32>}, {transform_indices = @transform_1, window_bounds = array<i64: 1, 1, 8>}, {pipeline_mode = #tpu.pipeline_mode<synchronous>, transform_indices = @transform_2, window_bounds = array<i64: 3, 32, 96>}, {pipeline_mode = #tpu.pipeline_mode<synchronous>, transform_indices = @transform_3, window_bounds = array<i64: 3, 32, 32>}, {pipeline_mode = #tpu.pipeline_mode<synchronous>, transform_indices = @transform_4, window_bounds = array<i64: 3, 32, 64>}, {pipeline_mode = #tpu.pipeline_mode<synchronous>, transform_indices = @transform_5, window_bounds = array<i64: 3, 64, 32>}, {pipeline_mode = #tpu.pipeline_mode<synchronous>, transform_indices = @transform_6, window_bounds = array<i64: 3, 8, 128>}, {pipeline_mode = #tpu.pipeline_mode<synchronous>, transform_indices = @transform_7, window_bounds = array<i64: 2, 32, 32>}, {pipeline_mode = #tpu.pipeline_mode<synchronous>, transform_indices = @transform_8, window_bounds = array<i64: 2, 3, 32>}, {pipeline_mode = #tpu.pipeline_mode<synchronous>, transform_indices = @transform_9, window_bounds = array<i64: 2, 2, 128>}, {transform_indices = @transform_10, window_bounds = array<i64: 3, 1, 8, 32>}, {transform_indices = @transform_11, window_bounds = array<i64: 1, 2, 128>}]} {
    %c0 = arith.constant 0 : index
    %c0_0 = arith.constant 0 : index
    %c0_1 = arith.constant 0 : index
    %0 = vector.load %arg2[%c0, %c0_0, %c0_1] : memref<1x1x8xf32, #tpu.memory_space<vmem>>, vector<1x1x8xf32>
    %c0_2 = arith.constant 0 : index
    %c0_3 = arith.constant 0 : index
    %c0_4 = arith.constant 0 : index
    %1 = vector.load %arg1[%c0_2, %c0_3, %c0_4] : memref<1x8x32xf32, #tpu.memory_space<vmem>>, vector<1x8x32xf32>
    %2 = vector.shape_cast %1 : vector<1x8x32xf32> to vector<8x32xf32>
    %c0_5 = arith.constant 0 : index
    %c0_6 = arith.constant 0 : index
    %c0_7 = arith.constant 0 : index
    %3 = vector.load %arg3[%c0_5, %c0_6, %c0_7] : memref<3x32x96xf32, #tpu.memory_space<vmem>>, vector<1x32x96xf32>
    %4 = vector.shape_cast %3 : vector<1x32x96xf32> to vector<32x96xf32>
    %cst = arith.constant dense<0.000000e+00> : vector<8x96xf32>
    %5 = tpu.matmul %2, %4, %cst {dimension_numbers = #tpu.dot_dimension_numbers<[1], [0], [0], [1], [0, 0, 1, 1], [], []>} : vector<8x32xf32>, vector<32x96xf32>, vector<8x96xf32> -> vector<8x96xf32>
    %c0_8 = arith.constant 0 : index
    %c0_9 = arith.constant 0 : index
    %c0_10 = arith.constant 0 : index
    %6 = vector.load %arg7[%c0_8, %c0_9, %c0_10] : memref<3x8x128xf32, #tpu.memory_space<vmem>>, vector<1x1x96xf32>
    %7 = vector.shape_cast %6 : vector<1x1x96xf32> to vector<1x96xf32>
    %8 = vector.broadcast %7 : vector<1x96xf32> to vector<8x96xf32>
    %9 = arith.addf %5, %8 : vector<8x96xf32>
    %10 = vector.extract_strided_slice %9 {offsets = [0, 0], sizes = [8, 32], strides = [1, 1]} : vector<8x96xf32> to vector<8x32xf32>
    %11 = vector.shape_cast %10 : vector<8x32xf32> to vector<8x4x8xf32>
    %12 = vector.extract_strided_slice %9 {offsets = [0, 32], sizes = [8, 32], strides = [1, 1]} : vector<8x96xf32> to vector<8x32xf32>
    %13 = vector.shape_cast %12 : vector<8x32xf32> to vector<8x4x8xf32>
    %14 = vector.extract_strided_slice %9 {offsets = [0, 64], sizes = [8, 32], strides = [1, 1]} : vector<8x96xf32> to vector<8x32xf32>
    %15 = vector.shape_cast %14 : vector<8x32xf32> to vector<8x4x8xf32>
    "tpu.trace_start"() <{level = 10 : i32, message = "qhd,khd->hqk"}> : () -> ()
    %cst_11 = arith.constant dense<0.000000e+00> : vector<4x8x8xf32>
    %16 = tpu.matmul %11, %13, %cst_11 {dimension_numbers = #tpu.dot_dimension_numbers<[2], [2], [0], [0], [0, 1, 0, 0, 1, 0], [1], [1]>} : vector<8x4x8xf32>, vector<8x4x8xf32>, vector<4x8x8xf32> -> vector<4x8x8xf32>
    "tpu.trace_stop"() : () -> ()
    %17 = vector.broadcast %0 : vector<1x1x8xf32> to vector<4x8x8xf32>
    %18 = arith.addf %16, %17 : vector<4x8x8xf32>
    %cst_12 = arith.constant dense<0xFF800000> : vector<4x8xf32>
    %19 = vector.multi_reduction <maximumf>, %18, %cst_12 [2] : vector<4x8x8xf32> to vector<4x8xf32>
    %20 = vector.shape_cast %19 : vector<4x8xf32> to vector<4x8x1xf32>
    %21 = vector.broadcast %20 : vector<4x8x1xf32> to vector<4x8x8xf32>
    %22 = arith.subf %18, %21 : vector<4x8x8xf32>
    %23 = math.exp %22 : vector<4x8x8xf32>
    %cst_13 = arith.constant dense<0.000000e+00> : vector<4x8xf32>
    %24 = vector.multi_reduction <add>, %23, %cst_13 [2] : vector<4x8x8xf32> to vector<4x8xf32>
    %25 = vector.shape_cast %24 : vector<4x8xf32> to vector<4x8x1xf32>
    %26 = tpu.reciprocal %25 {approx = true} : vector<4x8x1xf32> -> vector<4x8x1xf32>
    %27 = vector.broadcast %26 : vector<4x8x1xf32> to vector<4x8x8xf32>
    %28 = arith.mulf %23, %27 : vector<4x8x8xf32>
    "tpu.trace_start"() <{level = 10 : i32, message = "hqk,khd->qhd"}> : () -> ()
    %cst_14 = arith.constant dense<0.000000e+00> : vector<4x8x8xf32>
    %29 = tpu.matmul %15, %28, %cst_14 {dimension_numbers = #tpu.dot_dimension_numbers<[0], [2], [2], [1], [0, 1, 0, 2, 1, 1], [1], [0]>} : vector<8x4x8xf32>, vector<4x8x8xf32>, vector<4x8x8xf32> -> vector<4x8x8xf32>
    %30 = tpu.transpose %29, [2, 0, 1] : vector<4x8x8xf32> -> vector<8x4x8xf32>
    "tpu.trace_stop"() : () -> ()
    %31 = vector.shape_cast %30 : vector<8x4x8xf32> to vector<8x32xf32>
    %c0_15 = arith.constant 0 : index
    %c0_16 = arith.constant 0 : index
    %c0_17 = arith.constant 0 : index
    %32 = vector.load %arg4[%c0_15, %c0_16, %c0_17] : memref<3x32x32xf32, #tpu.memory_space<vmem>>, vector<1x32x32xf32>
    %33 = vector.shape_cast %32 : vector<1x32x32xf32> to vector<32x32xf32>
    %cst_18 = arith.constant dense<0.000000e+00> : vector<8x32xf32>
    %34 = tpu.matmul %31, %33, %cst_18 {dimension_numbers = #tpu.dot_dimension_numbers<[1], [0], [0], [1], [0, 0, 1, 1], [], []>} : vector<8x32xf32>, vector<32x32xf32>, vector<8x32xf32> -> vector<8x32xf32>
    %c0_19 = arith.constant 0 : index
    %c2 = arith.constant 2 : index
    %c0_20 = arith.constant 0 : index
    %35 = vector.load %arg7[%c0_19, %c2, %c0_20] : memref<3x8x128xf32, #tpu.memory_space<vmem>>, vector<1x1x32xf32>
    %36 = vector.shape_cast %35 : vector<1x1x32xf32> to vector<1x32xf32>
    %37 = vector.broadcast %36 : vector<1x32xf32> to vector<8x32xf32>
    %38 = arith.addf %34, %37 : vector<8x32xf32>
    %39 = arith.addf %38, %2 : vector<8x32xf32>
    %c0_21 = arith.constant 0 : index
    %c3 = arith.constant 3 : index
    %c0_22 = arith.constant 0 : index
    %40 = vector.load %arg7[%c0_21, %c3, %c0_22] : memref<3x8x128xf32, #tpu.memory_space<vmem>>, vector<1x1x32xf32>
    %41 = vector.shape_cast %40 : vector<1x1x32xf32> to vector<1x32xf32>
    %c0_23 = arith.constant 0 : index
    %c4 = arith.constant 4 : index
    %c0_24 = arith.constant 0 : index
    %42 = vector.load %arg7[%c0_23, %c4, %c0_24] : memref<3x8x128xf32, #tpu.memory_space<vmem>>, vector<1x1x32xf32>
    %43 = vector.shape_cast %42 : vector<1x1x32xf32> to vector<1x32xf32>
    %cst_25 = arith.constant dense<0.000000e+00> : vector<8xf32>
    %44 = vector.multi_reduction <add>, %39, %cst_25 [1] : vector<8x32xf32> to vector<8xf32>
    %45 = vector.shape_cast %44 : vector<8xf32> to vector<8x1xf32>
    %cst_26 = arith.constant 3.200000e+01 : f32
    %46 = vector.broadcast %cst_26 : f32 to vector<8x1xf32>
    %47 = arith.divf %45, %46 : vector<8x1xf32>
    %48 = vector.broadcast %47 : vector<8x1xf32> to vector<8x32xf32>
    %49 = arith.subf %39, %48 : vector<8x32xf32>
    %50 = arith.mulf %49, %49 : vector<8x32xf32>
    %cst_27 = arith.constant dense<0.000000e+00> : vector<8xf32>
    %51 = vector.multi_reduction <add>, %50, %cst_27 [1] : vector<8x32xf32> to vector<8xf32>
    %52 = vector.shape_cast %51 : vector<8xf32> to vector<8x1xf32>
    %cst_28 = arith.constant 3.200000e+01 : f32
    %53 = vector.broadcast %cst_28 : f32 to vector<8x1xf32>
    %54 = arith.divf %52, %53 : vector<8x1xf32>
    %55 = vector.broadcast %47 : vector<8x1xf32> to vector<8x32xf32>
    %56 = arith.subf %39, %55 : vector<8x32xf32>
    %cst_29 = arith.constant 9.99999996E-13 : f32
    %57 = vector.broadcast %cst_29 : f32 to vector<8x1xf32>
    %58 = arith.addf %54, %57 : vector<8x1xf32>
    %59 = math.rsqrt %58 : vector<8x1xf32>
    %60 = vector.broadcast %59 : vector<8x1xf32> to vector<8x32xf32>
    %61 = arith.mulf %56, %60 : vector<8x32xf32>
    %62 = vector.broadcast %41 : vector<1x32xf32> to vector<8x32xf32>
    %63 = arith.mulf %61, %62 : vector<8x32xf32>
    %64 = vector.broadcast %43 : vector<1x32xf32> to vector<8x32xf32>
    %65 = arith.addf %63, %64 : vector<8x32xf32>
    %c0_30 = arith.constant 0 : index
    %c0_31 = arith.constant 0 : index
    %c0_32 = arith.constant 0 : index
    %66 = vector.load %arg5[%c0_30, %c0_31, %c0_32] : memref<3x32x64xf32, #tpu.memory_space<vmem>>, vector<1x32x64xf32>
    %67 = vector.shape_cast %66 : vector<1x32x64xf32> to vector<32x64xf32>
    %cst_33 = arith.constant dense<0.000000e+00> : vector<8x64xf32>
    %68 = tpu.matmul %65, %67, %cst_33 {dimension_numbers = #tpu.dot_dimension_numbers<[1], [0], [0], [1], [0, 0, 1, 1], [], []>} : vector<8x32xf32>, vector<32x64xf32>, vector<8x64xf32> -> vector<8x64xf32>
    %c0_34 = arith.constant 0 : index
    %c1 = arith.constant 1 : index
    %c0_35 = arith.constant 0 : index
    %69 = vector.load %arg7[%c0_34, %c1, %c0_35] : memref<3x8x128xf32, #tpu.memory_space<vmem>>, vector<1x1x64xf32>
    %70 = vector.shape_cast %69 : vector<1x1x64xf32> to vector<1x64xf32>
    %71 = vector.broadcast %70 : vector<1x64xf32> to vector<8x64xf32>
    %72 = arith.addf %68, %71 : vector<8x64xf32>
    %cst_36 = arith.constant 5.000000e-01 : f32
    %73 = vector.broadcast %cst_36 : f32 to vector<8x64xf32>
    %74 = arith.mulf %73, %72 : vector<8x64xf32>
    %cst_37 = arith.constant 4.471500e-02 : f32
    %75 = vector.broadcast %cst_37 : f32 to vector<8x64xf32>
    %76 = arith.mulf %75, %72 : vector<8x64xf32>
    %77 = arith.mulf %76, %72 : vector<8x64xf32>
    %78 = arith.mulf %77, %72 : vector<8x64xf32>
    %79 = arith.addf %72, %78 : vector<8x64xf32>
    %cst_38 = arith.constant 0.797884583 : f32
    %80 = vector.broadcast %cst_38 : f32 to vector<8x64xf32>
    %81 = arith.mulf %80, %79 : vector<8x64xf32>
    %82 = math.tanh %81 : vector<8x64xf32>
    %cst_39 = arith.constant 1.000000e+00 : f32
    %83 = vector.broadcast %cst_39 : f32 to vector<8x64xf32>
    %84 = arith.addf %83, %82 : vector<8x64xf32>
    %85 = arith.mulf %74, %84 : vector<8x64xf32>
    %c0_40 = arith.constant 0 : index
    %c0_41 = arith.constant 0 : index
    %c0_42 = arith.constant 0 : index
    %86 = vector.load %arg6[%c0_40, %c0_41, %c0_42] : memref<3x64x32xf32, #tpu.memory_space<vmem>>, vector<1x64x32xf32>
    %87 = vector.shape_cast %86 : vector<1x64x32xf32> to vector<64x32xf32>
    %cst_43 = arith.constant dense<0.000000e+00> : vector<8x32xf32>
    %88 = tpu.matmul %85, %87, %cst_43 {dimension_numbers = #tpu.dot_dimension_numbers<[1], [0], [0], [1], [0, 0, 1, 1], [], []>} : vector<8x64xf32>, vector<64x32xf32>, vector<8x32xf32> -> vector<8x32xf32>
    %c0_44 = arith.constant 0 : index
    %c5 = arith.constant 5 : index
    %c0_45 = arith.constant 0 : index
    %89 = vector.load %arg7[%c0_44, %c5, %c0_45] : memref<3x8x128xf32, #tpu.memory_space<vmem>>, vector<1x1x32xf32>
    %90 = vector.shape_cast %89 : vector<1x1x32xf32> to vector<1x32xf32>
    %91 = vector.broadcast %90 : vector<1x32xf32> to vector<8x32xf32>
    %92 = arith.addf %88, %91 : vector<8x32xf32>
    %93 = arith.addf %92, %65 : vector<8x32xf32>
    %c0_46 = arith.constant 0 : index
    %c6 = arith.constant 6 : index
    %c0_47 = arith.constant 0 : index
    %94 = vector.load %arg7[%c0_46, %c6, %c0_47] : memref<3x8x128xf32, #tpu.memory_space<vmem>>, vector<1x1x32xf32>
    %95 = vector.shape_cast %94 : vector<1x1x32xf32> to vector<1x32xf32>
    %c0_48 = arith.constant 0 : index
    %c7 = arith.constant 7 : index
    %c0_49 = arith.constant 0 : index
    %96 = vector.load %arg7[%c0_48, %c7, %c0_49] : memref<3x8x128xf32, #tpu.memory_space<vmem>>, vector<1x1x32xf32>
    %97 = vector.shape_cast %96 : vector<1x1x32xf32> to vector<1x32xf32>
    %cst_50 = arith.constant dense<0.000000e+00> : vector<8xf32>
    %98 = vector.multi_reduction <add>, %93, %cst_50 [1] : vector<8x32xf32> to vector<8xf32>
    %99 = vector.shape_cast %98 : vector<8xf32> to vector<8x1xf32>
    %cst_51 = arith.constant 3.200000e+01 : f32
    %100 = vector.broadcast %cst_51 : f32 to vector<8x1xf32>
    %101 = arith.divf %99, %100 : vector<8x1xf32>
    %102 = vector.broadcast %101 : vector<8x1xf32> to vector<8x32xf32>
    %103 = arith.subf %93, %102 : vector<8x32xf32>
    %104 = arith.mulf %103, %103 : vector<8x32xf32>
    %cst_52 = arith.constant dense<0.000000e+00> : vector<8xf32>
    %105 = vector.multi_reduction <add>, %104, %cst_52 [1] : vector<8x32xf32> to vector<8xf32>
    %106 = vector.shape_cast %105 : vector<8xf32> to vector<8x1xf32>
    %cst_53 = arith.constant 3.200000e+01 : f32
    %107 = vector.broadcast %cst_53 : f32 to vector<8x1xf32>
    %108 = arith.divf %106, %107 : vector<8x1xf32>
    %109 = vector.broadcast %101 : vector<8x1xf32> to vector<8x32xf32>
    %110 = arith.subf %93, %109 : vector<8x32xf32>
    %cst_54 = arith.constant 9.99999996E-13 : f32
    %111 = vector.broadcast %cst_54 : f32 to vector<8x1xf32>
    %112 = arith.addf %108, %111 : vector<8x1xf32>
    %113 = math.rsqrt %112 : vector<8x1xf32>
    %114 = vector.broadcast %113 : vector<8x1xf32> to vector<8x32xf32>
    %115 = arith.mulf %110, %114 : vector<8x32xf32>
    %116 = vector.broadcast %95 : vector<1x32xf32> to vector<8x32xf32>
    %117 = arith.mulf %115, %116 : vector<8x32xf32>
    %118 = vector.broadcast %97 : vector<1x32xf32> to vector<8x32xf32>
    %119 = arith.addf %117, %118 : vector<8x32xf32>
    %120 = vector.shape_cast %119 : vector<8x32xf32> to vector<1x8x32xf32>
    %c0_55 = arith.constant 0 : index
    %c0_56 = arith.constant 0 : index
    %c0_57 = arith.constant 0 : index
    %c0_58 = arith.constant 0 : index
    %121 = vector.load %arg11[%c0_55, %c0_56, %c0_57, %c0_58] : memref<3x1x8x32xf32, #tpu.memory_space<vmem>>, vector<1x1x8x32xf32>
    %122 = vector.shape_cast %121 : vector<1x1x8x32xf32> to vector<1x8x32xf32>
    %123 = vector.shape_cast %120 : vector<1x8x32xf32> to vector<1x1x8x32xf32>
    tpu.vector_store %arg11[%c0_55, %c0_56, %c0_57, %c0_58], %123 {strides = array<i32>} : memref<3x1x8x32xf32, #tpu.memory_space<vmem>>, vector<1x1x8x32xf32>,
    %124 = vector.extract_strided_slice %119 {offsets = [0, 0], sizes = [1, 32], strides = [1, 1]} : vector<8x32xf32> to vector<1x32xf32>
    %c0_59 = arith.constant 0 : index
    %c0_60 = arith.constant 0 : index
    %c0_61 = arith.constant 0 : index
    %125 = vector.load %arg8[%c0_59, %c0_60, %c0_61] : memref<2x32x32xf32, #tpu.memory_space<vmem>>, vector<1x32x32xf32>
    %126 = vector.shape_cast %125 : vector<1x32x32xf32> to vector<32x32xf32>
    %cst_62 = arith.constant dense<0.000000e+00> : vector<1x32xf32>
    %127 = tpu.matmul %124, %126, %cst_62 {dimension_numbers = #tpu.dot_dimension_numbers<[1], [0], [0], [1], [0, 0, 1, 1], [], []>} : vector<1x32xf32>, vector<32x32xf32>, vector<1x32xf32> -> vector<1x32xf32>
    %c0_63 = arith.constant 0 : index
    %c0_64 = arith.constant 0 : index
    %c0_65 = arith.constant 0 : index
    %128 = vector.load %arg10[%c0_63, %c0_64, %c0_65] : memref<2x2x128xf32, #tpu.memory_space<vmem>>, vector<1x1x32xf32>
    %129 = vector.shape_cast %128 : vector<1x1x32xf32> to vector<1x32xf32>
    %130 = arith.addf %127, %129 : vector<1x32xf32>
    %131 = math.tanh %130 : vector<1x32xf32>
    %c0_66 = arith.constant 0 : index
    %c0_67 = arith.constant 0 : index
    %c0_68 = arith.constant 0 : index
    %132 = vector.load %arg9[%c0_66, %c0_67, %c0_68] : memref<2x3x32xf32, #tpu.memory_space<vmem>>, vector<1x3x32xf32>
    %133 = vector.shape_cast %132 : vector<1x3x32xf32> to vector<3x32xf32>
    "tpu.trace_start"() <{level = 10 : i32, message = "bh,nh->bn"}> : () -> ()
    %cst_69 = arith.constant dense<0.000000e+00> : vector<1x3xf32>
    %134 = tpu.matmul %131, %133, %cst_69 {dimension_numbers = #tpu.dot_dimension_numbers<[1], [1], [0], [0], [0, 0, 1, 0], [], []>} : vector<1x32xf32>, vector<3x32xf32>, vector<1x3xf32> -> vector<1x3xf32>
    "tpu.trace_stop"() : () -> ()
    %c0_70 = arith.constant 0 : index
    %c1_71 = arith.constant 1 : index
    %c0_72 = arith.constant 0 : index
    %135 = vector.load %arg10[%c0_70, %c1_71, %c0_72] : memref<2x2x128xf32, #tpu.memory_space<vmem>>, vector<1x1x3xf32>
    %136 = vector.shape_cast %135 : vector<1x1x3xf32> to vector<1x3xf32>
    %137 = arith.addf %134, %136 : vector<1x3xf32>
    %cst_73 = arith.constant dense<0xFF800000> : vector<1xf32>
    %138 = vector.multi_reduction <maximumf>, %137, %cst_73 [1] : vector<1x3xf32> to vector<1xf32>
    %139 = vector.shape_cast %138 : vector<1xf32> to vector<1x1xf32>
    %140 = vector.broadcast %139 : vector<1x1xf32> to vector<1x3xf32>
    %141 = arith.subf %137, %140 : vector<1x3xf32>
    %142 = math.exp %141 : vector<1x3xf32>
    %cst_74 = arith.constant dense<0.000000e+00> : vector<1xf32>
    %143 = vector.multi_reduction <add>, %142, %cst_74 [1] : vector<1x3xf32> to vector<1xf32>
    %144 = vector.shape_cast %143 : vector<1xf32> to vector<1x1xf32>
    %145 = math.log %144 : vector<1x1xf32>
    %146 = arith.addf %139, %145 : vector<1x1xf32>
    %147 = tpu.reciprocal %144 {approx = true} : vector<1x1xf32> -> vector<1x1xf32>
    %148 = vector.broadcast %147 : vector<1x1xf32> to vector<1x3xf32>
    %149 = arith.mulf %142, %148 : vector<1x3xf32>
    %150 = arith.mulf %149, %137 : vector<1x3xf32>
    %cst_75 = arith.constant dense<0.000000e+00> : vector<1xf32>
    %151 = vector.multi_reduction <add>, %150, %cst_75 [1] : vector<1x3xf32> to vector<1xf32>
    %152 = vector.shape_cast %151 : vector<1xf32> to vector<1x1xf32>
    %153 = arith.subf %146, %152 : vector<1x1xf32>
    %cst_76 = arith.constant 0.000000e+00 : f32
    %154 = vector.broadcast %cst_76 : f32 to vector<1x92xf32>
    %155 = tpu.concatenate %131, %137, %153, %154 in 1 : vector<1x32xf32>, vector<1x3xf32>, vector<1x1xf32>, vector<1x92xf32> -> vector<1x128xf32>
    %c0_77 = arith.constant 0 : index
    %c0_78 = arith.constant 0 : index
    %c0_79 = arith.constant 0 : index
    %156 = vector.load %arg12[%c0_77, %c0_78, %c0_79] : memref<1x2x128xf32, #tpu.memory_space<vmem>>, vector<1x1x128xf32>
    %157 = vector.shape_cast %156 : vector<1x1x128xf32> to vector<1x128xf32>
    %158 = vector.shape_cast %155 : vector<1x128xf32> to vector<1x1x128xf32>
    tpu.vector_store %arg12[%c0_77, %c0_78, %c0_79], %158 {strides = array<i32>} : memref<1x2x128xf32, #tpu.memory_space<vmem>>, vector<1x1x128xf32>,
    %c1_80 = arith.constant 1 : index
    %c0_81 = arith.constant 0 : index
    %c0_82 = arith.constant 0 : index
    %159 = vector.load %arg3[%c1_80, %c0_81, %c0_82] : memref<3x32x96xf32, #tpu.memory_space<vmem>>, vector<1x32x96xf32>
    %160 = vector.shape_cast %159 : vector<1x32x96xf32> to vector<32x96xf32>
    %cst_83 = arith.constant dense<0.000000e+00> : vector<8x96xf32>
    %161 = tpu.matmul %119, %160, %cst_83 {dimension_numbers = #tpu.dot_dimension_numbers<[1], [0], [0], [1], [0, 0, 1, 1], [], []>} : vector<8x32xf32>, vector<32x96xf32>, vector<8x96xf32> -> vector<8x96xf32>
    %c1_84 = arith.constant 1 : index
    %c0_85 = arith.constant 0 : index
    %c0_86 = arith.constant 0 : index
    %162 = vector.load %arg7[%c1_84, %c0_85, %c0_86] : memref<3x8x128xf32, #tpu.memory_space<vmem>>, vector<1x1x96xf32>
    %163 = vector.shape_cast %162 : vector<1x1x96xf32> to vector<1x96xf32>
    %164 = vector.broadcast %163 : vector<1x96xf32> to vector<8x96xf32>
    %165 = arith.addf %161, %164 : vector<8x96xf32>
    %166 = vector.extract_strided_slice %165 {offsets = [0, 0], sizes = [8, 32], strides = [1, 1]} : vector<8x96xf32> to vector<8x32xf32>
    %167 = vector.shape_cast %166 : vector<8x32xf32> to vector<8x4x8xf32>
    %168 = vector.extract_strided_slice %165 {offsets = [0, 32], sizes = [8, 32], strides = [1, 1]} : vector<8x96xf32> to vector<8x32xf32>
    %169 = vector.shape_cast %168 : vector<8x32xf32> to vector<8x4x8xf32>
    %170 = vector.extract_strided_slice %165 {offsets = [0, 64], sizes = [8, 32], strides = [1, 1]} : vector<8x96xf32> to vector<8x32xf32>
    %171 = vector.shape_cast %170 : vector<8x32xf32> to vector<8x4x8xf32>
    "tpu.trace_start"() <{level = 10 : i32, message = "qhd,khd->hqk"}> : () -> ()
    %cst_87 = arith.constant dense<0.000000e+00> : vector<4x8x8xf32>
    %172 = tpu.matmul %167, %169, %cst_87 {dimension_numbers = #tpu.dot_dimension_numbers<[2], [2], [0], [0], [0, 1, 0, 0, 1, 0], [1], [1]>} : vector<8x4x8xf32>, vector<8x4x8xf32>, vector<4x8x8xf32> -> vector<4x8x8xf32>
    "tpu.trace_stop"() : () -> ()
    %173 = vector.broadcast %0 : vector<1x1x8xf32> to vector<4x8x8xf32>
    %174 = arith.addf %172, %173 : vector<4x8x8xf32>
    %cst_88 = arith.constant dense<0xFF800000> : vector<4x8xf32>
    %175 = vector.multi_reduction <maximumf>, %174, %cst_88 [2] : vector<4x8x8xf32> to vector<4x8xf32>
    %176 = vector.shape_cast %175 : vector<4x8xf32> to vector<4x8x1xf32>
    %177 = vector.broadcast %176 : vector<4x8x1xf32> to vector<4x8x8xf32>
    %178 = arith.subf %174, %177 : vector<4x8x8xf32>
    %179 = math.exp %178 : vector<4x8x8xf32>
    %cst_89 = arith.constant dense<0.000000e+00> : vector<4x8xf32>
    %180 = vector.multi_reduction <add>, %179, %cst_89 [2] : vector<4x8x8xf32> to vector<4x8xf32>
    %181 = vector.shape_cast %180 : vector<4x8xf32> to vector<4x8x1xf32>
    %182 = tpu.reciprocal %181 {approx = true} : vector<4x8x1xf32> -> vector<4x8x1xf32>
    %183 = vector.broadcast %182 : vector<4x8x1xf32> to vector<4x8x8xf32>
    %184 = arith.mulf %179, %183 : vector<4x8x8xf32>
    "tpu.trace_start"() <{level = 10 : i32, message = "hqk,khd->qhd"}> : () -> ()
    %cst_90 = arith.constant dense<0.000000e+00> : vector<4x8x8xf32>
    %185 = tpu.matmul %171, %184, %cst_90 {dimension_numbers = #tpu.dot_dimension_numbers<[0], [2], [2], [1], [0, 1, 0, 2, 1, 1], [1], [0]>} : vector<8x4x8xf32>, vector<4x8x8xf32>, vector<4x8x8xf32> -> vector<4x8x8xf32>
    %186 = tpu.transpose %185, [2, 0, 1] : vector<4x8x8xf32> -> vector<8x4x8xf32>
    "tpu.trace_stop"() : () -> ()
    %187 = vector.shape_cast %186 : vector<8x4x8xf32> to vector<8x32xf32>
    %c1_91 = arith.constant 1 : index
    %c0_92 = arith.constant 0 : index
    %c0_93 = arith.constant 0 : index
    %188 = vector.load %arg4[%c1_91, %c0_92, %c0_93] : memref<3x32x32xf32, #tpu.memory_space<vmem>>, vector<1x32x32xf32>
    %189 = vector.shape_cast %188 : vector<1x32x32xf32> to vector<32x32xf32>
    %cst_94 = arith.constant dense<0.000000e+00> : vector<8x32xf32>
    %190 = tpu.matmul %187, %189, %cst_94 {dimension_numbers = #tpu.dot_dimension_numbers<[1], [0], [0], [1], [0, 0, 1, 1], [], []>} : vector<8x32xf32>, vector<32x32xf32>, vector<8x32xf32> -> vector<8x32xf32>
    %c1_95 = arith.constant 1 : index
    %c2_96 = arith.constant 2 : index
    %c0_97 = arith.constant 0 : index
    %191 = vector.load %arg7[%c1_95, %c2_96, %c0_97] : memref<3x8x128xf32, #tpu.memory_space<vmem>>, vector<1x1x32xf32>
    %192 = vector.shape_cast %191 : vector<1x1x32xf32> to vector<1x32xf32>
    %193 = vector.broadcast %192 : vector<1x32xf32> to vector<8x32xf32>
    %194 = arith.addf %190, %193 : vector<8x32xf32>
    %195 = arith.addf %194, %119 : vector<8x32xf32>
    %c1_98 = arith.constant 1 : index
    %c3_99 = arith.constant 3 : index
    %c0_100 = arith.constant 0 : index
    %196 = vector.load %arg7[%c1_98, %c3_99, %c0_100] : memref<3x8x128xf32, #tpu.memory_space<vmem>>, vector<1x1x32xf32>
    %197 = vector.shape_cast %196 : vector<1x1x32xf32> to vector<1x32xf32>
    %c1_101 = arith.constant 1 : index
    %c4_102 = arith.constant 4 : index
    %c0_103 = arith.constant 0 : index
    %198 = vector.load %arg7[%c1_101, %c4_102, %c0_103] : memref<3x8x128xf32, #tpu.memory_space<vmem>>, vector<1x1x32xf32>
    %199 = vector.shape_cast %198 : vector<1x1x32xf32> to vector<1x32xf32>
    %cst_104 = arith.constant dense<0.000000e+00> : vector<8xf32>
    %200 = vector.multi_reduction <add>, %195, %cst_104 [1] : vector<8x32xf32> to vector<8xf32>
    %201 = vector.shape_cast %200 : vector<8xf32> to vector<8x1xf32>
    %cst_105 = arith.constant 3.200000e+01 : f32
    %202 = vector.broadcast %cst_105 : f32 to vector<8x1xf32>
    %203 = arith.divf %201, %202 : vector<8x1xf32>
    %204 = vector.broadcast %203 : vector<8x1xf32> to vector<8x32xf32>
    %205 = arith.subf %195, %204 : vector<8x32xf32>
    %206 = arith.mulf %205, %205 : vector<8x32xf32>
    %cst_106 = arith.constant dense<0.000000e+00> : vector<8xf32>
    %207 = vector.multi_reduction <add>, %206, %cst_106 [1] : vector<8x32xf32> to vector<8xf32>
    %208 = vector.shape_cast %207 : vector<8xf32> to vector<8x1xf32>
    %cst_107 = arith.constant 3.200000e+01 : f32
    %209 = vector.broadcast %cst_107 : f32 to vector<8x1xf32>
    %210 = arith.divf %208, %209 : vector<8x1xf32>
    %211 = vector.broadcast %203 : vector<8x1xf32> to vector<8x32xf32>
    %212 = arith.subf %195, %211 : vector<8x32xf32>
    %cst_108 = arith.constant 9.99999996E-13 : f32
    %213 = vector.broadcast %cst_108 : f32 to vector<8x1xf32>
    %214 = arith.addf %210, %213 : vector<8x1xf32>
    %215 = math.rsqrt %214 : vector<8x1xf32>
    %216 = vector.broadcast %215 : vector<8x1xf32> to vector<8x32xf32>
    %217 = arith.mulf %212, %216 : vector<8x32xf32>
    %218 = vector.broadcast %197 : vector<1x32xf32> to vector<8x32xf32>
    %219 = arith.mulf %217, %218 : vector<8x32xf32>
    %220 = vector.broadcast %199 : vector<1x32xf32> to vector<8x32xf32>
    %221 = arith.addf %219, %220 : vector<8x32xf32>
    %c1_109 = arith.constant 1 : index
    %c0_110 = arith.constant 0 : index
    %c0_111 = arith.constant 0 : index
    %222 = vector.load %arg5[%c1_109, %c0_110, %c0_111] : memref<3x32x64xf32, #tpu.memory_space<vmem>>, vector<1x32x64xf32>
    %223 = vector.shape_cast %222 : vector<1x32x64xf32> to vector<32x64xf32>
    %cst_112 = arith.constant dense<0.000000e+00> : vector<8x64xf32>
    %224 = tpu.matmul %221, %223, %cst_112 {dimension_numbers = #tpu.dot_dimension_numbers<[1], [0], [0], [1], [0, 0, 1, 1], [], []>} : vector<8x32xf32>, vector<32x64xf32>, vector<8x64xf32> -> vector<8x64xf32>
    %c1_113 = arith.constant 1 : index
    %c1_114 = arith.constant 1 : index
    %c0_115 = arith.constant 0 : index
    %225 = vector.load %arg7[%c1_113, %c1_114, %c0_115] : memref<3x8x128xf32, #tpu.memory_space<vmem>>, vector<1x1x64xf32>
    %226 = vector.shape_cast %225 : vector<1x1x64xf32> to vector<1x64xf32>
    %227 = vector.broadcast %226 : vector<1x64xf32> to vector<8x64xf32>
    %228 = arith.addf %224, %227 : vector<8x64xf32>
    %cst_116 = arith.constant 5.000000e-01 : f32
    %229 = vector.broadcast %cst_116 : f32 to vector<8x64xf32>
    %230 = arith.mulf %229, %228 : vector<8x64xf32>
    %cst_117 = arith.constant 4.471500e-02 : f32
    %231 = vector.broadcast %cst_117 : f32 to vector<8x64xf32>
    %232 = arith.mulf %231, %228 : vector<8x64xf32>
    %233 = arith.mulf %232, %228 : vector<8x64xf32>
    %234 = arith.mulf %233, %228 : vector<8x64xf32>
    %235 = arith.addf %228, %234 : vector<8x64xf32>
    %cst_118 = arith.constant 0.797884583 : f32
    %236 = vector.broadcast %cst_118 : f32 to vector<8x64xf32>
    %237 = arith.mulf %236, %235 : vector<8x64xf32>
    %238 = math.tanh %237 : vector<8x64xf32>
    %cst_119 = arith.constant 1.000000e+00 : f32
    %239 = vector.broadcast %cst_119 : f32 to vector<8x64xf32>
    %240 = arith.addf %239, %238 : vector<8x64xf32>
    %241 = arith.mulf %230, %240 : vector<8x64xf32>
    %c1_120 = arith.constant 1 : index
    %c0_121 = arith.constant 0 : index
    %c0_122 = arith.constant 0 : index
    %242 = vector.load %arg6[%c1_120, %c0_121, %c0_122] : memref<3x64x32xf32, #tpu.memory_space<vmem>>, vector<1x64x32xf32>
    %243 = vector.shape_cast %242 : vector<1x64x32xf32> to vector<64x32xf32>
    %cst_123 = arith.constant dense<0.000000e+00> : vector<8x32xf32>
    %244 = tpu.matmul %241, %243, %cst_123 {dimension_numbers = #tpu.dot_dimension_numbers<[1], [0], [0], [1], [0, 0, 1, 1], [], []>} : vector<8x64xf32>, vector<64x32xf32>, vector<8x32xf32> -> vector<8x32xf32>
    %c1_124 = arith.constant 1 : index
    %c5_125 = arith.constant 5 : index
    %c0_126 = arith.constant 0 : index
    %245 = vector.load %arg7[%c1_124, %c5_125, %c0_126] : memref<3x8x128xf32, #tpu.memory_space<vmem>>, vector<1x1x32xf32>
    %246 = vector.shape_cast %245 : vector<1x1x32xf32> to vector<1x32xf32>
    %247 = vector.broadcast %246 : vector<1x32xf32> to vector<8x32xf32>
    %248 = arith.addf %244, %247 : vector<8x32xf32>
    %249 = arith.addf %248, %221 : vector<8x32xf32>
    %c1_127 = arith.constant 1 : index
    %c6_128 = arith.constant 6 : index
    %c0_129 = arith.constant 0 : index
    %250 = vector.load %arg7[%c1_127, %c6_128, %c0_129] : memref<3x8x128xf32, #tpu.memory_space<vmem>>, vector<1x1x32xf32>
    %251 = vector.shape_cast %250 : vector<1x1x32xf32> to vector<1x32xf32>
    %c1_130 = arith.constant 1 : index
    %c7_131 = arith.constant 7 : index
    %c0_132 = arith.constant 0 : index
    %252 = vector.load %arg7[%c1_130, %c7_131, %c0_132] : memref<3x8x128xf32, #tpu.memory_space<vmem>>, vector<1x1x32xf32>
    %253 = vector.shape_cast %252 : vector<1x1x32xf32> to vector<1x32xf32>
    %cst_133 = arith.constant dense<0.000000e+00> : vector<8xf32>
    %254 = vector.multi_reduction <add>, %249, %cst_133 [1] : vector<8x32xf32> to vector<8xf32>
    %255 = vector.shape_cast %254 : vector<8xf32> to vector<8x1xf32>
    %cst_134 = arith.constant 3.200000e+01 : f32
    %256 = vector.broadcast %cst_134 : f32 to vector<8x1xf32>
    %257 = arith.divf %255, %256 : vector<8x1xf32>
    %258 = vector.broadcast %257 : vector<8x1xf32> to vector<8x32xf32>
    %259 = arith.subf %249, %258 : vector<8x32xf32>
    %260 = arith.mulf %259, %259 : vector<8x32xf32>
    %cst_135 = arith.constant dense<0.000000e+00> : vector<8xf32>
    %261 = vector.multi_reduction <add>, %260, %cst_135 [1] : vector<8x32xf32> to vector<8xf32>
    %262 = vector.shape_cast %261 : vector<8xf32> to vector<8x1xf32>
    %cst_136 = arith.constant 3.200000e+01 : f32
    %263 = vector.broadcast %cst_136 : f32 to vector<8x1xf32>
    %264 = arith.divf %262, %263 : vector<8x1xf32>
    %265 = vector.broadcast %257 : vector<8x1xf32> to vector<8x32xf32>
    %266 = arith.subf %249, %265 : vector<8x32xf32>
    %cst_137 = arith.constant 9.99999996E-13 : f32
    %267 = vector.broadcast %cst_137 : f32 to vector<8x1xf32>
    %268 = arith.addf %264, %267 : vector<8x1xf32>
    %269 = math.rsqrt %268 : vector<8x1xf32>
    %270 = vector.broadcast %269 : vector<8x1xf32> to vector<8x32xf32>
    %271 = arith.mulf %266, %270 : vector<8x32xf32>
    %272 = vector.broadcast %251 : vector<1x32xf32> to vector<8x32xf32>
    %273 = arith.mulf %271, %272 : vector<8x32xf32>
    %274 = vector.broadcast %253 : vector<1x32xf32> to vector<8x32xf32>
    %275 = arith.addf %273, %274 : vector<8x32xf32>
    %276 = vector.shape_cast %275 : vector<8x32xf32> to vector<1x8x32xf32>
    %c1_138 = arith.constant 1 : index
    %c0_139 = arith.constant 0 : index
    %c0_140 = arith.constant 0 : index
    %c0_141 = arith.constant 0 : index
    %277 = vector.load %arg11[%c1_138, %c0_139, %c0_140, %c0_141] : memref<3x1x8x32xf32, #tpu.memory_space<vmem>>, vector<1x1x8x32xf32>
    %278 = vector.shape_cast %277 : vector<1x1x8x32xf32> to vector<1x8x32xf32>
    %279 = vector.shape_cast %276 : vector<1x8x32xf32> to vector<1x1x8x32xf32>
    tpu.vector_store %arg11[%c1_138, %c0_139, %c0_140, %c0_141], %279 {strides = array<i32>} : memref<3x1x8x32xf32, #tpu.memory_space<vmem>>, vector<1x1x8x32xf32>,
    %280 = vector.extract_strided_slice %275 {offsets = [0, 0], sizes = [1, 32], strides = [1, 1]} : vector<8x32xf32> to vector<1x32xf32>
    %c1_142 = arith.constant 1 : index
    %c0_143 = arith.constant 0 : index
    %c0_144 = arith.constant 0 : index
    %281 = vector.load %arg8[%c1_142, %c0_143, %c0_144] : memref<2x32x32xf32, #tpu.memory_space<vmem>>, vector<1x32x32xf32>
    %282 = vector.shape_cast %281 : vector<1x32x32xf32> to vector<32x32xf32>
    %cst_145 = arith.constant dense<0.000000e+00> : vector<1x32xf32>
    %283 = tpu.matmul %280, %282, %cst_145 {dimension_numbers = #tpu.dot_dimension_numbers<[1], [0], [0], [1], [0, 0, 1, 1], [], []>} : vector<1x32xf32>, vector<32x32xf32>, vector<1x32xf32> -> vector<1x32xf32>
    %c1_146 = arith.constant 1 : index
    %c0_147 = arith.constant 0 : index
    %c0_148 = arith.constant 0 : index
    %284 = vector.load %arg10[%c1_146, %c0_147, %c0_148] : memref<2x2x128xf32, #tpu.memory_space<vmem>>, vector<1x1x32xf32>
    %285 = vector.shape_cast %284 : vector<1x1x32xf32> to vector<1x32xf32>
    %286 = arith.addf %283, %285 : vector<1x32xf32>
    %287 = math.tanh %286 : vector<1x32xf32>
    %c1_149 = arith.constant 1 : index
    %c0_150 = arith.constant 0 : index
    %c0_151 = arith.constant 0 : index
    %288 = vector.load %arg9[%c1_149, %c0_150, %c0_151] : memref<2x3x32xf32, #tpu.memory_space<vmem>>, vector<1x3x32xf32>
    %289 = vector.shape_cast %288 : vector<1x3x32xf32> to vector<3x32xf32>
    "tpu.trace_start"() <{level = 10 : i32, message = "bh,nh->bn"}> : () -> ()
    %cst_152 = arith.constant dense<0.000000e+00> : vector<1x3xf32>
    %290 = tpu.matmul %287, %289, %cst_152 {dimension_numbers = #tpu.dot_dimension_numbers<[1], [1], [0], [0], [0, 0, 1, 0], [], []>} : vector<1x32xf32>, vector<3x32xf32>, vector<1x3xf32> -> vector<1x3xf32>
    "tpu.trace_stop"() : () -> ()
    %c1_153 = arith.constant 1 : index
    %c1_154 = arith.constant 1 : index
    %c0_155 = arith.constant 0 : index
    %291 = vector.load %arg10[%c1_153, %c1_154, %c0_155] : memref<2x2x128xf32, #tpu.memory_space<vmem>>, vector<1x1x3xf32>
    %292 = vector.shape_cast %291 : vector<1x1x3xf32> to vector<1x3xf32>
    %293 = arith.addf %290, %292 : vector<1x3xf32>
    %cst_156 = arith.constant dense<0xFF800000> : vector<1xf32>
    %294 = vector.multi_reduction <maximumf>, %293, %cst_156 [1] : vector<1x3xf32> to vector<1xf32>
    %295 = vector.shape_cast %294 : vector<1xf32> to vector<1x1xf32>
    %296 = vector.broadcast %295 : vector<1x1xf32> to vector<1x3xf32>
    %297 = arith.subf %293, %296 : vector<1x3xf32>
    %298 = math.exp %297 : vector<1x3xf32>
    %cst_157 = arith.constant dense<0.000000e+00> : vector<1xf32>
    %299 = vector.multi_reduction <add>, %298, %cst_157 [1] : vector<1x3xf32> to vector<1xf32>
    %300 = vector.shape_cast %299 : vector<1xf32> to vector<1x1xf32>
    %301 = math.log %300 : vector<1x1xf32>
    %302 = arith.addf %295, %301 : vector<1x1xf32>
    %303 = tpu.reciprocal %300 {approx = true} : vector<1x1xf32> -> vector<1x1xf32>
    %304 = vector.broadcast %303 : vector<1x1xf32> to vector<1x3xf32>
    %305 = arith.mulf %298, %304 : vector<1x3xf32>
    %306 = arith.mulf %305, %293 : vector<1x3xf32>
    %cst_158 = arith.constant dense<0.000000e+00> : vector<1xf32>
    %307 = vector.multi_reduction <add>, %306, %cst_158 [1] : vector<1x3xf32> to vector<1xf32>
    %308 = vector.shape_cast %307 : vector<1xf32> to vector<1x1xf32>
    %309 = arith.subf %302, %308 : vector<1x1xf32>
    %cst_159 = arith.constant 0.000000e+00 : f32
    %310 = vector.broadcast %cst_159 : f32 to vector<1x92xf32>
    %311 = tpu.concatenate %287, %293, %309, %310 in 1 : vector<1x32xf32>, vector<1x3xf32>, vector<1x1xf32>, vector<1x92xf32> -> vector<1x128xf32>
    %c0_160 = arith.constant 0 : index
    %c1_161 = arith.constant 1 : index
    %c0_162 = arith.constant 0 : index
    %312 = vector.load %arg12[%c0_160, %c1_161, %c0_162] : memref<1x2x128xf32, #tpu.memory_space<vmem>>, vector<1x1x128xf32>
    %313 = vector.shape_cast %312 : vector<1x1x128xf32> to vector<1x128xf32>
    %314 = vector.shape_cast %311 : vector<1x128xf32> to vector<1x1x128xf32>
    tpu.vector_store %arg12[%c0_160, %c1_161, %c0_162], %314 {strides = array<i32>} : memref<1x2x128xf32, #tpu.memory_space<vmem>>, vector<1x1x128xf32>,
    %c2_163 = arith.constant 2 : index
    %c0_164 = arith.constant 0 : index
    %c0_165 = arith.constant 0 : index
    %315 = vector.load %arg3[%c2_163, %c0_164, %c0_165] : memref<3x32x96xf32, #tpu.memory_space<vmem>>, vector<1x32x96xf32>
    %316 = vector.shape_cast %315 : vector<1x32x96xf32> to vector<32x96xf32>
    %cst_166 = arith.constant dense<0.000000e+00> : vector<8x96xf32>
    %317 = tpu.matmul %275, %316, %cst_166 {dimension_numbers = #tpu.dot_dimension_numbers<[1], [0], [0], [1], [0, 0, 1, 1], [], []>} : vector<8x32xf32>, vector<32x96xf32>, vector<8x96xf32> -> vector<8x96xf32>
    %c2_167 = arith.constant 2 : index
    %c0_168 = arith.constant 0 : index
    %c0_169 = arith.constant 0 : index
    %318 = vector.load %arg7[%c2_167, %c0_168, %c0_169] : memref<3x8x128xf32, #tpu.memory_space<vmem>>, vector<1x1x96xf32>
    %319 = vector.shape_cast %318 : vector<1x1x96xf32> to vector<1x96xf32>
    %320 = vector.broadcast %319 : vector<1x96xf32> to vector<8x96xf32>
    %321 = arith.addf %317, %320 : vector<8x96xf32>
    %322 = vector.extract_strided_slice %321 {offsets = [0, 0], sizes = [8, 32], strides = [1, 1]} : vector<8x96xf32> to vector<8x32xf32>
    %323 = vector.shape_cast %322 : vector<8x32xf32> to vector<8x4x8xf32>
    %324 = vector.extract_strided_slice %321 {offsets = [0, 32], sizes = [8, 32], strides = [1, 1]} : vector<8x96xf32> to vector<8x32xf32>
    %325 = vector.shape_cast %324 : vector<8x32xf32> to vector<8x4x8xf32>
    %326 = vector.extract_strided_slice %321 {offsets = [0, 64], sizes = [8, 32], strides = [1, 1]} : vector<8x96xf32> to vector<8x32xf32>
    %327 = vector.shape_cast %326 : vector<8x32xf32> to vector<8x4x8xf32>
    "tpu.trace_start"() <{level = 10 : i32, message = "qhd,khd->hqk"}> : () -> ()
    %cst_170 = arith.constant dense<0.000000e+00> : vector<4x8x8xf32>
    %328 = tpu.matmul %323, %325, %cst_170 {dimension_numbers = #tpu.dot_dimension_numbers<[2], [2], [0], [0], [0, 1, 0, 0, 1, 0], [1], [1]>} : vector<8x4x8xf32>, vector<8x4x8xf32>, vector<4x8x8xf32> -> vector<4x8x8xf32>
    "tpu.trace_stop"() : () -> ()
    %329 = vector.broadcast %0 : vector<1x1x8xf32> to vector<4x8x8xf32>
    %330 = arith.addf %328, %329 : vector<4x8x8xf32>
    %cst_171 = arith.constant dense<0xFF800000> : vector<4x8xf32>
    %331 = vector.multi_reduction <maximumf>, %330, %cst_171 [2] : vector<4x8x8xf32> to vector<4x8xf32>
    %332 = vector.shape_cast %331 : vector<4x8xf32> to vector<4x8x1xf32>
    %333 = vector.broadcast %332 : vector<4x8x1xf32> to vector<4x8x8xf32>
    %334 = arith.subf %330, %333 : vector<4x8x8xf32>
    %335 = math.exp %334 : vector<4x8x8xf32>
    %cst_172 = arith.constant dense<0.000000e+00> : vector<4x8xf32>
    %336 = vector.multi_reduction <add>, %335, %cst_172 [2] : vector<4x8x8xf32> to vector<4x8xf32>
    %337 = vector.shape_cast %336 : vector<4x8xf32> to vector<4x8x1xf32>
    %338 = tpu.reciprocal %337 {approx = true} : vector<4x8x1xf32> -> vector<4x8x1xf32>
    %339 = vector.broadcast %338 : vector<4x8x1xf32> to vector<4x8x8xf32>
    %340 = arith.mulf %335, %339 : vector<4x8x8xf32>
    "tpu.trace_start"() <{level = 10 : i32, message = "hqk,khd->qhd"}> : () -> ()
    %cst_173 = arith.constant dense<0.000000e+00> : vector<4x8x8xf32>
    %341 = tpu.matmul %327, %340, %cst_173 {dimension_numbers = #tpu.dot_dimension_numbers<[0], [2], [2], [1], [0, 1, 0, 2, 1, 1], [1], [0]>} : vector<8x4x8xf32>, vector<4x8x8xf32>, vector<4x8x8xf32> -> vector<4x8x8xf32>
    %342 = tpu.transpose %341, [2, 0, 1] : vector<4x8x8xf32> -> vector<8x4x8xf32>
    "tpu.trace_stop"() : () -> ()
    %343 = vector.shape_cast %342 : vector<8x4x8xf32> to vector<8x32xf32>
    %c2_174 = arith.constant 2 : index
    %c0_175 = arith.constant 0 : index
    %c0_176 = arith.constant 0 : index
    %344 = vector.load %arg4[%c2_174, %c0_175, %c0_176] : memref<3x32x32xf32, #tpu.memory_space<vmem>>, vector<1x32x32xf32>
    %345 = vector.shape_cast %344 : vector<1x32x32xf32> to vector<32x32xf32>
    %cst_177 = arith.constant dense<0.000000e+00> : vector<8x32xf32>
    %346 = tpu.matmul %343, %345, %cst_177 {dimension_numbers = #tpu.dot_dimension_numbers<[1], [0], [0], [1], [0, 0, 1, 1], [], []>} : vector<8x32xf32>, vector<32x32xf32>, vector<8x32xf32> -> vector<8x32xf32>
    %c2_178 = arith.constant 2 : index
    %c2_179 = arith.constant 2 : index
    %c0_180 = arith.constant 0 : index
    %347 = vector.load %arg7[%c2_178, %c2_179, %c0_180] : memref<3x8x128xf32, #tpu.memory_space<vmem>>, vector<1x1x32xf32>
    %348 = vector.shape_cast %347 : vector<1x1x32xf32> to vector<1x32xf32>
    %349 = vector.broadcast %348 : vector<1x32xf32> to vector<8x32xf32>
    %350 = arith.addf %346, %349 : vector<8x32xf32>
    %351 = arith.addf %350, %275 : vector<8x32xf32>
    %c2_181 = arith.constant 2 : index
    %c3_182 = arith.constant 3 : index
    %c0_183 = arith.constant 0 : index
    %352 = vector.load %arg7[%c2_181, %c3_182, %c0_183] : memref<3x8x128xf32, #tpu.memory_space<vmem>>, vector<1x1x32xf32>
    %353 = vector.shape_cast %352 : vector<1x1x32xf32> to vector<1x32xf32>
    %c2_184 = arith.constant 2 : index
    %c4_185 = arith.constant 4 : index
    %c0_186 = arith.constant 0 : index
    %354 = vector.load %arg7[%c2_184, %c4_185, %c0_186] : memref<3x8x128xf32, #tpu.memory_space<vmem>>, vector<1x1x32xf32>
    %355 = vector.shape_cast %354 : vector<1x1x32xf32> to vector<1x32xf32>
    %cst_187 = arith.constant dense<0.000000e+00> : vector<8xf32>
    %356 = vector.multi_reduction <add>, %351, %cst_187 [1] : vector<8x32xf32> to vector<8xf32>
    %357 = vector.shape_cast %356 : vector<8xf32> to vector<8x1xf32>
    %cst_188 = arith.constant 3.200000e+01 : f32
    %358 = vector.broadcast %cst_188 : f32 to vector<8x1xf32>
    %359 = arith.divf %357, %358 : vector<8x1xf32>
    %360 = vector.broadcast %359 : vector<8x1xf32> to vector<8x32xf32>
    %361 = arith.subf %351, %360 : vector<8x32xf32>
    %362 = arith.mulf %361, %361 : vector<8x32xf32>
    %cst_189 = arith.constant dense<0.000000e+00> : vector<8xf32>
    %363 = vector.multi_reduction <add>, %362, %cst_189 [1] : vector<8x32xf32> to vector<8xf32>
    %364 = vector.shape_cast %363 : vector<8xf32> to vector<8x1xf32>
    %cst_190 = arith.constant 3.200000e+01 : f32
    %365 = vector.broadcast %cst_190 : f32 to vector<8x1xf32>
    %366 = arith.divf %364, %365 : vector<8x1xf32>
    %367 = vector.broadcast %359 : vector<8x1xf32> to vector<8x32xf32>
    %368 = arith.subf %351, %367 : vector<8x32xf32>
    %cst_191 = arith.constant 9.99999996E-13 : f32
    %369 = vector.broadcast %cst_191 : f32 to vector<8x1xf32>
    %370 = arith.addf %366, %369 : vector<8x1xf32>
    %371 = math.rsqrt %370 : vector<8x1xf32>
    %372 = vector.broadcast %371 : vector<8x1xf32> to vector<8x32xf32>
    %373 = arith.mulf %368, %372 : vector<8x32xf32>
    %374 = vector.broadcast %353 : vector<1x32xf32> to vector<8x32xf32>
    %375 = arith.mulf %373, %374 : vector<8x32xf32>
    %376 = vector.broadcast %355 : vector<1x32xf32> to vector<8x32xf32>
    %377 = arith.addf %375, %376 : vector<8x32xf32>
    %c2_192 = arith.constant 2 : index
    %c0_193 = arith.constant 0 : index
    %c0_194 = arith.constant 0 : index
    %378 = vector.load %arg5[%c2_192, %c0_193, %c0_194] : memref<3x32x64xf32, #tpu.memory_space<vmem>>, vector<1x32x64xf32>
    %379 = vector.shape_cast %378 : vector<1x32x64xf32> to vector<32x64xf32>
    %cst_195 = arith.constant dense<0.000000e+00> : vector<8x64xf32>
    %380 = tpu.matmul %377, %379, %cst_195 {dimension_numbers = #tpu.dot_dimension_numbers<[1], [0], [0], [1], [0, 0, 1, 1], [], []>} : vector<8x32xf32>, vector<32x64xf32>, vector<8x64xf32> -> vector<8x64xf32>
    %c2_196 = arith.constant 2 : index
    %c1_197 = arith.constant 1 : index
    %c0_198 = arith.constant 0 : index
    %381 = vector.load %arg7[%c2_196, %c1_197, %c0_198] : memref<3x8x128xf32, #tpu.memory_space<vmem>>, vector<1x1x64xf32>
    %382 = vector.shape_cast %381 : vector<1x1x64xf32> to vector<1x64xf32>
    %383 = vector.broadcast %382 : vector<1x64xf32> to vector<8x64xf32>
    %384 = arith.addf %380, %383 : vector<8x64xf32>
    %cst_199 = arith.constant 5.000000e-01 : f32
    %385 = vector.broadcast %cst_199 : f32 to vector<8x64xf32>
    %386 = arith.mulf %385, %384 : vector<8x64xf32>
    %cst_200 = arith.constant 4.471500e-02 : f32
    %387 = vector.broadcast %cst_200 : f32 to vector<8x64xf32>
    %388 = arith.mulf %387, %384 : vector<8x64xf32>
    %389 = arith.mulf %388, %384 : vector<8x64xf32>
    %390 = arith.mulf %389, %384 : vector<8x64xf32>
    %391 = arith.addf %384, %390 : vector<8x64xf32>
    %cst_201 = arith.constant 0.797884583 : f32
    %392 = vector.broadcast %cst_201 : f32 to vector<8x64xf32>
    %393 = arith.mulf %392, %391 : vector<8x64xf32>
    %394 = math.tanh %393 : vector<8x64xf32>
    %cst_202 = arith.constant 1.000000e+00 : f32
    %395 = vector.broadcast %cst_202 : f32 to vector<8x64xf32>
    %396 = arith.addf %395, %394 : vector<8x64xf32>
    %397 = arith.mulf %386, %396 : vector<8x64xf32>
    %c2_203 = arith.constant 2 : index
    %c0_204 = arith.constant 0 : index
    %c0_205 = arith.constant 0 : index
    %398 = vector.load %arg6[%c2_203, %c0_204, %c0_205] : memref<3x64x32xf32, #tpu.memory_space<vmem>>, vector<1x64x32xf32>
    %399 = vector.shape_cast %398 : vector<1x64x32xf32> to vector<64x32xf32>
    %cst_206 = arith.constant dense<0.000000e+00> : vector<8x32xf32>
    %400 = tpu.matmul %397, %399, %cst_206 {dimension_numbers = #tpu.dot_dimension_numbers<[1], [0], [0], [1], [0, 0, 1, 1], [], []>} : vector<8x64xf32>, vector<64x32xf32>, vector<8x32xf32> -> vector<8x32xf32>
    %c2_207 = arith.constant 2 : index
    %c5_208 = arith.constant 5 : index
    %c0_209 = arith.constant 0 : index
    %401 = vector.load %arg7[%c2_207, %c5_208, %c0_209] : memref<3x8x128xf32, #tpu.memory_space<vmem>>, vector<1x1x32xf32>
    %402 = vector.shape_cast %401 : vector<1x1x32xf32> to vector<1x32xf32>
    %403 = vector.broadcast %402 : vector<1x32xf32> to vector<8x32xf32>
    %404 = arith.addf %400, %403 : vector<8x32xf32>
    %405 = arith.addf %404, %377 : vector<8x32xf32>
    %c2_210 = arith.constant 2 : index
    %c6_211 = arith.constant 6 : index
    %c0_212 = arith.constant 0 : index
    %406 = vector.load %arg7[%c2_210, %c6_211, %c0_212] : memref<3x8x128xf32, #tpu.memory_space<vmem>>, vector<1x1x32xf32>
    %407 = vector.shape_cast %406 : vector<1x1x32xf32> to vector<1x32xf32>
    %c2_213 = arith.constant 2 : index
    %c7_214 = arith.constant 7 : index
    %c0_215 = arith.constant 0 : index
    %408 = vector.load %arg7[%c2_213, %c7_214, %c0_215] : memref<3x8x128xf32, #tpu.memory_space<vmem>>, vector<1x1x32xf32>
    %409 = vector.shape_cast %408 : vector<1x1x32xf32> to vector<1x32xf32>
    %cst_216 = arith.constant dense<0.000000e+00> : vector<8xf32>
    %410 = vector.multi_reduction <add>, %405, %cst_216 [1] : vector<8x32xf32> to vector<8xf32>
    %411 = vector.shape_cast %410 : vector<8xf32> to vector<8x1xf32>
    %cst_217 = arith.constant 3.200000e+01 : f32
    %412 = vector.broadcast %cst_217 : f32 to vector<8x1xf32>
    %413 = arith.divf %411, %412 : vector<8x1xf32>
    %414 = vector.broadcast %413 : vector<8x1xf32> to vector<8x32xf32>
    %415 = arith.subf %405, %414 : vector<8x32xf32>
    %416 = arith.mulf %415, %415 : vector<8x32xf32>
    %cst_218 = arith.constant dense<0.000000e+00> : vector<8xf32>
    %417 = vector.multi_reduction <add>, %416, %cst_218 [1] : vector<8x32xf32> to vector<8xf32>
    %418 = vector.shape_cast %417 : vector<8xf32> to vector<8x1xf32>
    %cst_219 = arith.constant 3.200000e+01 : f32
    %419 = vector.broadcast %cst_219 : f32 to vector<8x1xf32>
    %420 = arith.divf %418, %419 : vector<8x1xf32>
    %421 = vector.broadcast %413 : vector<8x1xf32> to vector<8x32xf32>
    %422 = arith.subf %405, %421 : vector<8x32xf32>
    %cst_220 = arith.constant 9.99999996E-13 : f32
    %423 = vector.broadcast %cst_220 : f32 to vector<8x1xf32>
    %424 = arith.addf %420, %423 : vector<8x1xf32>
    %425 = math.rsqrt %424 : vector<8x1xf32>
    %426 = vector.broadcast %425 : vector<8x1xf32> to vector<8x32xf32>
    %427 = arith.mulf %422, %426 : vector<8x32xf32>
    %428 = vector.broadcast %407 : vector<1x32xf32> to vector<8x32xf32>
    %429 = arith.mulf %427, %428 : vector<8x32xf32>
    %430 = vector.broadcast %409 : vector<1x32xf32> to vector<8x32xf32>
    %431 = arith.addf %429, %430 : vector<8x32xf32>
    %432 = vector.shape_cast %431 : vector<8x32xf32> to vector<1x8x32xf32>
    %c2_221 = arith.constant 2 : index
    %c0_222 = arith.constant 0 : index
    %c0_223 = arith.constant 0 : index
    %c0_224 = arith.constant 0 : index
    %433 = vector.load %arg11[%c2_221, %c0_222, %c0_223, %c0_224] : memref<3x1x8x32xf32, #tpu.memory_space<vmem>>, vector<1x1x8x32xf32>
    %434 = vector.shape_cast %433 : vector<1x1x8x32xf32> to vector<1x8x32xf32>
    %435 = vector.shape_cast %432 : vector<1x8x32xf32> to vector<1x1x8x32xf32>
    tpu.vector_store %arg11[%c2_221, %c0_222, %c0_223, %c0_224], %435 {strides = array<i32>} : memref<3x1x8x32xf32, #tpu.memory_space<vmem>>, vector<1x1x8x32xf32>,
    return
  }
  func.func @transform_0(%arg0: i32) -> (i32, i32, i32) {
    %c0_i32 = arith.constant 0 : i32
    %c0_i32_0 = arith.constant 0 : i32
    %c0_i32_1 = arith.constant 0 : i32
    return %arg0, %c0_i32, %c0_i32_0 : i32, i32, i32
  }
  func.func @transform_1(%arg0: i32) -> (i32, i32, i32) {
    %c0_i32 = arith.constant 0 : i32
    %c0_i32_0 = arith.constant 0 : i32
    %c0_i32_1 = arith.constant 0 : i32
    return %arg0, %c0_i32, %c0_i32_0 : i32, i32, i32
  }
  func.func @transform_2(%arg0: i32) -> (i32, i32, i32) {
    %c0_i32 = arith.constant 0 : i32
    %c0_i32_0 = arith.constant 0 : i32
    %c0_i32_1 = arith.constant 0 : i32
    %c0_i32_2 = arith.constant 0 : i32
    return %c0_i32, %c0_i32_0, %c0_i32_1 : i32, i32, i32
  }
  func.func @transform_3(%arg0: i32) -> (i32, i32, i32) {
    %c0_i32 = arith.constant 0 : i32
    %c0_i32_0 = arith.constant 0 : i32
    %c0_i32_1 = arith.constant 0 : i32
    %c0_i32_2 = arith.constant 0 : i32
    return %c0_i32, %c0_i32_0, %c0_i32_1 : i32, i32, i32
  }
  func.func @transform_4(%arg0: i32) -> (i32, i32, i32) {
    %c0_i32 = arith.constant 0 : i32
    %c0_i32_0 = arith.constant 0 : i32
    %c0_i32_1 = arith.constant 0 : i32
    %c0_i32_2 = arith.constant 0 : i32
    return %c0_i32, %c0_i32_0, %c0_i32_1 : i32, i32, i32
  }
  func.func @transform_5(%arg0: i32) -> (i32, i32, i32) {
    %c0_i32 = arith.constant 0 : i32
    %c0_i32_0 = arith.constant 0 : i32
    %c0_i32_1 = arith.constant 0 : i32
    %c0_i32_2 = arith.constant 0 : i32
    return %c0_i32, %c0_i32_0, %c0_i32_1 : i32, i32, i32
  }
  func.func @transform_6(%arg0: i32) -> (i32, i32, i32) {
    %c0_i32 = arith.constant 0 : i32
    %c0_i32_0 = arith.constant 0 : i32
    %c0_i32_1 = arith.constant 0 : i32
    %c0_i32_2 = arith.constant 0 : i32
    return %c0_i32, %c0_i32_0, %c0_i32_1 : i32, i32, i32
  }
  func.func @transform_7(%arg0: i32) -> (i32, i32, i32) {
    %c0_i32 = arith.constant 0 : i32
    %c0_i32_0 = arith.constant 0 : i32
    %c0_i32_1 = arith.constant 0 : i32
    %c0_i32_2 = arith.constant 0 : i32
    return %c0_i32, %c0_i32_0, %c0_i32_1 : i32, i32, i32
  }
  func.func @transform_8(%arg0: i32) -> (i32, i32, i32) {
    %c0_i32 = arith.constant 0 : i32
    %c0_i32_0 = arith.constant 0 : i32
    %c0_i32_1 = arith.constant 0 : i32
    %c0_i32_2 = arith.constant 0 : i32
    return %c0_i32, %c0_i32_0, %c0_i32_1 : i32, i32, i32
  }
  func.func @transform_9(%arg0: i32) -> (i32, i32, i32) {
    %c0_i32 = arith.constant 0 : i32
    %c0_i32_0 = arith.constant 0 : i32
    %c0_i32_1 = arith.constant 0 : i32
    %c0_i32_2 = arith.constant 0 : i32
    return %c0_i32, %c0_i32_0, %c0_i32_1 : i32, i32, i32
  }
  func.func @transform_10(%arg0: i32) -> (i32, i32, i32, i32) {
    %c0_i32 = arith.constant 0 : i32
    %c0_i32_0 = arith.constant 0 : i32
    %c0_i32_1 = arith.constant 0 : i32
    %c0_i32_2 = arith.constant 0 : i32
    return %c0_i32, %arg0, %c0_i32_0, %c0_i32_1 : i32, i32, i32, i32
  }
  func.func @transform_11(%arg0: i32) -> (i32, i32, i32) {
    %c0_i32 = arith.constant 0 : i32
    %c0_i32_0 = arith.constant 0 : i32
    %c0_i32_1 = arith.constant 0 : i32
    return %arg0, %c0_i32, %c0_i32_0 : i32, i32, i32
  }
}

</mosaic_0001>

<bundles_post_ra>
// kernel: tpu_custom_call.1
= control target key start
LH: loop header
LB: loop body
LE: loop exit
PB: predicated region body
PF: predicated region fallthrough
CT: control target
= control target key end

     0   :  { %s5093_s0 = inlined_call_operand.hbm [shape: f32[2,8,32], index: 0, kind: input, shape index: {}]   ;;  %s5094_s1 = inlined_call_operand.vmem [shape: f32[2,1,8], index: 1, kind: input, shape index: {}]   ;;  %s5095_s2 = inlined_call_operand.vmem [shape: f32[3,32,96], index: 2, kind: input, shape index: {}]   ;;  %s5096_s3 = inlined_call_operand.vmem [shape: f32[3,32,32], index: 3, kind: input, shape index: {}]   ;;  %s5097_s4 = inlined_call_operand.vmem [shape: f32[3,32,64], index: 4, kind: input, shape index: {}]   ;;  %s5098_s5 = inlined_call_operand.vmem [shape: f32[3,64,32], index: 5, kind: input, shape index: {}]   ;;  %s5099_s6 = inlined_call_operand.hbm [shape: f32[3,8,128], index: 6, kind: input, shape index: {}]   ;;  %s5100_s7 = inlined_call_operand.hbm [shape: f32[2,32,32], index: 7, kind: input, shape index: {}]   ;;  %s5101_s8 = inlined_call_operand.vmem [shape: f32[2,3,32], index: 8, kind: input, shape index: {}]   ;;  %s5102_s9 = inlined_call_operand.vmem [shape: f32[2,2,128], index: 9, kind: input, shape index: {}]   ;;  %s5103_s10 = inlined_call_operand.hbm [shape: f32[3,2,8,32], index: 10, kind: output, shape index: {0}]   ;;  %s5104_s11 = inlined_call_operand.hbm [shape: f32[2,2,128], index: 11, kind: output, shape index: {1}]  }
   0x1   :  { %5122 = sst [smem:[#allocation19_spill]] %s5093_s0 }
   0x2   :  { %5123 = sst [smem:[#allocation20_spill]] %s5099_s6 }
   0x3   :  { %5124 = sst [smem:[#allocation21_spill]] %s5100_s7 }
   0x4   :  { %17 = vsyncpa [#allocation3], 0 }
   0x5   :  { %19 = vsyncpa [#allocation3 + $0x1], 0 }
   0x6   :  { %20 = vsyncpa [#allocation6], 0 }
   0x7   :  { %21 = vsyncpa [#allocation4], 0 }
   0x8   :  { %23 = vsyncpa [#allocation4 + $0x1], 0 }
   0x9   :  { %24 = vsyncpa [#allocation10], 0 }
   0xa   :  { %26 = vsyncpa [#allocation10 + $0x1], 0  ;;  %s4356_s17 = smov 0   ;;  %s4358_s18 = smov 0  }
   0xb   :  { %s4360_s19 = smov 0   ;;  %s4362_s20 = smov 0  }
   0xc LB: > { %5125 = sst [smem:[#allocation15_spill]] %s4272_s19  ;;  %s4380_s24 = sadd.s32 4294967295, %s4276_s20   ;;  %s4276_s20 = sphi %s4362_s20, %s5148_s20   ;;  %s4272_s19 = sphi %s4360_s19, %s5150_s19   ;;  %s4268_s18 = sphi %s4358_s18, %s5152_s18   ;;  %s4264_s17 = sphi %s4356_s17, %s5151_s17  }
   0xd   : > { %s5126_s6 = sld [smem:[#allocation20_spill]]  ;;  %p3721_p0 = scmp.ge.s32.totalorder %s4276_s20, 1 }
   0xe   : > { %p53_p1 = scmp.eq.s32.totalorder %s4380_s24, 0  ;;  %p309_p2 = scmp.lt.s32.totalorder %s4276_s20, 3 }
   0xf   : > { %s4278_s26 = smov [#allocation5]   ;;  %s5128_s7 = sld [smem:[#allocation21_spill]] }
  0x10   : > { %p4385_p3 = pnand %p3721_p0, %p309_p2  ;;  %s334_s27 = sshll.u32 %s4278_s26, 4  ;;  %s335_s27 = int_to_ptr.vmem [resolvable:$true] %s334_s27 }
  0x11   : > { %s4279_s12 = smov [#allocation7]   ;;  %s4280_s14 = smov 128  }
  0x12   : > { %p3851_p4 = pneg %p4385_p3  ;;  %s348_s13 = sshll.u32 %s4279_s12, 4  ;;  %s349_s13 = int_to_ptr.vmem [resolvable:$true] %s348_s13 }
  0x13   : > { %s332_s23 = sshll.u32 %s5126_s6, 4  ;;  %s4281_s15 = smov 8   ;;  %s333_s23 = int_to_ptr.hbm [resolvable:$true] %s332_s23 }
  0x14   : > { %p3852_p6 = pnand %p3851_p4, %p53_p1  ;;  %s3720_s16 = sadd.s32 4294967294, %s4276_s20  }
  0x15   : > { %s346_s30 = sshll.u32 %s5128_s7, 4  ;;  %s4399_s21 = sadd.s32 1, %s4276_s20   ;;  %s347_s30 = int_to_ptr.hbm [resolvable:$true] %s346_s30 }
  0x16   : > { %3854 = dma.hbm_to_vmem [thread:$0]  (!%p3852_p6), %s333_s23, 384, %s335_s27, [#allocation6], %s4280_s14, %s4280_s14, %s4281_s15  }
  0x17   : > { %3857 = dma.hbm_to_vmem [thread:$0]  (!%p3852_p6), %s347_s30, 1024, %s349_s13, [#allocation6], %s4280_s14, %s4280_s14, %s4281_s15  }
  0x18   : > { %5129 = sst [smem:[#allocation16_spill]] %s4399_s21  ;;  %s36_s22 = ssub.s32 %s4276_s20, %s4399_s21 }
  0x19   : > { %s39_s26 = sadd.s32 1, %s4272_s19  ;;  %p37_p7 = scmp.eq.s32.totalorder %s36_s22, 0 }
  0x1a   : > { %p46_p8 = scmp.ne.s32.totalorder %s4272_s19, %s4268_s18  ;;  %p47_p9 = scmp.eq.s32.totalorder %s4276_s20, 0 }
  0x1b   : > { %p52_p10 = scmp.ne.s32.totalorder %s4268_s18, %s4264_s17  ;;  %p270_p13 = scmp.eq.s32.totalorder %s4380_s24, 1 }
  0x1c   : > { %s4410_s28 = scalar_select %p37_p7, %s4272_s19, %s39_s26  }
  0x1d   : > { %p4412_p11 = por %p47_p9, %p46_p8  ;;  %p4418_p12 = por %p53_p1, %p52_p10 }
  0x1e   : > { %5130 = sst [smem:[#allocation17_spill]] %s4410_s28  ;;  %p276_p0 = scmp.eq.s32.totalorder %s3720_s16, 1 }
  0x1f   : > { %p3871_p2 = scmp.lt.s32.totalorder %s4276_s20, 2  ;;  %s368_s27 = sand.u32 1, %s4272_s19  }
  0x20   : > { %p4425_p4 = por %p270_p13, %p46_p8  ;;  %p4429_p6 = por %p276_p0, %p52_p10 }
  0x21   : > { %s3725_s13 = sshll.u32 %s368_s27, 3  ;;  %s3726_s14 = sshll.u32 %s4276_s20, 3 }
  0x22   : > { %s5134_s12 = scalar_select %p4429_p6, 1, 0 }
  0x23   : > { %s5136_s0 = sld [smem:[#allocation19_spill]]  ;;  %s372_s6 = scalar_lea.vmem [#allocation2], %s3725_s13 }
  0x24   : > { %5135 = sst [smem:[#allocation18_spill]] %s5134_s12  ;;  %s380_s7 = sshll.u32 %s372_s6, 4  ;;  %s381_s7 = int_to_ptr.vmem [resolvable:$true] %s380_s7 }
  0x25   : > { %p4439_p7 = pnand %p3871_p2, %p4412_p11  ;;  %s369_s19 = scalar_lea.sflag [#allocation3], %s368_s27 }
  0x27   : > { %p4148_p9 = pneg %p4439_p7 }
  0x29   : > { %s376_s26 = scalar_lea.hbm %s5136_s0, %s3726_s14  ;;  %s4151_s14 = scalar_lea.hbm %s5136_s0, 16 }
  0x2a   : > { %s378_s28 = sshll.u32 %s376_s26, 4  ;;  %s379_s28 = int_to_ptr.hbm [resolvable:$true] %s378_s28 }
  0x2b   : > { %s4144_s21 = sshra.s32 %s379_s28, 4  ;;  %s4145_s21 = int_to_ptr.hbm [resolvable:$true] %s4144_s21 }
  0x2c   : > { %s4146_s12 = scalar_lea.hbm %s4145_s21, 8  ;;  %p4152_p11 = scmp.lt.s32.totalorder %s4145_s21, %s5136_s0 }
  0x2d   : > { %p4147_p8 = scmp.ne.s32.totalorder %s4145_s21, %s4146_s12  ;;  %p4153_p0 = scmp.lt.s32.totalorder %s4151_s14, %s4146_s12 }
  0x2f   : > { %p4149_p10 = pnand %p4148_p9, %p4147_p8  ;;  %p4154_p2 = por %p4153_p0, %p4152_p11 }
  0x31   : > { %p4150_p13 = pneg %p4149_p10 }
  0x33   : > { %p4155_p5 = pnand %p4154_p2, %p4150_p13 }
  0x35   : > { %4158 = shalt.err (!%p4155_p5)
}
  0x36   : > { %3861 = dma.hbm_to_vmem [thread:$0]  (!%p4439_p7), %s379_s28, 128, %s381_s7, %s369_s19  }
  0x37   : > { %395 = sbr.rel (%p4385_p3) target bundleno = 7333 (0x1ca5), region = 60  ;;  %s4456_s27 = sand.u32 (!%p4385_p3), 1, %s4268_s18  }
  0x38   : > { %s3728_s22 = sshll.u32 (!%p4385_p3), %s4456_s27, 3  ;;  %s398_s26 = scalar_lea.sflag (!%p4385_p3), [#allocation3], %s4456_s27 }
  0x39   : > { %s401_s13 = scalar_lea.vmem (!%p4385_p3), [#allocation2], %s3728_s22 }
  0x3c   : > { %4247 = dma.done.wait (%p4418_p12), %s398_s26, 128  }
  0x3d   : > { %4249 = vsyncadd (%p4418_p12), %s398_s26, 4294967168 }
  0x3e   : > { %4251 = dma.done.wait (%p53_p1), [#allocation6], 1408  }
  0x3f   : > { %4253 = vsyncadd (%p53_p1), [#allocation6], 4294965888  ;;  %v467_v0 = vld [vmem:[%s5095_s2 + $0x18] sm:$0xff]  ;;  %v466_v1 = vld [vmem:[%s5095_s2 + $0x10] sm:$0xff]  ;;  %vm470_vm0 = vcmask 261120   ;;  %s5120_s6 = smov 104  }
  0x40   : > { %486 = vmatpush.msra.mxu0 %v467_v0  ;;  %v465_v2 = vld [vmem:[%s5095_s2 + $0x8] sm:$0xff]  ;;  %v464_v3 = vld [vmem:[%s5095_s2] sm:$0xff]  ;;  %v3974_v5 = vld [vmem:[#allocation5] ss:$0 sm:$0xff]  ;;  %s5121_s14 = smov 120   ;;  %s5119_s15 = smov 112  }
  0x41   : > { %v4480_v4 = vld [vmem:[%s401_s13] sm:$0xff]  ;;  %s5117_s29 = smov 96   ;;  %p459_p1 = scmp.lt.s32.totalorder %s4380_s24, 1  ;;  %vm644_vm1 = vcmask 64512   ;;  %vm1150_vm2 = vcmask 1047556   ;;  %vm1273_vm3 = vcmask 130048  }
  0x42   : > { %487 = vmatpush.msra.mxu0 %v466_v1  ;;  %s5115_s19 = smov 64   ;;  %s5109_s25 = smov 24   ;;  %vm1275_vm4 = vcmask 195584   ;;  %vm1390_vm9 = vcmask 523264  }
  0x43   : > { %s460_s22 = scalar_select %p459_p1, %s4380_s24, 1 }
  0x44   : > { %488 = vmatpush.msra.mxu0 %v465_v2  ;;  %s5111_s21 = smov 16   ;;  %s5113_s28 = smov 8  }
  0x45   : > { %s4495_s7 = scalar_lea.vmem %s5094_s1, %s460_s22  ;;  %s3836_s16 = smul.u32 24, %s4456_s27 }
  0x46   : > { %489 = vmatpush.msra.mxu0 %v464_v3  ;;  %v4502_v20 = vld [vmem:[%s4495_s7] ss:$0 sm:$0xff]  ;;  %s5140_s12 = smov 24   ;;  %s5141_s23 = smov 8  }
  0x47   : > { %3732 = vmatmul.msk.f32.vlgmr.msra.gmra.mxu0 %vm470_vm0, %v4480_v4  ;;  %s4655_s22 = scalar_lea.vmem [#allocation8], %s3836_s16  ;;  %s5142_s26 = smov 120  }
  0x48   : > { %s5143_s13 = smov 104  }
  0xc4   : > { %v491_v6 = vpop.f32.mrf.mxu0 }
  0xc5   : > { %v492_v7 = vadd.f32 %v3974_v5, %v491_v6 }
  0xc7   : > { %499 = vrot.lane.b32.xlu1 %v492_v7, %s5120_s6  ;;  %495 = vrot.lane.b32.xlu0 %v492_v7, %s5121_s14 }
  0xcf   : > { %497 = vrot.lane.b32.xlu0 %v492_v7, %s5119_s15 }
 0x139   : > { %v496_v8 = vpop.permute.xlu0 %495  ;;  %v500_v11 = vpop.permute.xlu1 %499 }
 0x13a   : > { %v3926_v9 = vpack.i.bf16 %v496_v8, %v492_v7 }
 0x13c   : > { %3927 = vrot.lane.b32.xlu1 %v3926_v9, %s5117_s29 }
 0x141   : > { %v498_v10 = vpop.permute.xlu0 %497 }
 0x142   : > { %508 = vrot.lane.b32.xlu2 %v498_v10, %s5117_s29 }
 0x14a   : > { %510 = vrot.lane.b32.xlu2 %v500_v11, %s5117_s29 }
 0x19c   : > { %v509_v12 = vpop.permute.xlu2 %508 }
 0x19d   : > { %580 = vxpose.xlu1.b32.start.end [1/1] (short) (narrow) %v509_v12, 8 }
 0x1a4   : > { %v511_v13 = vpop.permute.xlu2 %510 }
 0x1a5   : > { %612 = vxpose.xlu2.b32.start.end [1/1] (short) (narrow) %v511_v13, 8 }
 0x1ae   : > { %v3928_v14 = vpop.permute.xlu1 %3927 }
 0x1af   : > { %3932 = vxpose.xlu0.b32.start.end [1/1] (short) (narrow) %v3928_v14, 8 }
 0x23e   : > { %v628_v19 = vpop.trf.xlu2 }
 0x241   : > { %v596_v15 = vpop.trf.xlu1 }
 0x242   : > { %706 = vmatpush.msra.mxu3 %v596_v15 }
 0x243   : > { %3735 = vmatmul.msk.f32.vlgmr.msra.gmra.mxu3 %vm644_vm1, %v498_v10 }
 0x253   : > { %v3933_v16 = vpop.trf.xlu0 }
 0x254   : > { %v3934_v17 = vunpack.i.l.bf16 %v3933_v16  ;;  %v3937_v18 = vunpack.i.h.bf16 %v3933_v16  ;;  %v4287_v16 = vmov 1983009808  }
 0x256   : > { %662 = vmatpush.msra.mxu1 %v3934_v17  ;;  %684 = vmatpush.msra.mxu2 %v3937_v18  ;;  %v1155_v17 = vunpack.c.l.s4 %v4287_v16 }
 0x257   : > { %3733 = vmatmul.msk.f32.vlgmr.msra.gmra.mxu1 %vm644_vm1, %v492_v7  ;;  %3734 = vmatmul.msk.f32.vlgmr.msra.gmra.mxu2 %vm644_vm1, %v496_v8 }
 0x258   : > { %728 = vmatpush.msrb.mxu1 %v628_v19 }
 0x25f   : > { %3736 = vmatmul.msk.f32.vlgmr.msrb.gmra.mxu1 %vm644_vm1, %v500_v11 }
 0x2c6   : > { %v708_v21 = vpop.f32.mrf.mxu3 }
 0x2c7   : > { %v709_v22 = vadd.f32 %v4502_v20, %v708_v21 }
 0x2c9   : > { %v739_v23 = vsel %vm644_vm1, %v709_v22, -inf }
 0x2ca   : > { %740 = vmax.xlane.f32.xlu1 %v739_v23 }
 0x2d4   : > { %v664_v24 = vpop.f32.mrf.mxu1 }
 0x2d5   : > { %v665_v25 = vadd.f32 %v4502_v20, %v664_v24 }
 0x2d7   : > { %v733_v26 = vsel %vm644_vm1, %v665_v25, -inf }
 0x2d8   : > { %734 = vmax.xlane.f32.xlu0 %v733_v26  ;;  %v4288_v26 = vmov 1934713408  }
 0x2da   : > { %v686_v27 = vpop.f32.mrf.mxu2 }
 0x2db   : > { %v687_v28 = vadd.f32 %v4502_v20, %v686_v27  ;;  %v1179_v27 = vunpack.c.l.s4 %v4288_v26  ;;  %v1280_v26 = vld [vmem:[%s5096_s3 + $0x18] sm:$0xff] }
 0x2dc   : > { %v730_v29 = vpop.f32.mrf.mxu1  ;;  %1298 = vmatpush.msrb.mxu2 %v1280_v26 }
 0x2dd   : > { %v731_v30 = vadd.f32 %v4502_v20, %v730_v29  ;;  %v736_v31 = vsel %vm644_vm1, %v687_v28, -inf }
 0x2de   : > { %737 = vmax.xlane.f32.xlu2 %v736_v31 }
 0x2df   : > { %v742_v32 = vsel %vm644_vm1, %v731_v30, -inf }
 0x2e0   : > { %743 = vmax.xlane.f32.xlu0 %v742_v32  ;;  %v4534_v32 = vunpack.c.0.s8 %v1179_v27  ;;  %v1279_v27 = vld [vmem:[%s5096_s3 + $0x10] sm:$0xff] }
 0x2e1   : > { %1299 = vmatpush.msrb.mxu2 %v1279_v27 }
 0x2e3   : > { %777 = vrot.lane.b32.xlu1 %v492_v7, %s5115_s19 }
 0x2f4   : > { %779 = vrot.lane.b32.xlu0 %v496_v8, %s5115_s19 }
 0x2f6   : > { %781 = vrot.lane.b32.xlu2 %v498_v10, %s5115_s19 }
 0x2fc   : > { %783 = vrot.lane.b32.xlu0 %v500_v11, %s5115_s19  ;;  %s3731_s19 = sshll.u32 %s4456_s27, 1 }
 0x33d   : > { %v741_v33 = vpop.xlane.xlu1 %740 }
 0x33e   : > { %v747_v34 = vsub.f32 %v709_v22, %v741_v33  ;;  %v4528_v22 = vunpack.c.0.s8 %v1155_v17 }
 0x340   : > { %v753_v35 = vmul.f32 1.442695, %v747_v34 }
 0x342   : > { %3999 = vpow2.f32 %v753_v35 }
 0x348   : > { %v4000_v36 = vpop.eup %3999 }
 0x349   : > { %v763_v37 = vsel %vm644_vm1, %v4000_v36, 0.0 }
 0x34a   : > { %764 = vadd.xlane.f32.xlu0 %v763_v37 }
 0x34b   : > { %v735_v38 = vpop.xlane.xlu0 %734 }
 0x34c   : > { %v745_v39 = vsub.f32 %v665_v25, %v735_v38 }
 0x34e   : > { %v749_v40 = vmul.f32 1.442695, %v745_v39 }
 0x350   : > { %4001 = vpow2.f32 %v749_v40 }
 0x351   : > { %v738_v41 = vpop.xlane.xlu2 %737 }
 0x352   : > { %v746_v42 = vsub.f32 %v687_v28, %v738_v41 }
 0x353   : > { %v744_v43 = vpop.xlane.xlu0 %743 }
 0x354   : > { %v751_v44 = vmul.f32 1.442695, %v746_v42  ;;  %v748_v45 = vsub.f32 %v731_v30, %v744_v43 }
 0x355   : > { %v778_v56 = vpop.permute.xlu1 %777 }
 0x356   : > { %v4002_v46 = vpop.eup %4001  ;;  %4003 = vpow2.f32 %v751_v44  ;;  %v755_v47 = vmul.f32 1.442695, %v748_v45 }
 0x357   : > { %v757_v48 = vsel %vm644_vm1, %v4002_v46, 0.0 }
 0x358   : > { %4005 = vpow2.f32 %v755_v47  ;;  %758 = vadd.xlane.f32.xlu2 %v757_v48 }
 0x359   : > { %v782_v53 = vpop.permute.xlu2 %781 }
 0x35c   : > { %v4004_v49 = vpop.eup %4003 }
 0x35d   : > { %v760_v50 = vsel %vm644_vm1, %v4004_v49, 0.0 }
 0x35e   : > { %v4006_v51 = vpop.eup %4005  ;;  %761 = vadd.xlane.f32.xlu1 %v760_v50 }
 0x35f   : > { %v766_v52 = vsel %vm644_vm1, %v4006_v51, 0.0 }
 0x360   : > { %767 = vadd.xlane.f32.xlu2 %v766_v52 }
 0x366   : > { %v780_v54 = vpop.permute.xlu0 %779 }
 0x36e   : > { %v784_v55 = vpop.permute.xlu0 %783 }
 0x373   : > { %853 = vxpose.xlu0.b32.start.end [1/1] (short) (narrow) %v782_v53, 8 }
 0x389   : > { %821 = vxpose.xlu2.b32.start.end [1/1] (short) (narrow) %v780_v54, 8 }
 0x391   : > { %885 = vxpose.xlu2.b32.start.end [1/1] (short) (narrow) %v784_v55, 8 }
 0x398   : > { %789 = vxpose.xlu1.b32.start.end [1/1] (short) (narrow) %v778_v56, 8 }
 0x3bd   : > { %v765_v57 = vpop.xlane.xlu0 %764 }
 0x3be   : > { %4007 = vrcp.f32 %v765_v57 }
 0x3c4   : > { %v4008_v58 = vpop.eup %4007 }
 0x3c5   : > { %v775_v59 = vmul.f32 %v4008_v58, %v4000_v36 }
 0x3c7   : > { %3741 = vmatpush.xpose.msk.msrb.mxu0 %vm644_vm1, %v775_v59 }
 0x3cb   : > { %v759_v60 = vpop.xlane.xlu2 %758 }
 0x3cc   : > { %4009 = vrcp.f32 %v759_v60 }
 0x3d1   : > { %v762_v61 = vpop.xlane.xlu1 %761 }
 0x3d2   : > { %v4010_v62 = vpop.eup %4009  ;;  %4011 = vrcp.f32 %v762_v61 }
 0x3d3   : > { %v768_v63 = vpop.xlane.xlu2 %767  ;;  %v773_v0 = vmul.f32 %v4010_v62, %v4002_v46 }
 0x3d4   : > { %4013 = vrcp.f32 %v768_v63 }
 0x3d5   : > { %3737 = vmatpush.xpose.msk.msrb.mxu3 %vm644_vm1, %v773_v0 }
 0x3d8   : > { %v4012_v1 = vpop.eup %4011 }
 0x3d9   : > { %v774_v2 = vmul.f32 %v4012_v1, %v4004_v49 }
 0x3da   : > { %v4014_v3 = vpop.eup %4013 }
 0x3db   : > { %v776_v5 = vmul.f32 %v4014_v3, %v4006_v51  ;;  %3739 = vmatpush.xpose.msk.msra.mxu3 %vm644_vm1, %v774_v2 }
 0x3dd   : > { %3743 = vmatpush.xpose.msk.msra.mxu1 %vm644_vm1, %v776_v5 }
 0x417   : > { %v869_v7 = vpop.trf.xlu0 }
 0x418   : > { %3742 = vmatmul.msk.f32.vlgmr.msrb.gmra.mxu0 %vm644_vm1, %v869_v7 }
 0x422   : > { %v837_v6 = vpop.trf.xlu2 }
 0x42a   : > { %v901_v8 = vpop.trf.xlu2 }
 0x42b   : > { %3744 = vmatmul.msk.f32.vlgmr.msra.gmra.mxu1 %vm644_vm1, %v901_v8 }
 0x43c   : > { %v805_v9 = vpop.trf.xlu1 }
 0x43d   : > { %3738 = vmatmul.msk.f32.vlgmr.msrb.gmra.mxu3 %vm644_vm1, %v805_v9 }
 0x445   : > { %3740 = vmatmul.msk.f32.vlgmr.msra.gmra.mxu3 %vm644_vm1, %v837_v6 }
 0x495   : > { %v992_v11 = vpop.f32.mrf.mxu0 }
 0x4a8   : > { %v1018_v10 = vpop.f32.mrf.mxu1 }
 0x4a9   : > { %1117 = vxpose.xlu0.b32.start.end [1/1] (short) (narrow) %v1018_v10, 8 }
 0x4b1   : > { %1085 = vxpose.xlu0.b32.start.end [1/1] (short) (narrow) %v992_v11, 8 }
 0x4c0   : > { %v940_v12 = vpop.f32.mrf.mxu3 }
 0x4c1   : > { %1021 = vxpose.xlu2.b32.start.end [1/1] (short) (narrow) %v940_v12, 8 }
 0x4c8   : > { %v966_v13 = vpop.f32.mrf.mxu3 }
 0x4c9   : > { %1053 = vxpose.xlu1.b32.start.end [1/1] (short) (narrow) %v966_v13, 8 }
 0x54d   : > { %v1133_v14 = vpop.trf.xlu0 }
 0x54e   : > { %v1162_v29 = vrot.slane %v1133_v14, 4 }
 0x555   : > { %v1101_v15 = vpop.trf.xlu0 }
 0x556   : > { %v1149_v19 = vrot.slane %v1101_v15, 4 }
 0x55a   : > { %v1037_v18 = vpop.trf.xlu2 }
 0x55b   : > { %v1152_v21 = vrot.slane %v1037_v18, 4  ;;  %v1151_v23 = vsel %vm1150_vm2, %v1149_v19, %v1037_v18 }
 0x55c   : > { %v1157_v25 = vperm.slane %v1151_v23, %v4528_v22 }
 0x55d   : > { %v1153_v24 = vsel %vm1150_vm2, %v1101_v15, %v1152_v21 }
 0x55e   : > { %v1161_v28 = vperm.slane %v1153_v24, %v4528_v22  ;;  %v1176_v30 = vrot.slane %v1157_v25, 4 }
 0x560   : > { %v1188_v35 = vrot.slane %v1161_v28, 4 }
 0x56d   : > { %v1069_v31 = vpop.trf.xlu1 }
 0x56e   : > { %v1163_v33 = vsel %vm1150_vm2, %v1162_v29, %v1069_v31  ;;  %v1164_v34 = vrot.slane %v1069_v31, 4  ;;  %v1277_v29 = vld [vmem:[%s5096_s3] sm:$0xff] }
 0x56f   : > { %v1169_v36 = vperm.slane %v1163_v33, %v4528_v22 }
 0x570   : > { %v1165_v37 = vsel %vm1150_vm2, %v1133_v14, %v1164_v34 }
 0x571   : > { %v1173_v38 = vperm.slane %v1165_v37, %v4528_v22  ;;  %v1174_v39 = vrot.slane %v1169_v36, 4  ;;  %v1177_v40 = vsel %vm1150_vm2, %v1169_v36, %v1176_v30  ;;  %v3976_v37 = vld [vmem:[#allocation5 + $0x2] ss:$0 sm:$0xff] }
 0x572   : > { %v1185_v41 = vperm.slane %v1177_v40, %v4534_v32 }
 0x573   : > { %v1175_v42 = vsel %vm1150_vm2, %v1174_v39, %v1157_v25  ;;  %v1186_v43 = vrot.slane %v1173_v38, 4  ;;  %v1189_v44 = vsel %vm1150_vm2, %v1173_v38, %v1188_v35 }
 0x574   : > { %v1181_v45 = vperm.slane %v1175_v42, %v4534_v32  ;;  %v1197_v46 = vperm.slane %v1189_v44, %v4534_v32  ;;  %v1200_v47 = vrot.slane %v1185_v41, 4  ;;  %v4292_v42 = vmov 32.0  }
 0x575   : > { %v1187_v48 = vsel %vm1150_vm2, %v1186_v43, %v1161_v28  ;;  %v1278_v28 = vld [vmem:[%s5096_s3 + $0x8] sm:$0xff]  ;;  %4015 = vrcp.f32 %v4292_v42  ;;  %v1447_v42 = vld [vmem:[#allocation7 + $0x18] sm:$0xff] }
 0x576   : > { %v1193_v49 = vperm.slane %v1187_v48, %v4534_v32  ;;  %v1198_v50 = vrot.slane %v1181_v45, 4  ;;  %v1201_v51 = vsel %vm1150_vm2, 0.0, %v1200_v47  ;;  %v1204_v52 = vrot.slane %v1197_v46, 4  ;;  %1300 = vmatpush.msrb.mxu2 %v1278_v28  ;;  %1464 = vmatpush.msrb.mxu1 %v1447_v42 }
 0x577   : > { %v1206_v53 = vsel %vm1150_vm2, %v1200_v47, %v1181_v45  ;;  %v1211_v54 = vrot.slane %v1201_v51, 4 }
 0x578   : > { %v1199_v55 = vsel %vm1150_vm2, 0.0, %v1198_v50  ;;  %v1202_v56 = vrot.slane %v1193_v49, 4  ;;  %v1205_v57 = vsel %vm1150_vm2, 0.0, %v1204_v52  ;;  %v1210_v58 = vperm.slane %v1206_v53, %v4528_v22  ;;  %1301 = vmatpush.msrb.mxu2 %v1277_v29  ;;  %v1345_v53 = vld [vmem:[%s5097_s4 + $0x18] sm:$0xff] }
 0x579   : > { %v1222_v59 = vrot.slane %v1205_v57, 4  ;;  %v1212_v60 = vsel %vm1150_vm2, %v1211_v54, %v1199_v55  ;;  %v1217_v61 = vsel %vm1150_vm2, %v1204_v52, %v1193_v49  ;;  %1363 = vmatpush.msrb.mxu3 %v1345_v53  ;;  %v1344_v54 = vld [vmem:[%s5097_s4 + $0x10] sm:$0xff]  ;;  %v1343_v55 = vld [vmem:[%s5097_s4 + $0x8] sm:$0xff] }
 0x57a   : > { %v1203_v62 = vsel %vm1150_vm2, 0.0, %v1202_v56  ;;  %v1216_v63 = vperm.slane %v1212_v60, %v4528_v22  ;;  %v1221_v0 = vperm.slane %v1217_v61, %v4528_v22  ;;  %v1230_v1 = vrot.slane %v1210_v58, 4  ;;  %v1342_v56 = vld [vmem:[%s5097_s4] sm:$0xff] }
 0x57b   : > { %v1223_v2 = vsel %vm1150_vm2, %v1222_v59, %v1203_v62  ;;  %v4016_v43 = vpop.eup %4015  ;;  %1364 = vmatpush.msrb.mxu3 %v1344_v54 }
 0x57c   : > { %v1227_v3 = vperm.slane %v1223_v2, %v4528_v22  ;;  %v1231_v5 = vsel %vm1150_vm2, %v1216_v63, %v1230_v1  ;;  %v1242_v6 = vrot.slane %v1221_v0, 4  ;;  %v1228_v7 = vrot.slane %v1216_v63, 4  ;;  %v3977_v2 = vld [vmem:[#allocation5 + $0x3] ss:$0 sm:$0xff] }
 0x57d   : > { %v1239_v8 = vperm.slane %v1231_v5, %v4534_v32  ;;  %v1313_v44 = vmul.f32 32.0, %v4016_v43  ;;  %vm1317_vm5 = vweird.f32 %v4016_v43  ;;  %1365 = vmatpush.msrb.mxu3 %v1343_v55 }
 0x57e   : > { %v1243_v9 = vsel %vm1150_vm2, %v1227_v3, %v1242_v6  ;;  %v1229_v10 = vsel %vm1150_vm2, %v1228_v7, %v1210_v58  ;;  %v1240_v11 = vrot.slane %v1227_v3, 4  ;;  %v3978_v6 = vld [vmem:[#allocation5 + $0x4] ss:$0 sm:$0xff] }
 0x57f   : > { %v1251_v12 = vperm.slane %v1243_v9, %v4534_v32  ;;  %v1258_v13 = vrot.slane %v1239_v8, 4  ;;  %v1235_v14 = vperm.slane %v1229_v10, %v4534_v32  ;;  %v1314_v45 = vsub.f32 1.0, %v1313_v44  ;;  %1366 = vmatpush.msrb.mxu3 %v1342_v56  ;;  %v1387_v9 = vld [vmem:[%s5098_s5 + $0x38] sm:$0xff]  ;;  %v1386_v10 = vld [vmem:[%s5098_s5 + $0x30] sm:$0xff] }
 0x580   : > { %v1241_v15 = vsel %vm1150_vm2, %v1240_v11, %v1221_v0  ;;  %1402 = vmatpush.msra.mxu0 %v1387_v9  ;;  %v1385_v11 = vld [vmem:[%s5098_s5 + $0x28] sm:$0xff]  ;;  %v1446_v44 = vld [vmem:[#allocation7 + $0x10] sm:$0xff] }
 0x581   : > { %v1259_v16 = vsel %vm1150_vm2, %v1251_v12, %v1258_v13  ;;  %v1256_v17 = vrot.slane %v1251_v12, 4  ;;  %v1247_v18 = vperm.slane %v1241_v15, %v4534_v32  ;;  %v1254_v19 = vrot.slane %v1235_v14, 4  ;;  %v1384_v12 = vld [vmem:[%s5098_s5 + $0x20] sm:$0xff]  ;;  %v1383_v13 = vld [vmem:[%s5098_s5 + $0x18] sm:$0xff]  ;;  %v1381_v15 = vld [vmem:[%s5098_s5 + $0x8] sm:$0xff]  ;;  %1465 = vmatpush.msrb.mxu1 %v1446_v44 }
 0x582   : > { %1269 = vrot.lane.b32.xlu1 %v1259_v16, %s5109_s25  ;;  %v1315_v46 = vmul.f32 %v4016_v43, %v1314_v45  ;;  %1403 = vmatpush.msra.mxu0 %v1386_v10  ;;  %v1380_v16 = vld [vmem:[%s5098_s5] sm:$0xff]  ;;  %v3753_v45 = vld [vmem:[%s5095_s2 + $0x30] sm:$0xff]  ;;  %s5138_s25 = smov 64  }
 0x583   : > { %v1257_v21 = vsel %vm1150_vm2, %v1256_v17, %v1239_v8  ;;  %v1252_v23 = vrot.slane %v1247_v18, 4  ;;  %v1255_v24 = vsel %vm1150_vm2, %v1247_v18, %v1254_v19  ;;  %v3979_v17 = vld [vmem:[#allocation5 + $0x1] ss:$0 sm:$0xff] }
 0x584   : > { %1265 = vrot.lane.b32.xlu0 %v1257_v21, %s5111_s21  ;;  %1261 = vrot.lane.b32.xlu2 %v1255_v24, %s5113_s28  ;;  %v1316_v47 = vadd.f32 %v4016_v43, %v1315_v46  ;;  %v1445_v46 = vld [vmem:[#allocation7 + $0x8] sm:$0xff]  ;;  %s5139_s21 = smov 16  }
 0x585   : > { %v1253_v25 = vsel %vm1150_vm2, %v1252_v23, %v1235_v14  ;;  %1404 = vmatpush.msra.mxu0 %v1385_v11  ;;  %v1382_v14 = vld [vmem:[%s5098_s5 + $0x10] sm:$0xff]  ;;  %1466 = vmatpush.msrb.mxu1 %v1445_v46 }
 0x586   : > { %v4593_v48 = vsel %vm1317_vm5, %v4016_v43, %v1316_v47  ;;  %v3754_v43 = vld [vmem:[%s5095_s2 + $0x38] sm:$0xff]  ;;  %v3752_v47 = vld [vmem:[%s5095_s2 + $0x28] sm:$0xff] }
 0x587   : > { %1405 = vmatpush.msra.mxu0 %v1384_v12  ;;  %1551 = vmatpush.msra.mxu3 %v3754_v43 }
 0x589   : > { %1406 = vmatpush.msra.mxu0 %v1383_v13  ;;  %1552 = vmatpush.msra.mxu3 %v3753_v45 }
 0x58b   : > { %1407 = vmatpush.msra.mxu0 %v1382_v14  ;;  %1553 = vmatpush.msra.mxu3 %v3752_v47 }
 0x58d   : > { %1408 = vmatpush.msra.mxu0 %v1381_v15 }
 0x58f   : > { %1409 = vmatpush.msra.mxu0 %v1380_v16 }
 0x5de   : > { %v1262_v30 = vpop.permute.xlu2 %1261 }
 0x5df   : > { %v1272_v31 = vsel %vm644_vm1, %v1253_v25, %v1262_v30 }
 0x5f4   : > { %v1270_v34 = vpop.permute.xlu1 %1269 }
 0x5f6   : > { %v1266_v33 = vpop.permute.xlu0 %1265 }
 0x5f7   : > { %v1274_v35 = vsel %vm1273_vm3, %v1272_v31, %v1266_v33  ;;  %v3980_v31 = vld [vmem:[#allocation5 + $0x5] ss:$0 sm:$0xff] }
 0x5f8   : > { %v1276_v36 = vsel %vm1275_vm4, %v1274_v35, %v1270_v34 }
 0x5f9   : > { %3745 = vmatmul.msk.f32.vlgmr.msrb.gmra.mxu2 %vm470_vm0, %v1276_v36 }
 0x67c   : > { %v1303_v38 = vpop.f32.mrf.mxu2 }
 0x67d   : > { %v1304_v39 = vadd.f32 %v3976_v37, %v1303_v38 }
 0x67f   : > { %v1306_v40 = vadd.f32 %v1304_v39, %v4480_v4 }
 0x681   : > { %v1309_v41 = vsel %vm470_vm0, %v1306_v40, 0.0 }
 0x682   : > { %1310 = vadd.xlane.f32.xlu1 %v1309_v41 }
 0x6f5   : > { %v1311_v49 = vpop.xlane.xlu1 %1310 }
 0x6f6   : > { %v1319_v50 = vmul.f32 %v4593_v48, %v1311_v49  ;;  %v1444_v49 = vld [vmem:[#allocation7] sm:$0xff] }
 0x6f7   : > { %1467 = vmatpush.msrb.mxu1 %v1444_v49 }
 0x6f8   : > { %v1320_v51 = vsub.f32 %v1306_v40, %v1319_v50  ;;  %v3751_v50 = vld [vmem:[%s5095_s2 + $0x20] sm:$0xff] }
 0x6f9   : > { %1554 = vmatpush.msra.mxu3 %v3751_v50 }
 0x6fa   : > { %v1321_v52 = vmul.f32 %v1320_v51, %v1320_v51 }
 0x6fc   : > { %v1322_v4 = vsel %vm470_vm0, %v1321_v52, 0.0 }
 0x6fd   : > { %1323 = vadd.xlane.f32.xlu2 %v1322_v4 }
 0x770   : > { %v1324_v57 = vpop.xlane.xlu2 %1323 }
 0x771   : > { %v1325_v58 = vmul.f32 %v1324_v57, %v4593_v48 }
 0x773   : > { %v1326_v59 = vadd.f32 1e-12, %v1325_v58 }
 0x775   : > { %4017 = vrsqrt.f32 %v1326_v59  ;;  %vm1333_vm7 = vweird.f32 %v1326_v59 }
 0x77b   : > { %v4018_v60 = vpop.eup %4017 }
 0x77c   : > { %v1328_v61 = vmul.f32 %v4018_v60, %v1326_v59  ;;  %vm1334_vm6 = vweird.f32 %v4018_v60  ;;  %v3981_v59 = vld [vmem:[#allocation5 + $0x6] ss:$0 sm:$0xff] }
 0x77d   : > { %vm1335_vm8 = vmor %vm1333_vm7, %vm1334_vm6 }
 0x77e   : > { %v1329_v62 = vmul.f32 %v4018_v60, %v1328_v61 }
 0x780   : > { %v1330_v63 = vmul.f32 0.5, %v1329_v62  ;;  %v3982_v62 = vld [vmem:[#allocation5 + $0x7] ss:$0 sm:$0xff] }
 0x782   : > { %v1331_v0 = vsub.f32 1.5, %v1330_v63 }
 0x784   : > { %v1332_v1 = vmul.f32 %v4018_v60, %v1331_v0 }
 0x786   : > { %v1336_v3 = vsel %vm1335_vm8, %v4018_v60, %v1332_v1  ;;  %v1473_v1 = vld [vmem:[%s5101_s8] sm:$0x7]  ;;  %vm1501_vm8 = vcmask 16384  }
 0x787   : > { %v1337_v5 = vmul.f32 %v1336_v3, %v1320_v51  ;;  %3749 = vmatpush.xpose.msk.msra.mxu2 %vm470_vm0, %v1473_v1 }
 0x789   : > { %v1339_v7 = vmul.f32 %v3977_v2, %v1337_v5  ;;  %v1448_v2 = vld [vmem:[%s5102_s9] sm:$0x1] }
 0x78b   : > { %v1341_v8 = vadd.f32 %v3978_v6, %v1339_v7  ;;  %v3983_v6 = vld [vmem:[#allocation5 + $0x8] ss:$0 sm:$0xff] }
 0x78d   : > { %3746 = vmatmul.msk.f32.vlgmr.msrb.gmra.mxu3 %vm470_vm0, %v1341_v8 }
 0x810   : > { %v1368_v18 = vpop.f32.mrf.mxu3 }
 0x811   : > { %v1369_v19 = vadd.f32 %v3979_v17, %v1368_v18 }
 0x813   : > { %v1372_v21 = vmul.f32 0.044715, %v1369_v19  ;;  %v1371_v28 = vmul.f32 0.5, %v1369_v19 }
 0x815   : > { %v1373_v23 = vmul.f32 %v1372_v21, %v1369_v19 }
 0x817   : > { %v1374_v24 = vmul.f32 %v1373_v23, %v1369_v19 }
 0x819   : > { %v1375_v25 = vadd.f32 %v1374_v24, %v1369_v19 }
 0x81b   : > { %v1376_v26 = vmul.f32 0.7978846, %v1375_v25 }
 0x81d   : > { %4019 = vtanh.f32 %v1376_v26 }
 0x823   : > { %v4020_v27 = vpop.eup %4019 }
 0x824   : > { %v1378_v29 = vadd.f32 1.0, %v4020_v27 }
 0x826   : > { %v1379_v30 = vmul.f32 %v1378_v29, %v1371_v28 }
 0x828   : > { %3747 = vmatmul.msk.f32.vlgmr.msra.gmra.mxu0 %vm1390_vm9, %v1379_v30 }
 0x8a5   : > { %v1411_v33 = vpop.f32.mrf.mxu0 }
 0x8a6   : > { %v1412_v34 = vadd.f32 %v3980_v31, %v1411_v33 }
 0x8a8   : > { %v1414_v35 = vadd.f32 %v1412_v34, %v1341_v8 }
 0x8aa   : > { %v1417_v36 = vsel %vm470_vm0, %v1414_v35, 0.0 }
 0x8ab   : > { %1418 = vadd.xlane.f32.xlu0 %v1417_v36 }
 0x91e   : > { %v1419_v37 = vpop.xlane.xlu0 %1418 }
 0x91f   : > { %v1420_v38 = vmul.f32 %v1419_v37, %v4593_v48 }
 0x921   : > { %v1421_v39 = vsub.f32 %v1414_v35, %v1420_v38 }
 0x923   : > { %v1422_v40 = vmul.f32 %v1421_v39, %v1421_v39 }
 0x925   : > { %v1423_v41 = vsel %vm470_vm0, %v1422_v40, 0.0 }
 0x926   : > { %1424 = vadd.xlane.f32.xlu1 %v1423_v41 }
 0x999   : > { %v1425_v51 = vpop.xlane.xlu1 %1424 }
 0x99a   : > { %v1426_v52 = vmul.f32 %v1425_v51, %v4593_v48 }
 0x99c   : > { %v1427_v4 = vadd.f32 1e-12, %v1426_v52 }
 0x99e   : > { %4021 = vrsqrt.f32 %v1427_v4  ;;  %vm1434_vm11 = vweird.f32 %v1427_v4 }
 0x9a4   : > { %v4022_v53 = vpop.eup %4021 }
 0x9a5   : > { %v1429_v54 = vmul.f32 %v4022_v53, %v1427_v4  ;;  %vm1435_vm10 = vweird.f32 %v4022_v53 }
 0x9a6   : > { %vm1436_vm12 = vmor %vm1434_vm11, %vm1435_vm10  ;;  %vm1528_vm10 = vcmask 293888  }
 0x9a7   : > { %v1430_v55 = vmul.f32 %v4022_v53, %v1429_v54 }
 0x9a9   : > { %v1431_v56 = vmul.f32 0.5, %v1430_v55 }
 0x9ab   : > { %v1432_v57 = vsub.f32 1.5, %v1431_v56 }
 0x9ad   : > { %v1433_v58 = vmul.f32 %v4022_v53, %v1432_v57 }
 0x9af   : > { %v1437_v60 = vsel %vm1436_vm12, %v4022_v53, %v1433_v58 }
 0x9b0   : > { %v1438_v61 = vmul.f32 %v1437_v60, %v1421_v39 }
 0x9b2   : > { %v1440_v63 = vmul.f32 %v3981_v59, %v1438_v61 }
 0x9b4   : > { %v4653_v0 = vadd.f32 %v3982_v62, %v1440_v63 }
 0x9b6   : > { %1443 = vst.msk [vmem:[%s4655_s22] sm:$0xff] %vm470_vm0, %v4653_v0  ;;  %3748 = vmatmul.msk.f32.vlgmr.msrb.gmra.mxu1 %vm470_vm0, %v4653_v0  ;;  %3755 = vmatmul.msk.f32.vlgmr.msra.gmra.mxu3 %vm470_vm0, %v4653_v0 }
 0xa33   : > { %v1469_v3 = vpop.f32.mrf.mxu1 }
 0xa34   : > { %v1470_v5 = vadd.f32 %v1469_v3, %v1448_v2 }
 0xa36   : > { %4023 = vtanh.f32 %v1470_v5 }
 0xa39   : > { %v1556_v7 = vpop.f32.mrf.mxu3 }
 0xa3a   : > { %v1557_v8 = vadd.f32 %v3983_v6, %v1556_v7 }
 0xa3c   : > { %v4671_v9 = vpop.eup %4023  ;;  %1564 = vrot.lane.b32.xlu0 %v1557_v8, %s5120_s6  ;;  %1560 = vrot.lane.b32.xlu2 %v1557_v8, %s5121_s14  ;;  %s5144_s6 = smov 112   ;;  %s3558_s14 = scalar_lea.sflag [#allocation10], %s4456_s27 }
 0xa3d   : > { %1562 = vrot.lane.b32.xlu1 %v1557_v8, %s5119_s15  ;;  %3750 = vmatmul.msk.f32.vlgmr.msra.gmra.mxu2 %vm470_vm0, %v4671_v9  ;;  %s5145_s15 = smov 96  }
 0xa96   : > { %v1561_v10 = vpop.permute.xlu2 %1560 }
 0xa97   : > { %1568 = vrot.lane.b32.xlu2 %v1561_v10, %s5117_s29 }
 0xaae   : > { %v1565_v11 = vpop.permute.xlu0 %1564 }
 0xaaf   : > { %v3938_v12 = vpack.i.bf16 %v1565_v11, %v1557_v8  ;;  %v1563_v13 = vpop.permute.xlu1 %1562 }
 0xab0   : > { %1570 = vrot.lane.b32.xlu1 %v1563_v13, %s5117_s29 }
 0xab1   : > { %3939 = vrot.lane.b32.xlu0 %v3938_v12, %s5117_s29 }
 0xac0   : > { %v4693_v35 = vpop.f32.mrf.mxu2 }
 0xaf1   : > { %v1569_v14 = vpop.permute.xlu2 %1568 }
 0xaf2   : > { %1610 = vxpose.xlu2.b32.start.end [1/1] (short) (narrow) %v1569_v14, 8 }
 0xb22   : > { %v1571_v15 = vpop.permute.xlu1 %1570 }
 0xb23   : > { %1642 = vxpose.xlu1.b32.start.end [1/1] (short) (narrow) %v1571_v15, 8  ;;  %v3940_v16 = vpop.permute.xlu0 %3939 }
 0xb24   : > { %3944 = vxpose.xlu0.b32.start.end [1/1] (short) (narrow) %v3940_v16, 8 }
 0xb8b   : > { %v1626_v17 = vpop.trf.xlu2 }
 0xb8c   : > { %1745 = vmatpush.msrb.mxu2 %v1626_v17 }
 0xb8d   : > { %3757 = vmatmul.msk.f32.vlgmr.msrb.gmra.mxu2 %vm644_vm1, %v1561_v10 }
 0xb92   : > { %1842 = vrot.lane.b32.xlu0 %v1563_v13, %s5138_s25 }
 0xbc7   : > { %v1658_v18 = vpop.trf.xlu1 }
 0xbc8   : > { %1767 = vmatpush.msrb.mxu3 %v1658_v18  ;;  %v3945_v19 = vpop.trf.xlu0 }
 0xbc9   : > { %3758 = vmatmul.msk.f32.vlgmr.msrb.gmra.mxu3 %vm644_vm1, %v1563_v13  ;;  %v3949_v21 = vunpack.i.h.bf16 %v3945_v19  ;;  %v3946_v23 = vunpack.i.l.bf16 %v3945_v19 }
 0xbcb   : > { %1723 = vmatpush.msra.mxu1 %v3946_v23  ;;  %1789 = vmatpush.msrb.mxu0 %v3949_v21 }
 0xbcc   : > { %3756 = vmatmul.msk.f32.vlgmr.msra.gmra.mxu1 %vm644_vm1, %v1557_v8  ;;  %3759 = vmatmul.msk.f32.vlgmr.msrb.gmra.mxu0 %vm644_vm1, %v1565_v11 }
 0xc04   : > { %v1843_v24 = vpop.permute.xlu0 %1842 }
 0xc05   : > { %1914 = vxpose.xlu2.b32.start.end [1/1] (short) (narrow) %v1843_v24, 8 }
 0xc10   : > { %v1747_v36 = vpop.f32.mrf.mxu2 }
 0xc11   : > { %v1748_v37 = vadd.f32 %v4502_v20, %v1747_v36 }
 0xc13   : > { %v1797_v38 = vsel %vm644_vm1, %v1748_v37, -inf }
 0xc49   : > { %v1725_v27 = vpop.f32.mrf.mxu1  ;;  %v1791_v31 = vpop.f32.mrf.mxu0 }
 0xc4a   : > { %v1726_v28 = vadd.f32 %v4502_v20, %v1725_v27  ;;  %v1792_v33 = vadd.f32 %v4502_v20, %v1791_v31 }
 0xc4c   : > { %v1769_v25 = vpop.f32.mrf.mxu3  ;;  %v1794_v30 = vsel %vm644_vm1, %v1726_v28, -inf  ;;  %v1803_v34 = vsel %vm644_vm1, %v1792_v33, -inf }
 0xc4d   : > { %v1770_v26 = vadd.f32 %v4502_v20, %v1769_v25  ;;  %1795 = vmax.xlane.f32.xlu1 %v1794_v30 }
 0xc4f   : > { %v1800_v29 = vsel %vm644_vm1, %v1770_v26, -inf }
 0xc50   : > { %1801 = vmax.xlane.f32.xlu0 %v1800_v29 }
 0xc55   : > { %1804 = vmax.xlane.f32.xlu1 %v1803_v34 }
 0xc64   : > { %1844 = vrot.lane.b32.xlu0 %v1565_v11, %s5138_s25 }
 0xc6e   : > { %1840 = vrot.lane.b32.xlu1 %v1561_v10, %s5138_s25 }
 0xc76   : > { %1798 = vmax.xlane.f32.xlu2 %v1797_v38 }
 0xc8e   : > { %1838 = vrot.lane.b32.xlu2 %v1557_v8, %s5138_s25 }
 0xc9e   : > { %v1930_v53 = vpop.trf.xlu2 }
 0xcc0   : > { %v1796_v41 = vpop.xlane.xlu1 %1795 }
 0xcc1   : > { %v1806_v42 = vsub.f32 %v1726_v28, %v1796_v41 }
 0xcc3   : > { %v1802_v39 = vpop.xlane.xlu0 %1801  ;;  %v1810_v44 = vmul.f32 1.442695, %v1806_v42 }
 0xcc4   : > { %v1808_v40 = vsub.f32 %v1770_v26, %v1802_v39 }
 0xcc6   : > { %v1814_v43 = vmul.f32 1.442695, %v1808_v40 }
 0xcc8   : > { %4025 = vpow2.f32 %v1814_v43  ;;  %v1805_v45 = vpop.xlane.xlu1 %1804 }
 0xcc9   : > { %4027 = vpow2.f32 %v1810_v44  ;;  %v1809_v46 = vsub.f32 %v1792_v33, %v1805_v45 }
 0xccb   : > { %v1816_v50 = vmul.f32 1.442695, %v1809_v46 }
 0xccd   : > { %4029 = vpow2.f32 %v1816_v50 }
 0xcce   : > { %v4026_v47 = vpop.eup %4025 }
 0xccf   : > { %v4028_v49 = vpop.eup %4027  ;;  %v1824_v20 = vsel %vm644_vm1, %v4026_v47, 0.0 }
 0xcd0   : > { %1825 = vadd.xlane.f32.xlu2 %v1824_v20  ;;  %v1818_v51 = vsel %vm644_vm1, %v4028_v49, 0.0 }
 0xcd1   : > { %1819 = vadd.xlane.f32.xlu0 %v1818_v51 }
 0xcd3   : > { %v4030_v52 = vpop.eup %4029 }
 0xcd4   : > { %v1827_v4 = vsel %vm644_vm1, %v4030_v52, 0.0 }
 0xcd5   : > { %1828 = vadd.xlane.f32.xlu1 %v1827_v4 }
 0xcd6   : > { %v1845_v61 = vpop.permute.xlu0 %1844 }
 0xce0   : > { %v1841_v58 = vpop.permute.xlu1 %1840 }
 0xce9   : > { %v1799_v54 = vpop.xlane.xlu2 %1798 }
 0xcea   : > { %v1807_v55 = vsub.f32 %v1748_v37, %v1799_v54 }
 0xcec   : > { %v1812_v56 = vmul.f32 1.442695, %v1807_v55 }
 0xcee   : > { %4031 = vpow2.f32 %v1812_v56 }
 0xcf1   : > { %v1839_v60 = vpop.permute.xlu2 %1838 }
 0xcf4   : > { %v4032_v57 = vpop.eup %4031 }
 0xcf5   : > { %v1821_v59 = vsel %vm644_vm1, %v4032_v57, 0.0 }
 0xcf6   : > { %1822 = vadd.xlane.f32.xlu2 %v1821_v59 }
 0xcfa   : > { %1882 = vxpose.xlu0.b32.start.end [1/1] (short) (narrow) %v1841_v58, 8 }
 0xd0f   : > { %1850 = vxpose.xlu1.b32.start.end [1/1] (short) (narrow) %v1839_v60, 8 }
 0xd1f   : > { %1946 = vxpose.xlu2.b32.start.end [1/1] (short) (narrow) %v1845_v61, 8 }
 0xd43   : > { %v1826_v62 = vpop.xlane.xlu2 %1825 }
 0xd44   : > { %4033 = vrcp.f32 %v1826_v62  ;;  %v1820_v63 = vpop.xlane.xlu0 %1819 }
 0xd45   : > { %4035 = vrcp.f32 %v1820_v63 }
 0xd48   : > { %v1829_v6 = vpop.xlane.xlu1 %1828 }
 0xd49   : > { %4037 = vrcp.f32 %v1829_v6 }
 0xd4a   : > { %v4034_v1 = vpop.eup %4033 }
 0xd4b   : > { %v4036_v2 = vpop.eup %4035  ;;  %v1836_v3 = vmul.f32 %v4034_v1, %v4026_v47 }
 0xd4c   : > { %v1834_v5 = vmul.f32 %v4036_v2, %v4028_v49 }
 0xd4d   : > { %3764 = vmatpush.xpose.msk.msra.mxu3 %vm644_vm1, %v1836_v3 }
 0xd4e   : > { %3760 = vmatpush.xpose.msk.msrb.mxu1 %vm644_vm1, %v1834_v5 }
 0xd4f   : > { %v4038_v7 = vpop.eup %4037 }
 0xd50   : > { %3765 = vmatmul.msk.f32.vlgmr.msra.gmra.mxu3 %vm644_vm1, %v1930_v53  ;;  %v1837_v8 = vmul.f32 %v4038_v7, %v4030_v52 }
 0xd52   : > { %3766 = vmatpush.xpose.msk.msra.mxu0 %vm644_vm1, %v1837_v8 }
 0xd69   : > { %v1823_v10 = vpop.xlane.xlu2 %1822 }
 0xd6a   : > { %4039 = vrcp.f32 %v1823_v10 }
 0xd70   : > { %v4040_v11 = vpop.eup %4039 }
 0xd71   : > { %v1835_v12 = vmul.f32 %v4040_v11, %v4032_v57 }
 0xd73   : > { %3762 = vmatpush.xpose.msk.msra.mxu2 %vm644_vm1, %v1835_v12 }
 0xd9e   : > { %v1898_v13 = vpop.trf.xlu0 }
 0xd9f   : > { %3763 = vmatmul.msk.f32.vlgmr.msra.gmra.mxu2 %vm644_vm1, %v1898_v13 }
 0xdb3   : > { %v1866_v14 = vpop.trf.xlu1 }
 0xdb4   : > { %3761 = vmatmul.msk.f32.vlgmr.msrb.gmra.mxu1 %vm644_vm1, %v1866_v14 }
 0xdb8   : > { %v1962_v15 = vpop.trf.xlu2 }
 0xdb9   : > { %3767 = vmatmul.msk.f32.vlgmr.msra.gmra.mxu0 %vm644_vm1, %v1962_v15 }
 0xdd3   : > { %v2053_v19 = vpop.f32.mrf.mxu3 }
 0xe22   : > { %v2027_v16 = vpop.f32.mrf.mxu2 }
 0xe23   : > { %2114 = vxpose.xlu0.b32.start.end [1/1] (short) (narrow) %v2027_v16, 8 }
 0xe31   : > { %v2001_v17 = vpop.f32.mrf.mxu1 }
 0xe32   : > { %2082 = vxpose.xlu2.b32.start.end [1/1] (short) (narrow) %v2001_v17, 8 }
 0xe36   : > { %v2079_v18 = vpop.f32.mrf.mxu0 }
 0xe3a   : > { %2178 = vxpose.xlu2.b32.start.end [1/1] (short) (narrow) %v2079_v18, 8 }
 0xe42   : > { %2146 = vxpose.xlu2.b32.start.end [1/1] (short) (narrow) %v2053_v19, 8 }
 0xec7   : > { %v2130_v23 = vpop.trf.xlu0 }
 0xec8   : > { %v2224_v24 = vrot.slane %v2130_v23, 4 }
 0xecb   : > { %v2098_v21 = vpop.trf.xlu2 }
 0xecc   : > { %v2212_v30 = vrot.slane %v2098_v21, 4 }
 0xed3   : > { %v2194_v25 = vpop.trf.xlu2 }
 0xed4   : > { %v2222_v26 = vrot.slane %v2194_v25, 4  ;;  %v2225_v27 = vsel %vm1150_vm2, %v2194_v25, %v2224_v24 }
 0xed5   : > { %v2233_v29 = vperm.slane %v2225_v27, %v4528_v22 }
 0xed6   : > { %v2223_v28 = vsel %vm1150_vm2, %v2222_v26, %v2130_v23 }
 0xed7   : > { %v2229_v31 = vperm.slane %v2223_v28, %v4528_v22  ;;  %v2246_v37 = vrot.slane %v2233_v29, 4 }
 0xed9   : > { %v2234_v40 = vrot.slane %v2229_v31, 4 }
 0xedb   : > { %v2162_v33 = vpop.trf.xlu2 }
 0xedc   : > { %v2210_v34 = vrot.slane %v2162_v33, 4  ;;  %v2213_v36 = vsel %vm1150_vm2, %v2162_v33, %v2212_v30  ;;  %v3771_v30 = vld [vmem:[%s5096_s3 + $0x38] sm:$0xff]  ;;  %v3769_v33 = vld [vmem:[%s5096_s3 + $0x28] sm:$0xff] }
 0xedd   : > { %v2221_v38 = vperm.slane %v2213_v36, %v4528_v22  ;;  %2357 = vmatpush.msra.mxu1 %v3771_v30  ;;  %v3988_v30 = vld [vmem:[#allocation5 + $0xd] ss:$0 sm:$0xff] }
 0xede   : > { %v2211_v39 = vsel %vm1150_vm2, %v2210_v34, %v2098_v21  ;;  %v3768_v34 = vld [vmem:[%s5096_s3 + $0x20] sm:$0xff] }
 0xedf   : > { %v2217_v41 = vperm.slane %v2211_v39, %v4528_v22  ;;  %v2247_v42 = vsel %vm1150_vm2, %v2246_v37, %v2221_v38  ;;  %v2248_v43 = vrot.slane %v2221_v38, 4 }
 0xee0   : > { %v2253_v44 = vperm.slane %v2247_v42, %v4534_v32  ;;  %v3984_v42 = vld [vmem:[#allocation5 + $0xa] ss:$0 sm:$0xff] }
 0xee1   : > { %v2235_v45 = vsel %vm1150_vm2, %v2234_v40, %v2217_v41  ;;  %v2236_v46 = vrot.slane %v2217_v41, 4  ;;  %v2249_v47 = vsel %vm1150_vm2, %v2233_v29, %v2248_v43 }
 0xee2   : > { %v2241_v49 = vperm.slane %v2235_v45, %v4534_v32  ;;  %v2257_v50 = vperm.slane %v2249_v47, %v4534_v32  ;;  %v2262_v52 = vrot.slane %v2253_v44, 4 }
 0xee3   : > { %v2237_v20 = vsel %vm1150_vm2, %v2229_v31, %v2236_v46  ;;  %v3770_v31 = vld [vmem:[%s5096_s3 + $0x30] sm:$0xff] }
 0xee4   : > { %v2245_v51 = vperm.slane %v2237_v20, %v4534_v32  ;;  %v2264_v4 = vrot.slane %v2257_v50, 4  ;;  %v2258_v53 = vrot.slane %v2241_v49, 4  ;;  %v2263_v60 = vsel %vm1150_vm2, 0.0, %v2262_v52  ;;  %2358 = vmatpush.msra.mxu1 %v3770_v31  ;;  %v3776_v52 = vld [vmem:[%s5097_s4 + $0x38] sm:$0xff] }
 0xee5   : > { %2416 = vmatpush.msrb.mxu2 %v3776_v52 }
 0xee6   : > { %v2260_v54 = vrot.slane %v2245_v51, 4  ;;  %v2265_v55 = vsel %vm1150_vm2, 0.0, %v2264_v4  ;;  %v2277_v56 = vsel %vm1150_vm2, %v2264_v4, %v2253_v44  ;;  %v2259_v3 = vsel %vm1150_vm2, 0.0, %v2258_v53  ;;  %2359 = vmatpush.msra.mxu1 %v3769_v33  ;;  %v3774_v4 = vld [vmem:[%s5097_s4 + $0x28] sm:$0xff]  ;;  %v3773_v53 = vld [vmem:[%s5097_s4 + $0x20] sm:$0xff] }
 0xee7   : > { %v2281_v57 = vperm.slane %v2277_v56, %v4528_v22  ;;  %v2282_v58 = vrot.slane %v2265_v55, 4 }
 0xee8   : > { %v2261_v59 = vsel %vm1150_vm2, 0.0, %v2260_v54  ;;  %v2266_v61 = vsel %vm1150_vm2, %v2260_v54, %v2241_v49  ;;  %2360 = vmatpush.msra.mxu1 %v3768_v34 }
 0xee9   : > { %v2283_v62 = vsel %vm1150_vm2, %v2282_v58, %v2263_v60  ;;  %v2270_v63 = vperm.slane %v2266_v61, %v4528_v22  ;;  %v2271_v1 = vrot.slane %v2261_v59, 4  ;;  %v2302_v2 = vrot.slane %v2281_v57, 4 }
 0xeea   : > { %v2287_v5 = vperm.slane %v2283_v62, %v4528_v22 }
 0xeeb   : > { %v2272_v6 = vsel %vm1150_vm2, %v2271_v1, %v2259_v3  ;;  %v2290_v7 = vrot.slane %v2270_v63, 4  ;;  %v3986_v3 = vld [vmem:[#allocation5 + $0xc] ss:$0 sm:$0xff] }
 0xeec   : > { %v2276_v8 = vperm.slane %v2272_v6, %v4528_v22  ;;  %v2303_v10 = vsel %vm1150_vm2, %v2287_v5, %v2302_v2  ;;  %v2300_v11 = vrot.slane %v2287_v5, 4 }
 0xeed   : > { %v2311_v12 = vperm.slane %v2303_v10, %v4534_v32  ;;  %v3783_v10 = vld [vmem:[%s5098_s5 + $0x68] sm:$0xff] }
 0xeee   : > { %v2291_v13 = vsel %vm1150_vm2, %v2276_v8, %v2290_v7  ;;  %v2288_v14 = vrot.slane %v2276_v8, 4  ;;  %v2301_v15 = vsel %vm1150_vm2, %v2300_v11, %v2281_v57  ;;  %v3785_v7 = vld [vmem:[%s5098_s5 + $0x78] sm:$0xff]  ;;  %v3784_v8 = vld [vmem:[%s5098_s5 + $0x70] sm:$0xff]  ;;  %v3782_v11 = vld [vmem:[%s5098_s5 + $0x60] sm:$0xff] }
 0xeef   : > { %v2299_v16 = vperm.slane %v2291_v13, %v4534_v32  ;;  %v2316_v17 = vrot.slane %v2311_v12, 4  ;;  %v2307_v18 = vperm.slane %v2301_v15, %v4534_v32  ;;  %2455 = vmatpush.msrb.mxu3 %v3785_v7  ;;  %v3780_v13 = vld [vmem:[%s5098_s5 + $0x50] sm:$0xff]  ;;  %v3778_v15 = vld [vmem:[%s5098_s5 + $0x40] sm:$0xff] }
 0xef0   : > { %v2289_v19 = vsel %vm1150_vm2, %v2288_v14, %v2270_v63  ;;  %v3985_v63 = vld [vmem:[#allocation5 + $0xb] ss:$0 sm:$0xff]  ;;  %v3779_v14 = vld [vmem:[%s5098_s5 + $0x48] sm:$0xff] }
 0xef1   : > { %v2317_v21 = vsel %vm1150_vm2, %v2316_v17, %v2299_v16  ;;  %v2318_v23 = vrot.slane %v2299_v16, 4  ;;  %v2295_v24 = vperm.slane %v2289_v19, %v4534_v32  ;;  %v2312_v25 = vrot.slane %v2307_v18, 4  ;;  %2456 = vmatpush.msrb.mxu3 %v3784_v8  ;;  %v3987_v16 = vld [vmem:[#allocation5 + $0x9] ss:$0 sm:$0xff] }
 0xef2   : > { %2325 = vrot.lane.b32.xlu0 %v2317_v21, %s5139_s21 }
 0xef3   : > { %v2319_v26 = vsel %vm1150_vm2, %v2311_v12, %v2318_v23  ;;  %v2314_v27 = vrot.slane %v2295_v24, 4  ;;  %v2313_v28 = vsel %vm1150_vm2, %v2312_v25, %v2295_v24  ;;  %2457 = vmatpush.msrb.mxu3 %v3783_v10  ;;  %v3781_v12 = vld [vmem:[%s5098_s5 + $0x58] sm:$0xff] }
 0xef4   : > { %2329 = vrot.lane.b32.xlu1 %v2319_v26, %s5140_s12 }
 0xef5   : > { %v2315_v29 = vsel %vm1150_vm2, %v2307_v18, %v2314_v27  ;;  %2458 = vmatpush.msrb.mxu3 %v3782_v11 }
 0xef6   : > { %2321 = vrot.lane.b32.xlu2 %v2315_v29, %s5141_s23 }
 0xef7   : > { %2459 = vmatpush.msrb.mxu3 %v3781_v12 }
 0xef9   : > { %2460 = vmatpush.msrb.mxu3 %v3780_v13 }
 0xefb   : > { %2461 = vmatpush.msrb.mxu3 %v3779_v14 }
 0xefd   : > { %2462 = vmatpush.msrb.mxu3 %v3778_v15 }
 0xf50   : > { %v2322_v36 = vpop.permute.xlu2 %2321 }
 0xf51   : > { %v2332_v37 = vsel %vm644_vm1, %v2313_v28, %v2322_v36 }
 0xf64   : > { %v2326_v38 = vpop.permute.xlu0 %2325 }
 0xf65   : > { %v2333_v39 = vsel %vm1273_vm3, %v2332_v37, %v2326_v38 }
 0xf66   : > { %v2330_v40 = vpop.permute.xlu1 %2329 }
 0xf67   : > { %v2334_v41 = vsel %vm1275_vm4, %v2333_v39, %v2330_v40 }
 0xf68   : > { %3772 = vmatmul.msk.f32.vlgmr.msra.gmra.mxu1 %vm470_vm0, %v2334_v41 }
 0xfe5   : > { %v2362_v43 = vpop.f32.mrf.mxu1 }
 0xfe6   : > { %v2363_v44 = vadd.f32 %v3984_v42, %v2362_v43  ;;  %v2502_v42 = vld [vmem:[#allocation7 + $0x38] sm:$0xff]  ;;  %v3797_v43 = vld [vmem:[%s5095_s2 + $0x58] sm:$0xff] }
 0xfe7   : > { %2520 = vmatpush.msrb.mxu0 %v2502_v42 }
 0xfe8   : > { %v2365_v45 = vadd.f32 %v2363_v44, %v4653_v0  ;;  %v3775_v0 = vld [vmem:[%s5097_s4 + $0x30] sm:$0xff]  ;;  %v2501_v44 = vld [vmem:[#allocation7 + $0x30] sm:$0xff] }
 0xfe9   : > { %2417 = vmatpush.msrb.mxu2 %v3775_v0  ;;  %2521 = vmatpush.msrb.mxu0 %v2501_v44 }
 0xfea   : > { %v2368_v46 = vsel %vm470_vm0, %v2365_v45, 0.0 }
 0xfeb   : > { %2369 = vadd.xlane.f32.xlu2 %v2368_v46  ;;  %2418 = vmatpush.msrb.mxu2 %v3774_v4  ;;  %v2500_v46 = vld [vmem:[#allocation7 + $0x28] sm:$0xff] }
 0xfec   : > { %2522 = vmatpush.msrb.mxu0 %v2500_v46 }
 0xfed   : > { %2419 = vmatpush.msrb.mxu2 %v3773_v53 }
 0xfef   : > { %2605 = vmatpush.msra.mxu2 %v3797_v43 }
0x105e   : > { %v2370_v47 = vpop.xlane.xlu2 %2369 }
0x105f   : > { %v2371_v49 = vmul.f32 %v2370_v47, %v4593_v48  ;;  %v3795_v47 = vld [vmem:[%s5095_s2 + $0x48] sm:$0xff] }
0x1061   : > { %v2372_v50 = vsub.f32 %v2365_v45, %v2371_v49  ;;  %v3796_v45 = vld [vmem:[%s5095_s2 + $0x50] sm:$0xff]  ;;  %v2499_v49 = vld [vmem:[#allocation7 + $0x20] sm:$0xff] }
0x1062   : > { %2606 = vmatpush.msra.mxu2 %v3796_v45  ;;  %2523 = vmatpush.msrb.mxu0 %v2499_v49 }
0x1063   : > { %v2373_v20 = vmul.f32 %v2372_v50, %v2372_v50 }
0x1064   : > { %2607 = vmatpush.msra.mxu2 %v3795_v47 }
0x1065   : > { %v2374_v51 = vsel %vm470_vm0, %v2373_v20, 0.0 }
0x1066   : > { %2375 = vadd.xlane.f32.xlu1 %v2374_v51 }
0x10d9   : > { %v2376_v54 = vpop.xlane.xlu1 %2375 }
0x10da   : > { %v2377_v55 = vmul.f32 %v2376_v54, %v4593_v48 }
0x10dc   : > { %v2378_v56 = vadd.f32 1e-12, %v2377_v55 }
0x10de   : > { %4041 = vrsqrt.f32 %v2378_v56  ;;  %vm2385_vm14 = vweird.f32 %v2378_v56 }
0x10e4   : > { %v4042_v57 = vpop.eup %4041 }
0x10e5   : > { %v2380_v58 = vmul.f32 %v4042_v57, %v2378_v56  ;;  %vm2386_vm13 = vweird.f32 %v4042_v57 }
0x10e6   : > { %vm2387_vm15 = vmor %vm2385_vm14, %vm2386_vm13 }
0x10e7   : > { %v2381_v59 = vmul.f32 %v4042_v57, %v2380_v58 }
0x10e9   : > { %v2382_v60 = vmul.f32 0.5, %v2381_v59 }
0x10eb   : > { %v2383_v61 = vsub.f32 1.5, %v2382_v60  ;;  %v3990_v60 = vld [vmem:[#allocation5 + $0xf] ss:$0 sm:$0xff] }
0x10ed   : > { %v2384_v62 = vmul.f32 %v4042_v57, %v2383_v61 }
0x10ef   : > { %v2388_v1 = vsel %vm2387_vm15, %v4042_v57, %v2384_v62  ;;  %v3989_v57 = vld [vmem:[#allocation5 + $0xe] ss:$0 sm:$0xff] }
0x10f0   : > { %v2389_v2 = vmul.f32 %v2388_v1, %v2372_v50  ;;  %v3794_v50 = vld [vmem:[%s5095_s2 + $0x40] sm:$0xff] }
0x10f1   : > { %2608 = vmatpush.msra.mxu2 %v3794_v50  ;;  %v3788_v1 = vld [vmem:[%s5102_s9 + $0x2] sm:$0x1] }
0x10f2   : > { %v2391_v5 = vmul.f32 %v3985_v63, %v2389_v2  ;;  %v3790_v63 = vld [vmem:[%s5101_s8 + $0x4] sm:$0x7] }
0x10f3   : > { %3792 = vmatpush.xpose.msk.msrb.mxu1 %vm470_vm0, %v3790_v63 }
0x10f4   : > { %v2393_v6 = vadd.f32 %v3986_v3, %v2391_v5  ;;  %v3991_v5 = vld [vmem:[#allocation5 + $0x10] ss:$0 sm:$0xff] }
0x10f6   : > { %3777 = vmatmul.msk.f32.vlgmr.msrb.gmra.mxu2 %vm470_vm0, %v2393_v6 }
0x1179   : > { %v2421_v17 = vpop.f32.mrf.mxu2 }
0x117a   : > { %v2422_v18 = vadd.f32 %v3987_v16, %v2421_v17 }
0x117c   : > { %v2425_v19 = vmul.f32 0.044715, %v2422_v18  ;;  %v2424_v27 = vmul.f32 0.5, %v2422_v18 }
0x117e   : > { %v2426_v21 = vmul.f32 %v2425_v19, %v2422_v18 }
0x1180   : > { %v2427_v23 = vmul.f32 %v2426_v21, %v2422_v18 }
0x1182   : > { %v2428_v24 = vadd.f32 %v2427_v23, %v2422_v18 }
0x1184   : > { %v2429_v25 = vmul.f32 0.7978846, %v2428_v24 }
0x1186   : > { %4043 = vtanh.f32 %v2429_v25 }
0x118c   : > { %v4044_v26 = vpop.eup %4043 }
0x118d   : > { %v2431_v28 = vadd.f32 1.0, %v4044_v26 }
0x118f   : > { %v2432_v29 = vmul.f32 %v2431_v28, %v2424_v27  ;;  %v4083_v27 = vld [vmem:[%s4495_s7] ss:$0 sm:$0xff]  ;;  %s3833_s7 = sshll.u32 %s4380_s24, 1 }
0x1190   : > { %s3584_s16 = scalar_lea.hbm %s5104_s11, %s3833_s7 }
0x1191   : > { %3786 = vmatmul.msk.f32.vlgmr.msrb.gmra.mxu3 %vm1390_vm9, %v2432_v29  ;;  %s3588_s0 = sshll.u32 %s3584_s16, 4  ;;  %s3589_s0 = int_to_ptr.hbm [resolvable:$true] %s3588_s0 }
0x1214   : > { %v2464_v31 = vpop.f32.mrf.mxu3 }
0x1215   : > { %v2465_v33 = vadd.f32 %v3988_v30, %v2464_v31 }
0x1217   : > { %v2467_v34 = vadd.f32 %v2465_v33, %v2393_v6 }
0x1219   : > { %v2470_v36 = vsel %vm470_vm0, %v2467_v34, 0.0 }
0x121a   : > { %2471 = vadd.xlane.f32.xlu0 %v2470_v36 }
0x128d   : > { %v2472_v37 = vpop.xlane.xlu0 %2471 }
0x128e   : > { %v2473_v38 = vmul.f32 %v2472_v37, %v4593_v48 }
0x1290   : > { %v2474_v39 = vsub.f32 %v2467_v34, %v2473_v38 }
0x1292   : > { %v2475_v40 = vmul.f32 %v2474_v39, %v2474_v39 }
0x1294   : > { %v2476_v41 = vsel %vm470_vm0, %v2475_v40, 0.0 }
0x1295   : > { %2477 = vadd.xlane.f32.xlu2 %v2476_v41 }
0x1308   : > { %v2478_v20 = vpop.xlane.xlu2 %2477 }
0x1309   : > { %v2479_v51 = vmul.f32 %v2478_v20, %v4593_v48 }
0x130b   : > { %v2480_v52 = vadd.f32 1e-12, %v2479_v51 }
0x130d   : > { %4045 = vrsqrt.f32 %v2480_v52  ;;  %vm2487_vm6 = vweird.f32 %v2480_v52 }
0x1313   : > { %v4046_v0 = vpop.eup %4045 }
0x1314   : > { %v2482_v4 = vmul.f32 %v4046_v0, %v2480_v52  ;;  %vm2488_vm5 = vweird.f32 %v4046_v0 }
0x1315   : > { %vm2489_vm7 = vmor %vm2487_vm6, %vm2488_vm5 }
0x1316   : > { %v2483_v53 = vmul.f32 %v4046_v0, %v2482_v4 }
0x1318   : > { %v2484_v54 = vmul.f32 0.5, %v2483_v53 }
0x131a   : > { %v2485_v55 = vsub.f32 1.5, %v2484_v54 }
0x131c   : > { %v2486_v56 = vmul.f32 %v4046_v0, %v2485_v55 }
0x131e   : > { %v2490_v58 = vsel %vm2489_vm7, %v4046_v0, %v2486_v56 }
0x131f   : > { %v2491_v59 = vmul.f32 %v2490_v58, %v2474_v39 }
0x1321   : > { %v2493_v61 = vmul.f32 %v3989_v57, %v2491_v59 }
0x1323   : > { %v4829_v62 = vadd.f32 %v3990_v60, %v2493_v61 }
0x1325   : > { %3787 = vst.msk [vmem:[%s4655_s22 + $0x8] sm:$0xff] %vm470_vm0, %v4829_v62  ;;  %3789 = vmatmul.msk.f32.vlgmr.msrb.gmra.mxu0 %vm470_vm0, %v4829_v62  ;;  %3798 = vmatmul.msk.f32.vlgmr.msra.gmra.mxu2 %vm470_vm0, %v4829_v62 }
0x13a2   : > { %v2525_v2 = vpop.f32.mrf.mxu0 }
0x13a3   : > { %v2526_v3 = vadd.f32 %v3788_v1, %v2525_v2 }
0x13a5   : > { %4047 = vtanh.f32 %v2526_v3 }
0x13a8   : > { %v2610_v6 = vpop.f32.mrf.mxu2 }
0x13a9   : > { %v2611_v7 = vadd.f32 %v3991_v5, %v2610_v6 }
0x13ab   : > { %v4845_v8 = vpop.eup %4047  ;;  %2614 = vrot.lane.b32.xlu0 %v2611_v7, %s5142_s26  ;;  %2618 = vrot.lane.b32.xlu2 %v2611_v7, %s5143_s13  ;;  %s5015_s13 = scalar_lea.vmem [#allocation9], %s3731_s19  ;;  %s3569_s19 = sshll.u32 %s4655_s22, 4  ;;  %s5038_s19 = int_to_ptr.vmem [resolvable:$true] %s3569_s19 }
0x13ac   : > { %2616 = vrot.lane.b32.xlu1 %v2611_v7, %s5144_s6  ;;  %3793 = vmatmul.msk.f32.vlgmr.msrb.gmra.mxu1 %vm470_vm0, %v4845_v8  ;;  %s4293_s6 = smov 32   ;;  %s3586_s28 = sshll.u32 %s5015_s13, 4  ;;  %s3587_s28 = int_to_ptr.vmem [resolvable:$true] %s3586_s28 }
0x13ad   : > { %s4188_s26 = sshra.s32 %s3589_s0, 4  ;;  %s4189_s26 = int_to_ptr.hbm [resolvable:$true] %s4188_s26 }
0x13ae   : > { %p4195_p7 = scmp.lt.s32.totalorder %s4189_s26, %s5104_s11 }
0x1405   : > { %v2619_v11 = vpop.permute.xlu2 %2618 }
0x141d   : > { %v2615_v10 = vpop.permute.xlu0 %2614 }
0x141e   : > { %v3955_v12 = vpack.i.bf16 %v2615_v10, %v2611_v7  ;;  %v2617_v13 = vpop.permute.xlu1 %2616 }
0x141f   : > { %v3950_v14 = vpack.i.bf16 %v2619_v11, %v2617_v13 }
0x1420   : > { %3956 = vrot.lane.b32.xlu2 %v3955_v12, %s5145_s15 }
0x1421   : > { %3951 = vrot.lane.b32.xlu1 %v3950_v14, %s5145_s15  ;;  %s3832_s15 = sshll.u32 %s4380_s24, 3 }
0x1429   : > { %v4858_v25 = vpop.f32.mrf.mxu1 }
0x147a   : > { %v3957_v15 = vpop.permute.xlu2 %3956 }
0x147b   : > { %3968 = vxpose.xlu1.b32.start.end [1/1] (short) (narrow) %v3957_v15, 8 }
0x1493   : > { %v3952_v16 = vpop.permute.xlu1 %3951 }
0x1494   : > { %3961 = vxpose.xlu0.b32.start.end [1/1] (short) (narrow) %v3952_v16, 8 }
0x151f   : > { %v3969_v17 = vpop.trf.xlu1 }
0x1520   : > { %v3973_v18 = vunpack.i.h.bf16 %v3969_v17  ;;  %v3970_v19 = vunpack.i.l.bf16 %v3969_v17 }
0x1522   : > { %2777 = vmatpush.msra.mxu0 %v3970_v19  ;;  %2799 = vmatpush.msra.mxu1 %v3973_v18 }
0x1523   : > { %3799 = vmatmul.msk.f32.vlgmr.msra.gmra.mxu0 %vm644_vm1, %v2611_v7  ;;  %3800 = vmatmul.msk.f32.vlgmr.msra.gmra.mxu1 %vm644_vm1, %v2615_v10 }
0x1538   : > { %v3962_v21 = vpop.trf.xlu0 }
0x1539   : > { %v3966_v23 = vunpack.i.h.bf16 %v3962_v21  ;;  %v3963_v24 = vunpack.i.l.bf16 %v3962_v21 }
0x153b   : > { %2821 = vmatpush.msrb.mxu2 %v3963_v24  ;;  %2843 = vmatpush.msra.mxu3 %v3966_v23 }
0x153c   : > { %3801 = vmatmul.msk.f32.vlgmr.msrb.gmra.mxu2 %vm644_vm1, %v2617_v13  ;;  %3802 = vmatmul.msk.f32.vlgmr.msra.gmra.mxu3 %vm644_vm1, %v2619_v11 }
0x15a0   : > { %v2801_v26 = vpop.f32.mrf.mxu1  ;;  %v2779_v38 = vpop.f32.mrf.mxu0 }
0x15a1   : > { %v2802_v28 = vadd.f32 %v4083_v27, %v2801_v26  ;;  %v2780_v39 = vadd.f32 %v4083_v27, %v2779_v38 }
0x15a3   : > { %v2851_v29 = vsel %vm644_vm1, %v2802_v28, -inf  ;;  %v2848_v40 = vsel %vm644_vm1, %v2780_v39, -inf }
0x15a4   : > { %2852 = vmax.xlane.f32.xlu1 %v2851_v29 }
0x15bf   : > { %v2823_v30 = vpop.f32.mrf.mxu2  ;;  %v2845_v31 = vpop.f32.mrf.mxu3 }
0x15c0   : > { %v2824_v33 = vadd.f32 %v4083_v27, %v2823_v30  ;;  %v2846_v34 = vadd.f32 %v4083_v27, %v2845_v31 }
0x15c2   : > { %v2857_v36 = vsel %vm644_vm1, %v2846_v34, -inf  ;;  %v2854_v37 = vsel %vm644_vm1, %v2824_v33, -inf }
0x15c3   : > { %2858 = vmax.xlane.f32.xlu0 %v2857_v36  ;;  %2855 = vmax.xlane.f32.xlu2 %v2854_v37 }
0x15cb   : > { %2849 = vmax.xlane.f32.xlu2 %v2848_v40 }
0x15d7   : > { %2894 = vrot.lane.b32.xlu0 %v2615_v10, %s5138_s25 }
0x15e3   : > { %2896 = vrot.lane.b32.xlu2 %v2617_v13, %s5138_s25 }
0x15eb   : > { %2898 = vrot.lane.b32.xlu2 %v2619_v11, %s5138_s25 }
0x15f3   : > { %2892 = vrot.lane.b32.xlu2 %v2611_v7, %s5138_s25  ;;  %s4194_s25 = scalar_lea.hbm %s5104_s11, 4 }
0x1617   : > { %v2853_v46 = vpop.xlane.xlu1 %2852 }
0x1618   : > { %v2861_v20 = vsub.f32 %v2802_v28, %v2853_v46 }
0x161a   : > { %v2866_v4 = vmul.f32 1.442695, %v2861_v20 }
0x1636   : > { %v2856_v41 = vpop.xlane.xlu2 %2855  ;;  %v2859_v42 = vpop.xlane.xlu0 %2858 }
0x1637   : > { %v2862_v43 = vsub.f32 %v2824_v33, %v2856_v41  ;;  %v2863_v45 = vsub.f32 %v2846_v34, %v2859_v42 }
0x1639   : > { %v2868_v44 = vmul.f32 1.442695, %v2862_v43  ;;  %v2870_v47 = vmul.f32 1.442695, %v2863_v45 }
0x163b   : > { %4049 = vpow2.f32 %v2868_v44 }
0x163c   : > { %4051 = vpow2.f32 %v2870_v47 }
0x163e   : > { %v2850_v49 = vpop.xlane.xlu2 %2849 }
0x163f   : > { %v2860_v50 = vsub.f32 %v2780_v39, %v2850_v49 }
0x1641   : > { %v2864_v51 = vmul.f32 1.442695, %v2860_v50  ;;  %v4050_v52 = vpop.eup %4049 }
0x1642   : > { %v2878_v0 = vsel %vm644_vm1, %v4050_v52, 0.0  ;;  %v4052_v54 = vpop.eup %4051 }
0x1643   : > { %4053 = vpow2.f32 %v2864_v51  ;;  %2879 = vadd.xlane.f32.xlu2 %v2878_v0  ;;  %v2881_v57 = vsel %vm644_vm1, %v4052_v54, 0.0 }
0x1644   : > { %4055 = vpow2.f32 %v2866_v4 }
0x1646   : > { %v2897_v53 = vpop.permute.xlu2 %2896 }
0x1649   : > { %v4054_v55 = vpop.eup %4053  ;;  %v2895_v61 = vpop.permute.xlu0 %2894 }
0x164a   : > { %v2872_v56 = vsel %vm644_vm1, %v4054_v55, 0.0  ;;  %v4056_v59 = vpop.eup %4055 }
0x164b   : > { %2873 = vadd.xlane.f32.xlu1 %v2872_v56  ;;  %2882 = vadd.xlane.f32.xlu2 %v2881_v57  ;;  %v2875_v60 = vsel %vm644_vm1, %v4056_v59, 0.0 }
0x164e   : > { %v2899_v58 = vpop.permute.xlu2 %2898 }
0x164f   : > { %3000 = vxpose.xlu0.b32.start.end [1/1] (short) (narrow) %v2899_v58, 8 }
0x1653   : > { %2876 = vadd.xlane.f32.xlu1 %v2875_v60 }
0x1656   : > { %v2893_v63 = vpop.permute.xlu2 %2892 }
0x1674   : > { %2968 = vxpose.xlu2.b32.start.end [1/1] (short) (narrow) %v2897_v53, 8 }
0x167c   : > { %2936 = vxpose.xlu2.b32.start.end [1/1] (short) (narrow) %v2895_v61, 8 }
0x168d   : > { %2904 = vxpose.xlu1.b32.start.end [1/1] (short) (narrow) %v2893_v63, 8 }
0x16b6   : > { %v2880_v1 = vpop.xlane.xlu2 %2879 }
0x16b7   : > { %4057 = vrcp.f32 %v2880_v1 }
0x16bd   : > { %v4058_v2 = vpop.eup %4057 }
0x16be   : > { %v2874_v3 = vpop.xlane.xlu1 %2873  ;;  %v2890_v5 = vmul.f32 %v4058_v2, %v4050_v52  ;;  %v2883_v6 = vpop.xlane.xlu2 %2882 }
0x16bf   : > { %4059 = vrcp.f32 %v2874_v3 }
0x16c0   : > { %4061 = vrcp.f32 %v2883_v6  ;;  %3807 = vmatpush.xpose.msk.msra.mxu2 %vm644_vm1, %v2890_v5 }
0x16c5   : > { %v4060_v7 = vpop.eup %4059 }
0x16c6   : > { %v4062_v10 = vpop.eup %4061  ;;  %v2888_v11 = vmul.f32 %v4060_v7, %v4054_v55  ;;  %v2877_v12 = vpop.xlane.xlu1 %2876 }
0x16c7   : > { %v2891_v13 = vmul.f32 %v4062_v10, %v4052_v54  ;;  %4063 = vrcp.f32 %v2877_v12 }
0x16c8   : > { %3803 = vmatpush.xpose.msk.msrb.mxu0 %vm644_vm1, %v2888_v11 }
0x16c9   : > { %3809 = vmatpush.xpose.msk.msrb.mxu3 %vm644_vm1, %v2891_v13 }
0x16cd   : > { %v4064_v14 = vpop.eup %4063 }
0x16ce   : > { %v2889_v15 = vmul.f32 %v4064_v14, %v4056_v59 }
0x16d0   : > { %3805 = vmatpush.xpose.msk.msrb.mxu1 %vm644_vm1, %v2889_v15 }
0x16f3   : > { %v3016_v16 = vpop.trf.xlu0 }
0x16f4   : > { %3810 = vmatmul.msk.f32.vlgmr.msrb.gmra.mxu3 %vm644_vm1, %v3016_v16 }
0x170d   : > { %v2984_v17 = vpop.trf.xlu2 }
0x170e   : > { %3808 = vmatmul.msk.f32.vlgmr.msra.gmra.mxu2 %vm644_vm1, %v2984_v17 }
0x1715   : > { %v2952_v18 = vpop.trf.xlu2 }
0x1716   : > { %3806 = vmatmul.msk.f32.vlgmr.msrb.gmra.mxu1 %vm644_vm1, %v2952_v18 }
0x1731   : > { %v2920_v19 = vpop.trf.xlu1 }
0x1732   : > { %3804 = vmatmul.msk.f32.vlgmr.msrb.gmra.mxu0 %vm644_vm1, %v2920_v19 }
0x1777   : > { %v3133_v23 = vpop.f32.mrf.mxu3 }
0x1791   : > { %v3107_v21 = vpop.f32.mrf.mxu2 }
0x1792   : > { %3200 = vxpose.xlu0.b32.start.end [1/1] (short) (narrow) %v3107_v21, 8 }
0x1793   : > { %v3081_v26 = vpop.f32.mrf.mxu1 }
0x179a   : > { %3232 = vxpose.xlu0.b32.start.end [1/1] (short) (narrow) %v3133_v23, 8 }
0x17af   : > { %v3055_v24 = vpop.f32.mrf.mxu0 }
0x17b0   : > { %3136 = vxpose.xlu2.b32.start.end [1/1] (short) (narrow) %v3055_v24, 8 }
0x17b8   : > { %3168 = vxpose.xlu2.b32.start.end [1/1] (short) (narrow) %v3081_v26, 8 }
0x1836   : > { %v3216_v27 = vpop.trf.xlu0 }
0x1837   : > { %v3264_v28 = vrot.slane %v3216_v27, 4 }
0x183e   : > { %v3248_v31 = vpop.trf.xlu0 }
0x183f   : > { %v3276_v36 = vrot.slane %v3248_v31, 4 }
0x1849   : > { %v3152_v29 = vpop.trf.xlu2 }
0x184a   : > { %v3266_v30 = vrot.slane %v3152_v29, 4  ;;  %v3265_v33 = vsel %vm1150_vm2, %v3264_v28, %v3152_v29 }
0x184b   : > { %v3271_v37 = vperm.slane %v3265_v33, %v4528_v22 }
0x184c   : > { %v3267_v34 = vsel %vm1150_vm2, %v3216_v27, %v3266_v30 }
0x184d   : > { %v3275_v38 = vperm.slane %v3267_v34, %v4528_v22  ;;  %v3290_v42 = vrot.slane %v3271_v37, 4 }
0x184f   : > { %v3302_v45 = vrot.slane %v3275_v38, 4 }
0x1851   : > { %v3184_v39 = vpop.trf.xlu2 }
0x1852   : > { %v3277_v40 = vsel %vm1150_vm2, %v3276_v36, %v3184_v39  ;;  %v3278_v41 = vrot.slane %v3184_v39, 4 }
0x1853   : > { %v3283_v43 = vperm.slane %v3277_v40, %v4528_v22  ;;  %v3814_v40 = vld [vmem:[%s5096_s3 + $0x58] sm:$0xff] }
0x1854   : > { %v3279_v44 = vsel %vm1150_vm2, %v3248_v31, %v3278_v41  ;;  %3411 = vmatpush.msra.mxu0 %v3814_v40  ;;  %v3813_v41 = vld [vmem:[%s5096_s3 + $0x50] sm:$0xff] }
0x1855   : > { %v3287_v46 = vperm.slane %v3279_v44, %v4528_v22  ;;  %v3288_v47 = vrot.slane %v3283_v43, 4  ;;  %v3291_v49 = vsel %vm1150_vm2, %v3283_v43, %v3290_v42  ;;  %v3811_v42 = vld [vmem:[%s5096_s3 + $0x40] sm:$0xff] }
0x1856   : > { %v3299_v50 = vperm.slane %v3291_v49, %v4534_v32  ;;  %3412 = vmatpush.msra.mxu0 %v3813_v41 }
0x1857   : > { %v3289_v20 = vsel %vm1150_vm2, %v3288_v47, %v3271_v37  ;;  %v3300_v51 = vrot.slane %v3287_v46, 4  ;;  %v3303_v52 = vsel %vm1150_vm2, %v3287_v46, %v3302_v45 }
0x1858   : > { %v3295_v0 = vperm.slane %v3289_v20, %v4534_v32  ;;  %v3311_v4 = vperm.slane %v3303_v52, %v4534_v32  ;;  %v3314_v53 = vrot.slane %v3299_v50, 4 }
0x1859   : > { %v3301_v54 = vsel %vm1150_vm2, %v3300_v51, %v3275_v38  ;;  %v1474_v38 = vld [vmem:[%s5102_s9 + $0x1] sm:$0x1] }
0x185a   : > { %v3307_v55 = vperm.slane %v3301_v54, %v4534_v32  ;;  %v3312_v56 = vrot.slane %v3295_v0, 4  ;;  %v3315_v57 = vsel %vm1150_vm2, 0.0, %v3314_v53  ;;  %v3318_v58 = vrot.slane %v3311_v4, 4  ;;  %v3992_v4 = vld [vmem:[#allocation5 + $0x12] ss:$0 sm:$0xff] }
0x185b   : > { %v3320_v59 = vsel %vm1150_vm2, %v3314_v53, %v3295_v0  ;;  %v3325_v60 = vrot.slane %v3315_v57, 4  ;;  %v3791_v57 = vld [vmem:[%s5102_s9 + $0x3] sm:$0x1] }
0x185c   : > { %v3313_v61 = vsel %vm1150_vm2, 0.0, %v3312_v56  ;;  %v3316_v63 = vrot.slane %v3307_v55, 4  ;;  %v3319_v1 = vsel %vm1150_vm2, 0.0, %v3318_v58  ;;  %v3324_v2 = vperm.slane %v3320_v59, %v4528_v22 }
0x185d   : > { %v3336_v3 = vrot.slane %v3319_v1, 4  ;;  %v3326_v5 = vsel %vm1150_vm2, %v3325_v60, %v3313_v61  ;;  %v3331_v6 = vsel %vm1150_vm2, %v3318_v58, %v3307_v55  ;;  %v2556_v58 = vadd.f32 %v3791_v57, %v4858_v25 }
0x185e   : > { %v3317_v7 = vsel %vm1150_vm2, 0.0, %v3316_v63  ;;  %v3330_v10 = vperm.slane %v3326_v5, %v4528_v22  ;;  %v3335_v11 = vperm.slane %v3331_v6, %v4528_v22  ;;  %v3344_v12 = vrot.slane %v3324_v2, 4 }
0x185f   : > { %v3337_v13 = vsel %vm1150_vm2, %v3336_v3, %v3317_v7  ;;  %v2558_v59 = vsel %vm1501_vm8, %v2556_v58, -inf }
0x1860   : > { %v3341_v14 = vperm.slane %v3337_v13, %v4528_v22  ;;  %v3345_v15 = vsel %vm1150_vm2, %v3330_v10, %v3344_v12  ;;  %v3356_v16 = vrot.slane %v3335_v11, 4  ;;  %v3342_v17 = vrot.slane %v3330_v10, 4 }
0x1861   : > { %v3353_v18 = vperm.slane %v3345_v15, %v4534_v32  ;;  %v3818_v15 = vld [vmem:[%s5097_s4 + $0x50] sm:$0xff] }
0x1862   : > { %v3357_v19 = vsel %vm1150_vm2, %v3341_v14, %v3356_v16  ;;  %v3343_v21 = vsel %vm1150_vm2, %v3342_v17, %v3324_v2  ;;  %v3354_v23 = vrot.slane %v3341_v14, 4  ;;  %v3819_v14 = vld [vmem:[%s5097_s4 + $0x58] sm:$0xff]  ;;  %v3817_v16 = vld [vmem:[%s5097_s4 + $0x48] sm:$0xff]  ;;  %v3816_v17 = vld [vmem:[%s5097_s4 + $0x40] sm:$0xff] }
0x1863   : > { %v3365_v24 = vperm.slane %v3357_v19, %v4534_v32  ;;  %v3372_v26 = vrot.slane %v3353_v18, 4  ;;  %v3349_v27 = vperm.slane %v3343_v21, %v4534_v32  ;;  %3470 = vmatpush.msra.mxu1 %v3819_v14 }
0x1864   : > { %v3355_v28 = vsel %vm1150_vm2, %v3354_v23, %v3335_v11 }
0x1865   : > { %v3373_v22 = vsel %vm1150_vm2, %v3365_v24, %v3372_v26  ;;  %v3370_v29 = vrot.slane %v3365_v24, 4  ;;  %v3361_v30 = vperm.slane %v3355_v28, %v4534_v32  ;;  %v3368_v31 = vrot.slane %v3349_v27, 4  ;;  %3471 = vmatpush.msra.mxu1 %v3818_v15 }
0x1866   : > { %3383 = vrot.lane.b32.xlu1 %v3373_v22, %s5140_s12  ;;  %v4928_v32 = vadd.f32 %v4693_v35, %v1474_v38  ;;  %v3812_v35 = vld [vmem:[%s5096_s3 + $0x48] sm:$0xff]  ;;  %s3568_s12 = scalar_lea.hbm %s5103_s10, %s3832_s15  ;;  %s4190_s15 = scalar_lea.hbm %s4189_s26, 2 }
0x1867   : > { %v3371_v33 = vsel %vm1150_vm2, %v3370_v29, %v3353_v18  ;;  %v3366_v34 = vrot.slane %v3361_v30, 4  ;;  %v3369_v36 = vsel %vm1150_vm2, %v3361_v30, %v3368_v31  ;;  %3413 = vmatpush.msra.mxu0 %v3812_v35  ;;  %3472 = vmatpush.msra.mxu1 %v3817_v16  ;;  %v3993_v31 = vld [vmem:[#allocation5 + $0x13] ss:$0 sm:$0xff]  ;;  %s3571_s24 = sshll.u32 %s3568_s12, 4  ;;  %p4191_p3 = scmp.ne.s32.totalorder %s4189_s26, %s4190_s15  ;;  %s5042_s24 = int_to_ptr.hbm [resolvable:$true] %s3571_s24 }
0x1868   : > { %3379 = vrot.lane.b32.xlu2 %v3371_v33, %s5139_s21  ;;  %3375 = vrot.lane.b32.xlu0 %v3369_v36, %s5141_s23  ;;  %v1502_v39 = vsel %vm1501_vm8, %v4928_v32, -inf  ;;  %p4196_p8 = scmp.lt.s32.totalorder %s4194_s25, %s4190_s15 }
0x1869   : > { %v3367_v37 = vsel %vm1150_vm2, %v3366_v34, %v3349_v27  ;;  %3414 = vmatpush.msra.mxu0 %v3811_v42  ;;  %3473 = vmatpush.msra.mxu1 %v3816_v17  ;;  %v3828_v42 = vld [vmem:[%s5098_s5 + $0xb8] sm:$0xff]  ;;  %p4192_p5 = pnand %p4191_p3, %p4425_p4 }
0x186a   : > { %3509 = vmatpush.msrb.mxu2 %v3828_v42  ;;  %p4197_p9 = por %p4196_p8, %p4195_p7 }
0x186b   : > { %p4193_p12 = pneg %p4192_p5 }
0x186d   : > { %p4198_p10 = pnand %p4197_p9, %p4193_p12 }
0x1891   : > { %1503 = vmax.xlane.f32.xlu2 %v1502_v39 }
0x18c2   : > { %v3380_v44 = vpop.permute.xlu2 %3379 }
0x18d8   : > { %v3384_v46 = vpop.permute.xlu1 %3383 }
0x18da   : > { %v3376_v43 = vpop.permute.xlu0 %3375 }
0x18db   : > { %v3386_v45 = vsel %vm644_vm1, %v3367_v37, %v3376_v43  ;;  %v3994_v37 = vld [vmem:[#allocation5 + $0x14] ss:$0 sm:$0xff]  ;;  %v3827_v43 = vld [vmem:[%s5098_s5 + $0xb0] sm:$0xff] }
0x18dc   : > { %v3387_v47 = vsel %vm1273_vm3, %v3386_v45, %v3380_v44  ;;  %3510 = vmatpush.msrb.mxu2 %v3827_v43  ;;  %v3826_v45 = vld [vmem:[%s5098_s5 + $0xa8] sm:$0xff] }
0x18dd   : > { %v3388_v49 = vsel %vm1275_vm4, %v3387_v47, %v3384_v46  ;;  %v3825_v46 = vld [vmem:[%s5098_s5 + $0xa0] sm:$0xff]  ;;  %vm1526_vm4 = vcmask 285696  }
0x18de   : > { %3815 = vmatmul.msk.f32.vlgmr.msra.gmra.mxu0 %vm470_vm0, %v3388_v49  ;;  %3511 = vmatpush.msrb.mxu2 %v3826_v45  ;;  %v3824_v49 = vld [vmem:[%s5098_s5 + $0x98] sm:$0xff] }
0x18e0   : > { %3512 = vmatpush.msrb.mxu2 %v3825_v46 }
0x18e2   : > { %3513 = vmatpush.msrb.mxu2 %v3824_v49 }
0x1904   : > { %v4948_v50 = vpop.xlane.xlu2 %1503 }
0x1905   : > { %v1505_v20 = vsub.f32 %v4928_v32, %v4948_v50 }
0x1907   : > { %v1506_v51 = vmul.f32 1.442695, %v1505_v20  ;;  %v3823_v20 = vld [vmem:[%s5098_s5 + $0x90] sm:$0xff] }
0x1908   : > { %3514 = vmatpush.msrb.mxu2 %v3823_v20 }
0x1909   : > { %4065 = vpow2.f32 %v1506_v51 }
0x190f   : > { %v4066_v52 = vpop.eup %4065 }
0x1910   : > { %v1508_v0 = vsel %vm1501_vm8, %v4066_v52, 0.0 }
0x1911   : > { %1509 = vadd.xlane.f32.xlu2 %v1508_v0  ;;  %v3822_v0 = vld [vmem:[%s5098_s5 + $0x88] sm:$0xff] }
0x1912   : > { %3515 = vmatpush.msrb.mxu2 %v3822_v0 }
0x195b   : > { %v3416_v53 = vpop.f32.mrf.mxu0 }
0x195c   : > { %v3417_v54 = vadd.f32 %v3992_v4, %v3416_v53 }
0x195e   : > { %v3419_v55 = vadd.f32 %v3417_v54, %v4829_v62  ;;  %v3821_v54 = vld [vmem:[%s5098_s5 + $0x80] sm:$0xff] }
0x195f   : > { %3516 = vmatpush.msrb.mxu2 %v3821_v54 }
0x1960   : > { %v3422_v56 = vsel %vm470_vm0, %v3419_v55, 0.0 }
0x1961   : > { %3423 = vadd.xlane.f32.xlu1 %v3422_v56 }
0x1969   : > { %2559 = vmax.xlane.f32.xlu1 %v2558_v59 }
0x1984   : > { %v4960_v60 = vpop.xlane.xlu2 %1509 }
0x1985   : > { %4067 = vrcp.f32 %v4960_v60 }
0x198b   : > { %v4068_v61 = vpop.eup %4067 }
0x198c   : > { %v1515_v63 = vmul.f32 %v4068_v61, %v4066_v52 }
0x198e   : > { %v1516_v62 = vmul.f32 %v1515_v63, %v4928_v32 }
0x1990   : > { %v1517_v1 = vsel %vm1501_vm8, %v1516_v62, 0.0 }
0x1991   : > { %1518 = vadd.xlane.f32.xlu2 %v1517_v1 }
0x19a9   : > { %2578 = vrot.lane.b32.xlu2 %v2556_v58, %s4293_s6 }
0x19d4   : > { %v3424_v2 = vpop.xlane.xlu1 %3423 }
0x19d5   : > { %v3425_v25 = vmul.f32 %v3424_v2, %v4593_v48 }
0x19d7   : > { %v3426_v3 = vsub.f32 %v3419_v55, %v3425_v25 }
0x19d9   : > { %v3427_v5 = vmul.f32 %v3426_v3, %v3426_v3 }
0x19db   : > { %v3428_v6 = vsel %vm470_vm0, %v3427_v5, 0.0 }
0x19dc   : > { %3429 = vadd.xlane.f32.xlu0 %v3428_v6  ;;  %v2560_v7 = vpop.xlane.xlu1 %2559 }
0x19dd   : > { %v2561_v10 = vsub.f32 %v2556_v58, %v2560_v7 }
0x19df   : > { %v2562_v11 = vmul.f32 1.442695, %v2561_v10 }
0x19e1   : > { %4069 = vpow2.f32 %v2562_v11 }
0x19e7   : > { %v4070_v12 = vpop.eup %4069 }
0x19e8   : > { %v2564_v13 = vsel %vm1501_vm8, %v4070_v12, 0.0 }
0x19e9   : > { %2565 = vadd.xlane.f32.xlu0 %v2564_v13 }
0x1a04   : > { %v4984_v35 = vpop.xlane.xlu2 %1518 }
0x1a0c   : > { %v2579_v51 = vpop.permute.xlu2 %2578 }
0x1a0d   : > { %v2581_v55 = vsel %vm470_vm0, %v4845_v8, %v2579_v51 }
0x1a4f   : > { %v3430_v18 = vpop.xlane.xlu0 %3429 }
0x1a50   : > { %v3431_v19 = vmul.f32 %v3430_v18, %v4593_v48 }
0x1a52   : > { %v3432_v21 = vadd.f32 1e-12, %v3431_v19 }
0x1a54   : > { %4071 = vrsqrt.f32 %v3432_v21  ;;  %vm3439_vm2 = vweird.f32 %v3432_v21 }
0x1a5a   : > { %v4072_v23 = vpop.eup %4071 }
0x1a5b   : > { %v3434_v24 = vmul.f32 %v4072_v23, %v3432_v21  ;;  %vm3440_vm1 = vweird.f32 %v4072_v23 }
0x1a5c   : > { %v2566_v26 = vpop.xlane.xlu0 %2565  ;;  %vm3441_vm3 = vmor %vm3439_vm2, %vm3440_vm1 }
0x1a5d   : > { %v3435_v27 = vmul.f32 %v4072_v23, %v3434_v24  ;;  %4073 = vrcp.f32 %v2566_v26 }
0x1a5e   : > { %4075 = vlog2.f32 %v2566_v26 }
0x1a5f   : > { %v3436_v28 = vmul.f32 0.5, %v3435_v27 }
0x1a61   : > { %v3437_v22 = vsub.f32 1.5, %v3436_v28 }
0x1a63   : > { %v3438_v29 = vmul.f32 %v4072_v23, %v3437_v22  ;;  %v4074_v30 = vpop.eup %4073 }
0x1a64   : > { %v2571_v34 = vmul.f32 %v4074_v30, %v4070_v12  ;;  %v4076_v44 = vpop.eup %4075 }
0x1a65   : > { %v3442_v33 = vsel %vm3441_vm3, %v4072_v23, %v3438_v29  ;;  %v2568_v47 = vmul.f32 0.6931472, %v4076_v44 }
0x1a66   : > { %v3443_v36 = vmul.f32 %v3442_v33, %v3426_v3  ;;  %v2572_v38 = vmul.f32 %v2571_v34, %v2556_v58  ;;  %v3995_v58 = vld [vmem:[#allocation5 + $0x11] ss:$0 sm:$0xff]  ;;  %v3998_v33 = vld [vmem:[#allocation5 + $0x17] ss:$0 sm:$0xff] }
0x1a67   : > { %v2569_v52 = vadd.f32 %v2568_v47, %v2560_v7  ;;  %v3996_v7 = vld [vmem:[#allocation5 + $0x15] ss:$0 sm:$0xff] }
0x1a68   : > { %v3445_v39 = vmul.f32 %v3993_v31, %v3443_v36  ;;  %v2573_v40 = vsel %vm1501_vm8, %v2572_v38, 0.0 }
0x1a69   : > { %2574 = vadd.xlane.f32.xlu0 %v2573_v40 }
0x1a6a   : > { %v3447_v41 = vadd.f32 %v3994_v37, %v3445_v39 }
0x1a6c   : > { %3820 = vmatmul.msk.f32.vlgmr.msra.gmra.mxu1 %vm470_vm0, %v3447_v41 }
0x1adc   : > { %v2575_v4 = vpop.xlane.xlu0 %2574 }
0x1add   : > { %v2576_v53 = vsub.f32 %v2569_v52, %v2575_v4 }
0x1adf   : > { %v2582_v56 = vsel %vm1526_vm4, %v2581_v55, %v2576_v53 }
0x1ae0   : > { %v2583_v57 = vsel %vm1528_vm10, %v2582_v56, 0.0 }
0x1ae1   : > { %2584 = vst [vmem:[%s5015_s13 + $0x1] sm:$0x1] %v2583_v57 }
0x1ae9   : > { %v3475_v59 = vpop.f32.mrf.mxu1 }
0x1aea   : > { %v3476_v61 = vadd.f32 %v3995_v58, %v3475_v59 }
0x1aec   : > { %v3479_v63 = vmul.f32 0.044715, %v3476_v61  ;;  %v3478_v3 = vmul.f32 0.5, %v3476_v61 }
0x1aee   : > { %v3480_v62 = vmul.f32 %v3479_v63, %v3476_v61 }
0x1af0   : > { %v3481_v1 = vmul.f32 %v3480_v62, %v3476_v61 }
0x1af2   : > { %v3482_v2 = vadd.f32 %v3481_v1, %v3476_v61 }
0x1af4   : > { %v3483_v25 = vmul.f32 0.7978846, %v3482_v2 }
0x1af6   : > { %4077 = vtanh.f32 %v3483_v25 }
0x1afc   : > { %v4078_v8 = vpop.eup %4077 }
0x1afd   : > { %v3485_v5 = vadd.f32 1.0, %v4078_v8 }
0x1aff   : > { %v3486_v6 = vmul.f32 %v3485_v5, %v3478_v3 }
0x1b01   : > { %3829 = vmatmul.msk.f32.vlgmr.msrb.gmra.mxu2 %vm1390_vm9, %v3486_v6 }
0x1b84   : > { %v3518_v10 = vpop.f32.mrf.mxu2 }
0x1b85   : > { %v3519_v11 = vadd.f32 %v3996_v7, %v3518_v10 }
0x1b87   : > { %v3521_v12 = vadd.f32 %v3519_v11, %v3447_v41 }
0x1b89   : > { %v3524_v13 = vsel %vm470_vm0, %v3521_v12, 0.0 }
0x1b8a   : > { %3525 = vadd.xlane.f32.xlu1 %v3524_v13 }
0x1bfd   : > { %v3526_v14 = vpop.xlane.xlu1 %3525 }
0x1bfe   : > { %v3527_v15 = vmul.f32 %v3526_v14, %v4593_v48 }
0x1c00   : > { %v3528_v16 = vsub.f32 %v3521_v12, %v3527_v15 }
0x1c02   : > { %v3529_v17 = vmul.f32 %v3528_v16, %v3528_v16 }
0x1c04   : > { %v3530_v18 = vsel %vm470_vm0, %v3529_v17, 0.0 }
0x1c05   : > { %3531 = vadd.xlane.f32.xlu1 %v3530_v18 }
0x1c1e   : > { %1522 = vrot.lane.b32.xlu1 %v4928_v32, %s4293_s6  ;;  %v3997_v32 = vld [vmem:[#allocation5 + $0x16] ss:$0 sm:$0xff] }
0x1c78   : > { %v3532_v19 = vpop.xlane.xlu1 %3531 }
0x1c79   : > { %v3533_v21 = vmul.f32 %v3532_v19, %v4593_v48 }
0x1c7b   : > { %v3534_v23 = vadd.f32 1e-12, %v3533_v21 }
0x1c7d   : > { %4079 = vrsqrt.f32 %v3534_v23  ;;  %vm3541_vm11 = vweird.f32 %v3534_v23 }
0x1c7e   : > { %4081 = vlog2.f32 %v4960_v60 }
0x1c83   : > { %v4080_v24 = vpop.eup %4079 }
0x1c84   : > { %v3536_v26 = vmul.f32 %v4080_v24, %v3534_v23  ;;  %v4082_v28 = vpop.eup %4081  ;;  %vm3542_vm9 = vweird.f32 %v4080_v24 }
0x1c85   : > { %v1512_v29 = vmul.f32 0.6931472, %v4082_v28  ;;  %vm3543_vm12 = vmor %vm3541_vm11, %vm3542_vm9 }
0x1c86   : > { %v3537_v27 = vmul.f32 %v4080_v24, %v3536_v26 }
0x1c87   : > { %v1513_v60 = vadd.f32 %v1512_v29, %v4948_v50 }
0x1c88   : > { %v3538_v22 = vmul.f32 0.5, %v3537_v27 }
0x1c89   : > { %v1520_v36 = vsub.f32 %v1513_v60, %v4984_v35 }
0x1c8a   : > { %v3539_v30 = vsub.f32 1.5, %v3538_v22 }
0x1c8c   : > { %v3540_v48 = vmul.f32 %v4080_v24, %v3539_v30 }
0x1c8e   : > { %v3544_v31 = vsel %vm3543_vm12, %v4080_v24, %v3540_v48 }
0x1c8f   : > { %v3545_v34 = vmul.f32 %v3544_v31, %v3528_v16 }
0x1c90   : > { %v1523_v37 = vpop.permute.xlu1 %1522 }
0x1c91   : > { %v3547_v38 = vmul.f32 %v3997_v32, %v3545_v34  ;;  %v1525_v39 = vsel %vm470_vm0, %v4671_v9, %v1523_v37 }
0x1c92   : > { %v1527_v50 = vsel %vm1526_vm4, %v1525_v39, %v1520_v36 }
0x1c93   : > { %v3549_v40 = vadd.f32 %v3998_v33, %v3547_v38  ;;  %v1529_v41 = vsel %vm1528_vm10, %v1527_v50, 0.0 }
0x1c94   : > { %1530 = vst [vmem:[%s5015_s13] sm:$0x1] %v1529_v41 }
0x1c95   : > { %3830 = vst.msk [vmem:[%s4655_s22 + $0x10] sm:$0xff] %vm470_vm0, %v3549_v40 }
0x1c96   : > { %4201 = shalt.err (!%p4198_p10)
}
0x1c97   : > { %3848 = dma.vmem_to_hbm [thread:$0]  (%p4425_p4), %s3587_s28, 32, %s3589_s0, %s3558_s14  }
0x1c98   : > { %s3553_s22 = scalar_lea.sflag [#allocation4], %s4456_s27  ;;  %s4216_s13 = sshra.s32 %s5042_s24, 4  ;;  %s4217_s13 = int_to_ptr.hbm [resolvable:$true] %s4216_s13 }
0x1c99   : > { %s4218_s21 = scalar_lea.hbm %s4217_s13, 24  ;;  %s4222_s15 = scalar_lea.hbm %s5103_s10, 48 }
0x1c9a   : > { %p4219_p13 = scmp.ne.s32.totalorder %s4217_s13, %s4218_s21  ;;  %p4223_p2 = scmp.lt.s32.totalorder %s4217_s13, %s5103_s10 }
0x1c9b   : > { %p4224_p1 = scmp.lt.s32.totalorder %s4222_s15, %s4218_s21 }
0x1c9c   : > { %p4220_p11 = pnand %p4219_p13, %p4425_p4 }
0x1c9d   : > { %p4225_p3 = por %p4224_p1, %p4223_p2 }
0x1c9e   : > { %p4221_p0 = pneg %p4220_p11 }
0x1ca0   : > { %p4226_p5 = pnand %p4225_p3, %p4221_p0 }
0x1ca2   : > { %4229 = shalt.err (!%p4226_p5)
}
0x1ca3   : > { %s4294_s27 = smov 128   ;;  %s4295_s28 = smov 256  }
0x1ca4   : > { %3847 = dma.vmem_to_hbm [thread:$0]  (%p4425_p4), %s5038_s19, 384, %s5042_s24, %s3553_s22, %s4294_s27, %s4295_s28, %s5141_s23  }
0x1ca5 PF: > { %s3600_s14 = sand.u32 1, %s4264_s17   ;;  %p5147_p12 = scmp.ge.s32.totalorder %s4276_s20, 2 }
0x1ca6   : > { %s3601_s25 = scalar_lea.sflag [#allocation4], %s3600_s14 }
0x1ca7   : > { %p3863_p7 = pnand %p5147_p12, %p4429_p6 }
0x1ca9   : > { %p3864_p8 = pneg %p3863_p7 }
0x1cab   : > { %4255 = dma.done.wait (%p3864_p8), %s3601_s25, 384  }
0x1cac   : > { %4257 = vsyncadd (%p3864_p8), %s3601_s25, 4294966912  ;;  %s3611_s12 = scalar_lea.sflag [#allocation10], %s3600_s14 }
0x1cad   : > { %4259 = dma.done.wait (%p3864_p8), %s3611_s12, 32  }
0x1cae   : > { %4261 = vsyncadd (%p3864_p8), %s3611_s12, 4294967264  ;;  %s5148_s20 = sld [smem:[#allocation16_spill]]  ;;  %s5151_s17 = smov %s4268_s18 }
0x1caf   : > { %s5149_s30 = sld [smem:[#allocation15_spill]] }
0x1cb0   : > { %s5150_s19 = sld [smem:[#allocation17_spill]] }
0x1cb4   : > { %p29_p4 = scmp.ge.s32.totalorder %s5148_s20, 4  }
0x1cb5   : > { %s5152_s18 = smov %s5149_s30 }
0x1cb6   :  { %31 = sbr.rel (!%p29_p4) target bundleno = 12 (0xc), region = 148 }
0x1cbb   :  { %3617 = vsyncpa [#allocation3], 1 }
0x1cbc   :  { %3619 = vsyncpa [#allocation3 + $0x1], 1 }
0x1cbd   :  { %3620 = vsyncpa [#allocation6], 1 }
0x1cbe   :  { %3621 = vsyncpa [#allocation4], 1 }
0x1cbf   :  { %3623 = vsyncpa [#allocation4 + $0x1], 1 }
0x1cc0   :  { %3624 = vsyncpa [#allocation10], 1 }
0x1cc1   :  { %3626 = vsyncpa [#allocation10 + $0x1], 1 }

</bundles_post_ra>
